<compile_context>
chip_gen: v7x
topology: tpu7x:2x2x1
jax: 0.10.0
libtpu: 0.0.40
codegen_flags: <defaults>
</compile_context>

<pallas_src>
import jax
import jax.numpy as jnp
from jax.experimental import pallas as pl
from jax.experimental.pallas import tpu as pltpu


F_PAD = 128            # lane-dense feature width used for every padded slab
NEG = -1.0e9           # bias value in padded lanes -> exp underflows to exactly 0
_APPROX_RECIP = False  # True would use the EUP approx path (loosens the 1e-5 match)


# ----------------------------- Pallas kernel --------------------------------

def _softmax_lanes(x):
    """Row softmax over all 128 lanes; padded lanes carry -1e9 logits -> 0."""
    m = jnp.max(x, axis=-1, keepdims=True)
    e = jnp.exp(x - m)
    s = jnp.sum(e, axis=-1, keepdims=True)
    return e * pl.reciprocal(s, approx=_APPROX_RECIP)


def ae_kg_kernel(inp_ref, w01_ref, w_ref, b_ref, out_ref):
    """One batch tile of the full 4-layer forward pass.

    inp_ref : (BT, 128)      [num | cat | zeros] per row
    w01_ref : (128, 256)     fused weights: cols [0,128) cat->x logits,
                             cols [128,256) num->encoder logits
    w_ref   : (3, 128, 128)  packed, zero-padded weights (x->h, h->d, d->y)
    b_ref   : (5, 128)       rows 0..3 biases (NEG in padded lanes),
                             row 4 = lane mask selecting decoder[:, :N]
    out_ref : (BT, 128)      lanes [0,N) = decoder[:N], lanes [N,N+C) = decoder_cat
    """
    f32 = jnp.float32
    inp = inp_ref[...]
    b = b_ref[...]

    # One fused MXU pass for both matmuls whose LHS is the packed input row.
    t = jnp.dot(inp, w01_ref[...], preferred_element_type=f32)        # (BT, 256)

    # encoder_cat: softmax(cat @ W_ec + b_ec)
    x = _softmax_lanes(t[:, :F_PAD] + b[0:1, :])

    # encoder: softmax(concat(num, x) @ W_e + b_e) as a split matmul
    h = _softmax_lanes(t[:, F_PAD:]
                       + jnp.dot(x, w_ref[0], preferred_element_type=f32)
                       + b[1:2, :])

    # decoder: softmax(h @ W_d + b_d)
    d = _softmax_lanes(jnp.dot(h, w_ref[1], preferred_element_type=f32) + b[2:3, :])

    # decoder_cat on d[:, N:E]; its weight columns / bias are pre-placed in
    # lanes [N, N+C), so y already sits at its final output lanes (0 elsewhere).
    y = _softmax_lanes(jnp.dot(d, w_ref[2], preferred_element_type=f32) + b[3:4, :])

    # fused lane-dense output: lanes [0,N) <- d (mask row), lanes [N,N+C) <- y.
    out_ref[...] = d * b[4:5, :] + y


# --------------------------- parameter packing --------------------------------

def prepare_params(params, num_feature_size):
    """One-time packing of all weights/biases into lane-dense slabs."""
    N = num_feature_size
    C, R = params["w_enc_cat"].shape
    E = N + R
    H = params["w_enc"].shape[1]
    assert max(N + C, E, H) <= F_PAD

    # Fused weight for the two matmuls whose LHS is the packed [num|cat|0] row.
    w01 = jnp.zeros((F_PAD, 2 * F_PAD), jnp.float32)
    w01 = w01.at[N:N + C, :R].set(params["w_enc_cat"])              # cat -> x logits
    w01 = w01.at[:N, F_PAD:F_PAD + H].set(params["w_enc"][:N, :])   # num -> h logits

    w = jnp.zeros((3, F_PAD, F_PAD), jnp.float32)
    w = w.at[0, :R, :H].set(params["w_enc"][N:, :])                 # x_cat     -> h logits
    w = w.at[1, :H, :E].set(params["w_dec"])                        # h         -> d logits
    w = w.at[2, N:E, N:N + C].set(params["w_dec_cat"])              # d[:, N:E] -> y logits
                                                                    # (cols pre-shifted to [N,N+C))

    b = jnp.full((5, F_PAD), NEG, jnp.float32)
    b = b.at[0, :R].set(params["b_enc_cat"])
    b = b.at[1, :H].set(params["b_enc"])
    b = b.at[2, :E].set(params["b_dec"])
    b = b.at[3, N:N + C].set(params["b_dec_cat"])
    # row 4: 0/1 lane mask selecting decoder[:, :N] in the fused output
    b = b.at[4, :].set((jnp.arange(F_PAD) < N).astype(jnp.float32))
    return w01, w, b


# ------------------------------- wrapper -------------------------------------

def _round_up(x, m):
    return (x + m - 1) // m * m


def _choose_tiling(batch, block_b):
    """Pick (tile, padded_batch) with minimal slack; >=2 grid steps when possible
    so the 'parallel' batch axis uses both TensorCores on v7x."""
    b8 = _round_up(max(batch, 1), 8)
    steps = -(-b8 // block_b)                 # ceil
    if steps == 1 and b8 >= 16:
        steps = 2
    bt = _round_up(-(-b8 // steps), 8)
    return bt, steps * bt


def autoencoder_kg_forward(prepared, cat_vector, num_vector, *, block_b=1024):
    """Replicates AutoEncoderKG.forward. Accepts 1-D vectors or (B, F) batches."""
    w01, w_slab, b_slab = prepared
    single = cat_vector.ndim == 1
    cat = jnp.atleast_2d(cat_vector).astype(jnp.float32)   # (B, C)
    num = jnp.atleast_2d(num_vector).astype(jnp.float32)   # (B, N)
    B = cat.shape[0]
    N = num.shape[-1]
    C = cat.shape[-1]

    bt, Bp = _choose_tiling(B, block_b)

    # fused lane-dense input slab: [num | cat | 0-pad] -> (Bp, 128)
    # (allow_input_fusion lets XLA fold this pad/concat into the pallas_call)
    inp = jnp.pad(jnp.concatenate([num, cat], axis=-1),
                  ((0, Bp - B), (0, F_PAD - N - C)))

    out = pl.pallas_call(
        ae_kg_kernel,
        out_shape=jax.ShapeDtypeStruct((Bp, F_PAD), jnp.float32),
        grid=(Bp // bt,),
        in_specs=[
            pl.BlockSpec((bt, F_PAD), lambda i: (i, 0)),
            pl.BlockSpec((F_PAD, 2 * F_PAD), lambda i: (0, 0)),
            pl.BlockSpec((3, F_PAD, F_PAD), lambda i: (0, 0, 0)),
            pl.BlockSpec((5, F_PAD), lambda i: (0, 0)),
        ],
        out_specs=pl.BlockSpec((bt, F_PAD), lambda i: (i, 0)),
        compiler_params=pltpu.CompilerParams(
            dimension_semantics=("parallel",),
            allow_input_fusion=[True, False, False, False],
            vmem_limit_bytes=32 * 1024 * 1024),
    )(inp, w01, w_slab, b_slab)

    result = out[:B, :N + C]
    return result[0] if single else result


# --------------------------- parameter setup ---------------------------------

def xavier_uniform(key, fan_in, fan_out):
    bound = (6.0 / (fan_in + fan_out)) ** 0.5
    return jax.random.uniform(key, (fan_in, fan_out), jnp.float32, -bound, bound)


def init_params(key, num_feature_size, cat_feature_size):
    N, C = num_feature_size, cat_feature_size
    R = int(C * 3 / 4)
    E = N + R
    H = int(E * 3 / 4)
    ks = jax.random.split(key, 6)
    # "pretrained" categorical weights (synthetic, deterministic)
    w_enc_cat = jax.random.normal(ks[0], (C, R), jnp.float32) * 0.1
    b_enc_cat = jax.random.uniform(ks[1], (R,), jnp.float32,
                                   -1.0 / C ** 0.5, 1.0 / C ** 0.5)
    return {
        "w_enc_cat": w_enc_cat,
        "b_enc_cat": b_enc_cat,
        "w_enc": xavier_uniform(ks[2], E, H),
        "b_enc": jnp.zeros((H,), jnp.float32),
        "w_dec": xavier_uniform(ks[3], H, E),
        "b_dec": jnp.zeros((E,), jnp.float32),
        "w_dec_cat": xavier_uniform(ks[4], R, C),
        "b_dec_cat": jnp.zeros((C,), jnp.float32),
    }


# --------------------------- pure-JAX reference -------------------------------

def reference_forward(params, cat_vector, num_vector):
    N = num_vector.shape[-1]
    sm = jax.nn.softmax
    x = sm(cat_vector @ params["w_enc_cat"] + params["b_enc_cat"], axis=-1)
    z = jnp.concatenate([num_vector, x], axis=-1)
    h = sm(z @ params["w_enc"] + params["b_enc"], axis=-1)
    d = sm(h @ params["w_dec"] + params["b_dec"], axis=-1)
    y = sm(d[..., N:] @ params["w_dec_cat"] + params["b_dec_cat"], axis=-1)
    return jnp.concatenate([d[..., :N], y], axis=-1)


# TODO(synk): save()/load() (torch checkpoint I/O) and the detach().numpy()
# round-trip in forward() are framework glue with no Pallas equivalent.


if __name__ == "__main__":
    NUM_FEATURE_SIZE = 4
    CAT_FEATURE_SIZE = 16
    BATCH = 512

    key = jax.random.PRNGKey(0)
    kp, kc, kn = jax.random.split(key, 3)
    params = init_params(kp, NUM_FEATURE_SIZE, CAT_FEATURE_SIZE)
    prepared = prepare_params(params, NUM_FEATURE_SIZE)   # hoisted, run once

    cat = jax.random.uniform(kc, (BATCH, CAT_FEATURE_SIZE), jnp.float32)
    num = jax.random.uniform(kn, (BATCH, NUM_FEATURE_SIZE), jnp.float32)

    fwd = jax.jit(autoencoder_kg_forward, static_argnames=("block_b",))

    # batched path
    out = jax.block_until_ready(fwd(prepared, cat, num))
    ref = reference_forward(params, cat, num)
    assert out.shape == (BATCH, NUM_FEATURE_SIZE + CAT_FEATURE_SIZE)
    assert jnp.allclose(out, ref, atol=1e-5, rtol=1e-5)

    # single-vector path (original module signature)
    out1 = jax.block_until_ready(fwd(prepared, cat[0], num[0]))
    ref1 = reference_forward(params, cat[0], num[0])
    assert out1.shape == (NUM_FEATURE_SIZE + CAT_FEATURE_SIZE,)
    assert jnp.allclose(out1, ref1, atol=1e-5, rtol=1e-5)

    print("KERNEL_OK")
</pallas_src>

<mosaic_0001>
module attributes {stable_mosaic.version = 11 : i64} {
  func.func @ae_kg_kernel(%arg0: i32, %arg1: memref<256x128xf32, #tpu.memory_space<vmem>>, %arg2: memref<128x256xf32, #tpu.memory_space<vmem>>, %arg3: memref<3x128x128xf32, #tpu.memory_space<vmem>>, %arg4: memref<5x128xf32, #tpu.memory_space<vmem>>, %arg5: memref<256x128xf32, #tpu.memory_space<vmem>>) attributes {dimension_semantics = [#tpu.dimension_semantics<parallel>], iteration_bounds = array<i64: 2>, scalar_prefetch = 0 : i64, scratch_operands = 0 : i64, tpu.core_type = #tpu.core_type<tc>, window_params = [{transform_indices = @transform_0, window_bounds = array<i64: 256, 128>}, {pipeline_mode = #tpu.pipeline_mode<synchronous>, transform_indices = @transform_1, window_bounds = array<i64: 128, 256>}, {pipeline_mode = #tpu.pipeline_mode<synchronous>, transform_indices = @transform_2, window_bounds = array<i64: 3, 128, 128>}, {pipeline_mode = #tpu.pipeline_mode<synchronous>, transform_indices = @transform_3, window_bounds = array<i64: 5, 128>}, {transform_indices = @transform_4, window_bounds = array<i64: 256, 128>}]} {
    %c0 = arith.constant 0 : index
    %c0_0 = arith.constant 0 : index
    %0 = vector.load %arg1[%c0, %c0_0] : memref<256x128xf32, #tpu.memory_space<vmem>>, vector<256x128xf32>
    %c0_1 = arith.constant 0 : index
    %c0_2 = arith.constant 0 : index
    %1 = vector.load %arg4[%c0_1, %c0_2] : memref<5x128xf32, #tpu.memory_space<vmem>>, vector<5x128xf32>
    %c0_3 = arith.constant 0 : index
    %c0_4 = arith.constant 0 : index
    %2 = vector.load %arg2[%c0_3, %c0_4] : memref<128x256xf32, #tpu.memory_space<vmem>>, vector<128x256xf32>
    %cst = arith.constant dense<0.000000e+00> : vector<256x256xf32>
    %3 = tpu.matmul %0, %2, %cst {dimension_numbers = #tpu.dot_dimension_numbers<[1], [0], [0], [1], [0, 0, 1, 1], [], []>} : vector<256x128xf32>, vector<128x256xf32>, vector<256x256xf32> -> vector<256x256xf32>
    %4 = vector.extract_strided_slice %3 {offsets = [0, 0], sizes = [256, 128], strides = [1, 1]} : vector<256x256xf32> to vector<256x128xf32>
    %5 = vector.extract_strided_slice %1 {offsets = [0, 0], sizes = [1, 128], strides = [1, 1]} : vector<5x128xf32> to vector<1x128xf32>
    %6 = vector.broadcast %5 : vector<1x128xf32> to vector<256x128xf32>
    %7 = arith.addf %4, %6 : vector<256x128xf32>
    %cst_5 = arith.constant dense<0xFF800000> : vector<256xf32>
    %8 = vector.multi_reduction <maximumf>, %7, %cst_5 [1] : vector<256x128xf32> to vector<256xf32>
    %9 = vector.shape_cast %8 : vector<256xf32> to vector<256x1xf32>
    %10 = vector.broadcast %9 : vector<256x1xf32> to vector<256x128xf32>
    %11 = arith.subf %7, %10 : vector<256x128xf32>
    %12 = math.exp %11 : vector<256x128xf32>
    %cst_6 = arith.constant dense<0.000000e+00> : vector<256xf32>
    %13 = vector.multi_reduction <add>, %12, %cst_6 [1] : vector<256x128xf32> to vector<256xf32>
    %14 = vector.shape_cast %13 : vector<256xf32> to vector<256x1xf32>
    %15 = tpu.reciprocal %14 : vector<256x1xf32> -> vector<256x1xf32>
    %16 = vector.broadcast %15 : vector<256x1xf32> to vector<256x128xf32>
    %17 = arith.mulf %12, %16 : vector<256x128xf32>
    %18 = vector.extract_strided_slice %3 {offsets = [0, 128], sizes = [256, 128], strides = [1, 1]} : vector<256x256xf32> to vector<256x128xf32>
    %c0_7 = arith.constant 0 : index
    %c0_8 = arith.constant 0 : index
    %c0_9 = arith.constant 0 : index
    %19 = vector.load %arg3[%c0_7, %c0_8, %c0_9] : memref<3x128x128xf32, #tpu.memory_space<vmem>>, vector<1x128x128xf32>
    %20 = vector.shape_cast %19 : vector<1x128x128xf32> to vector<128x128xf32>
    %cst_10 = arith.constant dense<0.000000e+00> : vector<256x128xf32>
    %21 = tpu.matmul %17, %20, %cst_10 {dimension_numbers = #tpu.dot_dimension_numbers<[1], [0], [0], [1], [0, 0, 1, 1], [], []>} : vector<256x128xf32>, vector<128x128xf32>, vector<256x128xf32> -> vector<256x128xf32>
    %22 = arith.addf %18, %21 : vector<256x128xf32>
    %23 = vector.extract_strided_slice %1 {offsets = [1, 0], sizes = [1, 128], strides = [1, 1]} : vector<5x128xf32> to vector<1x128xf32>
    %24 = vector.broadcast %23 : vector<1x128xf32> to vector<256x128xf32>
    %25 = arith.addf %22, %24 : vector<256x128xf32>
    %cst_11 = arith.constant dense<0xFF800000> : vector<256xf32>
    %26 = vector.multi_reduction <maximumf>, %25, %cst_11 [1] : vector<256x128xf32> to vector<256xf32>
    %27 = vector.shape_cast %26 : vector<256xf32> to vector<256x1xf32>
    %28 = vector.broadcast %27 : vector<256x1xf32> to vector<256x128xf32>
    %29 = arith.subf %25, %28 : vector<256x128xf32>
    %30 = math.exp %29 : vector<256x128xf32>
    %cst_12 = arith.constant dense<0.000000e+00> : vector<256xf32>
    %31 = vector.multi_reduction <add>, %30, %cst_12 [1] : vector<256x128xf32> to vector<256xf32>
    %32 = vector.shape_cast %31 : vector<256xf32> to vector<256x1xf32>
    %33 = tpu.reciprocal %32 : vector<256x1xf32> -> vector<256x1xf32>
    %34 = vector.broadcast %33 : vector<256x1xf32> to vector<256x128xf32>
    %35 = arith.mulf %30, %34 : vector<256x128xf32>
    %c1 = arith.constant 1 : index
    %c0_13 = arith.constant 0 : index
    %c0_14 = arith.constant 0 : index
    %36 = vector.load %arg3[%c1, %c0_13, %c0_14] : memref<3x128x128xf32, #tpu.memory_space<vmem>>, vector<1x128x128xf32>
    %37 = vector.shape_cast %36 : vector<1x128x128xf32> to vector<128x128xf32>
    %cst_15 = arith.constant dense<0.000000e+00> : vector<256x128xf32>
    %38 = tpu.matmul %35, %37, %cst_15 {dimension_numbers = #tpu.dot_dimension_numbers<[1], [0], [0], [1], [0, 0, 1, 1], [], []>} : vector<256x128xf32>, vector<128x128xf32>, vector<256x128xf32> -> vector<256x128xf32>
    %39 = vector.extract_strided_slice %1 {offsets = [2, 0], sizes = [1, 128], strides = [1, 1]} : vector<5x128xf32> to vector<1x128xf32>
    %40 = vector.broadcast %39 : vector<1x128xf32> to vector<256x128xf32>
    %41 = arith.addf %38, %40 : vector<256x128xf32>
    %cst_16 = arith.constant dense<0xFF800000> : vector<256xf32>
    %42 = vector.multi_reduction <maximumf>, %41, %cst_16 [1] : vector<256x128xf32> to vector<256xf32>
    %43 = vector.shape_cast %42 : vector<256xf32> to vector<256x1xf32>
    %44 = vector.broadcast %43 : vector<256x1xf32> to vector<256x128xf32>
    %45 = arith.subf %41, %44 : vector<256x128xf32>
    %46 = math.exp %45 : vector<256x128xf32>
    %cst_17 = arith.constant dense<0.000000e+00> : vector<256xf32>
    %47 = vector.multi_reduction <add>, %46, %cst_17 [1] : vector<256x128xf32> to vector<256xf32>
    %48 = vector.shape_cast %47 : vector<256xf32> to vector<256x1xf32>
    %49 = tpu.reciprocal %48 : vector<256x1xf32> -> vector<256x1xf32>
    %50 = vector.broadcast %49 : vector<256x1xf32> to vector<256x128xf32>
    %51 = arith.mulf %46, %50 : vector<256x128xf32>
    %c2 = arith.constant 2 : index
    %c0_18 = arith.constant 0 : index
    %c0_19 = arith.constant 0 : index
    %52 = vector.load %arg3[%c2, %c0_18, %c0_19] : memref<3x128x128xf32, #tpu.memory_space<vmem>>, vector<1x128x128xf32>
    %53 = vector.shape_cast %52 : vector<1x128x128xf32> to vector<128x128xf32>
    %cst_20 = arith.constant dense<0.000000e+00> : vector<256x128xf32>
    %54 = tpu.matmul %51, %53, %cst_20 {dimension_numbers = #tpu.dot_dimension_numbers<[1], [0], [0], [1], [0, 0, 1, 1], [], []>} : vector<256x128xf32>, vector<128x128xf32>, vector<256x128xf32> -> vector<256x128xf32>
    %55 = vector.extract_strided_slice %1 {offsets = [3, 0], sizes = [1, 128], strides = [1, 1]} : vector<5x128xf32> to vector<1x128xf32>
    %56 = vector.broadcast %55 : vector<1x128xf32> to vector<256x128xf32>
    %57 = arith.addf %54, %56 : vector<256x128xf32>
    %cst_21 = arith.constant dense<0xFF800000> : vector<256xf32>
    %58 = vector.multi_reduction <maximumf>, %57, %cst_21 [1] : vector<256x128xf32> to vector<256xf32>
    %59 = vector.shape_cast %58 : vector<256xf32> to vector<256x1xf32>
    %60 = vector.broadcast %59 : vector<256x1xf32> to vector<256x128xf32>
    %61 = arith.subf %57, %60 : vector<256x128xf32>
    %62 = math.exp %61 : vector<256x128xf32>
    %cst_22 = arith.constant dense<0.000000e+00> : vector<256xf32>
    %63 = vector.multi_reduction <add>, %62, %cst_22 [1] : vector<256x128xf32> to vector<256xf32>
    %64 = vector.shape_cast %63 : vector<256xf32> to vector<256x1xf32>
    %65 = tpu.reciprocal %64 : vector<256x1xf32> -> vector<256x1xf32>
    %66 = vector.broadcast %65 : vector<256x1xf32> to vector<256x128xf32>
    %67 = arith.mulf %62, %66 : vector<256x128xf32>
    %68 = vector.extract_strided_slice %1 {offsets = [4, 0], sizes = [1, 128], strides = [1, 1]} : vector<5x128xf32> to vector<1x128xf32>
    %69 = vector.broadcast %68 : vector<1x128xf32> to vector<256x128xf32>
    %70 = arith.mulf %51, %69 : vector<256x128xf32>
    %71 = arith.addf %70, %67 : vector<256x128xf32>
    %c0_23 = arith.constant 0 : index
    %c0_24 = arith.constant 0 : index
    %72 = vector.load %arg5[%c0_23, %c0_24] : memref<256x128xf32, #tpu.memory_space<vmem>>, vector<256x128xf32>
    tpu.vector_store %arg5[%c0_23, %c0_24], %71 {strides = array<i32>} : memref<256x128xf32, #tpu.memory_space<vmem>>, vector<256x128xf32>,
    return
  }
  func.func @transform_0(%arg0: i32) -> (i32, i32) {
    %c0_i32 = arith.constant 0 : i32
    %c0_i32_0 = arith.constant 0 : i32
    return %arg0, %c0_i32 : i32, i32
  }
  func.func @transform_1(%arg0: i32) -> (i32, i32) {
    %c0_i32 = arith.constant 0 : i32
    %c0_i32_0 = arith.constant 0 : i32
    %c0_i32_1 = arith.constant 0 : i32
    return %c0_i32, %c0_i32_0 : i32, i32
  }
  func.func @transform_2(%arg0: i32) -> (i32, i32, i32) {
    %c0_i32 = arith.constant 0 : i32
    %c0_i32_0 = arith.constant 0 : i32
    %c0_i32_1 = arith.constant 0 : i32
    %c0_i32_2 = arith.constant 0 : i32
    return %c0_i32, %c0_i32_0, %c0_i32_1 : i32, i32, i32
  }
  func.func @transform_3(%arg0: i32) -> (i32, i32) {
    %c0_i32 = arith.constant 0 : i32
    %c0_i32_0 = arith.constant 0 : i32
    %c0_i32_1 = arith.constant 0 : i32
    return %c0_i32, %c0_i32_0 : i32, i32
  }
  func.func @transform_4(%arg0: i32) -> (i32, i32) {
    %c0_i32 = arith.constant 0 : i32
    %c0_i32_0 = arith.constant 0 : i32
    return %arg0, %c0_i32 : i32, i32
  }
}

</mosaic_0001>

<bundles_post_ra>
// kernel: autoencoder_kg_forward.2
= control target key start
LH: loop header
LB: loop body
LE: loop exit
PB: predicated region body
PF: predicated region fallthrough
CT: control target
= control target key end

     0   :  { %s4158_s20 = smov 0   ;;  %s6112_s0 = inlined_call_operand.vmem [shape: f32[128,256], index: 0, kind: input, shape index: {}]   ;;  %s6113_s1 = inlined_call_operand.vmem [shape: f32[3,128,128], index: 1, kind: input, shape index: {}]   ;;  %s6114_s2 = inlined_call_operand.vmem [shape: f32[5,128], index: 2, kind: input, shape index: {}]   ;;  %s6115_s3 = inlined_call_operand.vmem [shape: f32[512,20], index: 3, kind: input, shape index: {}]   ;;  %s6116_s4 = inlined_call_operand.<no memory space> [shape: f32[], index: 4, kind: input, shape index: {}]   ;;  %s6117_s5 = inlined_call_operand.vmem [shape: f32[512,128], index: 5, kind: output, shape index: {}]  }
   0x1   :  { %v4156_v0 = vstv %s6116_s4 }
   0x2   :  { %6133 = vst [vmem:[#allocation8_spill] sm:$0xff] %v4156_v0 }
   0x3 LB: > { %s2988_s21 = sadd.s32 4294967295, %s4120_s20   ;;  %p2992_p0 = scmp.ge.s32.totalorder %s4120_s20, 1  ;;  %s4120_s20 = sphi %s4158_s20, %s16_s20  }
   0x4   : > { %p165_p1 = scmp.lt.s32.totalorder %s4120_s20, 3 }
   0x6   : > { %p166_p2 = pnand %p2992_p0, %p165_p1 }
   0x8   : > { %169 = sbr.rel (%p166_p2) target bundleno = 2273 (0x8e1), region = 36 }
   0x9   : > { %v6134_v0 = vld [vmem:[#allocation8_spill] sm:$0xff] }
   0xf   : > { %v555_v1 = vld [vmem:[%s6112_s0 + $0x8] sm:$0xff]  ;;  %v557_v2 = vld [vmem:[%s6112_s0 + $0x18] sm:$0xff]  ;;  %v554_v3 = vld [vmem:[%s6112_s0] sm:$0xff]  ;;  %v4122_v8 = vmov 0.0   ;;  %s2993_s8 = sshll.u32 %s2988_s21, 5  ;;  %v204_v22 = vlaneseq }
  0x10   : > { %v3446_v4 = vpack.c.bf16 %v557_v2, %v555_v1  ;;  %v556_v5 = vld [vmem:[%s6112_s0 + $0x10] sm:$0xff]  ;;  %v559_v6 = vld [vmem:[%s6112_s0 + $0x28] sm:$0xff]  ;;  %v561_v7 = vld [vmem:[%s6112_s0 + $0x38] sm:$0xff]  ;;  %650 = vmatprep.mubr.f32.mxu0 %v4122_v8  ;;  %794 = vmatprep.mubr.f32.mxu1 %v4122_v8  ;;  %p192_p3 = scmp.lt.s32.totalorder %s2993_s8, 63 }
  0x11   : > { %v3448_v9 = vpack.c.bf16 %v556_v5, %v554_v3  ;;  %v3450_v10 = vpack.c.bf16 %v561_v7, %v559_v6  ;;  %v558_v11 = vld [vmem:[%s6112_s0 + $0x20] sm:$0xff]  ;;  %v560_v12 = vld [vmem:[%s6112_s0 + $0x30] sm:$0xff]  ;;  %v563_v13 = vld [vmem:[%s6112_s0 + $0x48] sm:$0xff]  ;;  %v4229_v30 = vand.u32 127, %v204_v22 }
  0x12   : > { %3447 = vmatprep.subr.bf16.mxu0 %v3446_v4  ;;  %v565_v14 = vld [vmem:[%s6112_s0 + $0x58] sm:$0xff]  ;;  %3574 = vmatprep.subr.bf16.mxu1 %v3446_v4  ;;  %v3452_v15 = vpack.c.bf16 %v560_v12, %v558_v11  ;;  %v562_v17 = vld [vmem:[%s6112_s0 + $0x40] sm:$0xff]  ;;  %v564_v18 = vld [vmem:[%s6112_s0 + $0x50] sm:$0xff]  ;;  %s6194_s8 = smov (!%p192_p3, %s2993_s8), 63 }
  0x13   : > { %3449 = vmatpush1.bf16.msra.mxu0 %v3448_v9  ;;  %3582 = vmatpush1.bf16.msra.mxu1 %v3448_v9  ;;  %v3454_v16 = vpack.c.bf16 %v565_v14, %v563_v13  ;;  %v567_v19 = vld [vmem:[%s6112_s0 + $0x68] sm:$0xff]  ;;  %v569_v20 = vld [vmem:[%s6112_s0 + $0x78] sm:$0xff]  ;;  %v3456_v21 = vpack.c.bf16 %v564_v18, %v562_v17  ;;  %v566_v24 = vld [vmem:[%s6112_s0 + $0x60] sm:$0xff]  ;;  %s2994_s11 = sshll.u32 %s6194_s8, 3  ;;  %vm207_vm0 = vcmp.lt.s32.totalorder %v4229_v30, 20  ;;  %v4461_v30 = vshrl.u32 %v204_v22, 7 }
  0x14   : > { %3451 = vmatprep.subr.bf16.mxu0 %v3450_v10  ;;  %3575 = vmatprep.subr.bf16.mxu1 %v3450_v10  ;;  %v3458_v23 = vpack.c.bf16 %v569_v20, %v567_v19  ;;  %v568_v25 = vld [vmem:[%s6112_s0 + $0x70] sm:$0xff]  ;;  %v571_v26 = vld [vmem:[%s6112_s0 + $0x88] sm:$0xff]  ;;  %v573_v27 = vld [vmem:[%s6112_s0 + $0x98] sm:$0xff]  ;;  %s4248_s23 = scalar_lea.vmem %s6115_s3, %s2994_s11  ;;  %s5982_s7 = scalar_lea.vmem %s6117_s5, %s2994_s11 }
  0x15   : > { %v3460_v28 = vpack.c.bf16 %v568_v25, %v566_v24  ;;  %v570_v29 = vld [vmem:[%s6112_s0 + $0x80] sm:$0xff]  ;;  %v3462_v31 = vpack.c.bf16 %v573_v27, %v571_v26  ;;  %v572_v32 = vld [vmem:[%s6112_s0 + $0x90] sm:$0xff]  ;;  %v575_v33 = vld [vmem:[%s6112_s0 + $0xa8] sm:$0xff] }
  0x16   : > { %v577_v34 = vld [vmem:[%s6112_s0 + $0xb8] sm:$0xff]  ;;  %v574_v35 = vld [vmem:[%s6112_s0 + $0xa0] sm:$0xff]  ;;  %v3464_v36 = vpack.c.bf16 %v572_v32, %v570_v29  ;;  %v3013_v39 = vld [vmem:[%s4248_s23 + $0x88] sm:$0xff] }
  0x17   : > { %3453 = vmatpush1.bf16.msra.mxu0 %v3452_v15  ;;  %3583 = vmatpush1.bf16.msra.mxu1 %v3452_v15  ;;  %v3466_v37 = vpack.c.bf16 %v577_v34, %v575_v33  ;;  %v3012_v38 = vld [vmem:[%s4248_s23 + $0x80] sm:$0xff]  ;;  %v3014_v40 = vld [vmem:[%s4248_s23 + $0x90] sm:$0xff]  ;;  %v4265_v43 = vsel %vm207_vm0, %v3013_v39, %v6134_v0  ;;  %v3015_v45 = vld [vmem:[%s4248_s23 + $0x98] sm:$0xff] }
  0x18   : > { %3455 = vmatprep.subr.bf16.mxu0 %v3454_v16  ;;  %3576 = vmatprep.subr.bf16.mxu1 %v3454_v16  ;;  %v576_v41 = vld [vmem:[%s6112_s0 + $0xb0] sm:$0xff]  ;;  %v4260_v42 = vsel %vm207_vm0, %v3012_v38, %v6134_v0  ;;  %v4270_v44 = vsel %vm207_vm0, %v3014_v40, %v6134_v0  ;;  %v3016_v46 = vld [vmem:[%s4248_s23 + $0xa0] sm:$0xff]  ;;  %v579_v47 = vld [vmem:[%s6112_s0 + $0xc8] sm:$0xff]  ;;  %v4283_v49 = vsel %vm207_vm0, %v3015_v45, %v6134_v0 }
  0x19   : > { %v581_v48 = vld [vmem:[%s6112_s0 + $0xd8] sm:$0xff]  ;;  %v4288_v50 = vsel %vm207_vm0, %v3016_v46, %v6134_v0  ;;  %v3017_v51 = vld [vmem:[%s4248_s23 + $0xa8] sm:$0xff]  ;;  %v3018_v53 = vld [vmem:[%s4248_s23 + $0xb0] sm:$0xff]  ;;  %v3468_v55 = vpack.c.bf16 %v576_v41, %v574_v35 }
  0x1a   : > { %v4294_v52 = vsel %vm207_vm0, %v3017_v51, %v6134_v0  ;;  %v3019_v54 = vld [vmem:[%s4248_s23 + $0xb8] sm:$0xff]  ;;  %v4301_v56 = vsel %vm207_vm0, %v3018_v53, %v6134_v0  ;;  %v3470_v58 = vpack.c.bf16 %v581_v48, %v579_v47  ;;  %v578_v59 = vld [vmem:[%s6112_s0 + $0xc0] sm:$0xff]  ;;  %v580_v60 = vld [vmem:[%s6112_s0 + $0xd0] sm:$0xff] }
  0x1b   : > { %3457 = vmatpush1.bf16.msra.mxu0 %v3456_v21  ;;  %3584 = vmatpush1.bf16.msra.mxu1 %v3456_v21  ;;  %v4306_v57 = vsel %vm207_vm0, %v3019_v54, %v6134_v0  ;;  %v583_v61 = vld [vmem:[%s6112_s0 + $0xe8] sm:$0xff]  ;;  %v585_v62 = vld [vmem:[%s6112_s0 + $0xf8] sm:$0xff]  ;;  %v3472_v63 = vpack.c.bf16 %v580_v60, %v578_v59  ;;  %v582_v2 = vld [vmem:[%s6112_s0 + $0xe0] sm:$0xff] }
  0x1c   : > { %3459 = vmatprep.subr.bf16.mxu0 %v3458_v23  ;;  %3577 = vmatprep.subr.bf16.mxu1 %v3458_v23  ;;  %v3474_v1 = vpack.c.bf16 %v585_v62, %v583_v61  ;;  %v584_v3 = vld [vmem:[%s6112_s0 + $0xf0] sm:$0xff]  ;;  %v203_v5 = vld [vmem:[%s4248_s23] sm:$0xff]  ;;  %v2997_v10 = vld [vmem:[%s4248_s23 + $0x8] sm:$0xff] }
  0x1d   : > { %v3476_v4 = vpack.c.bf16 %v584_v3, %v582_v2  ;;  %v3020_v6 = vld [vmem:[%s4248_s23 + $0xc0] sm:$0xff]  ;;  %v208_v7 = vsel %vm207_vm0, %v203_v5, %v6134_v0  ;;  %v3021_v11 = vld [vmem:[%s4248_s23 + $0xc8] sm:$0xff]  ;;  %v217_v12 = vsel %vm207_vm0, %v2997_v10, %v6134_v0  ;;  %v2998_v14 = vld [vmem:[%s4248_s23 + $0x10] sm:$0xff] }
  0x1e   : > { %v447_v9 = vsel %vm207_vm0, %v3020_v6, %v6134_v0  ;;  %v457_v13 = vsel %vm207_vm0, %v3021_v11, %v6134_v0  ;;  %v3022_v15 = vld [vmem:[%s4248_s23 + $0xd0] sm:$0xff]  ;;  %v227_v16 = vsel %vm207_vm0, %v2998_v14, %v6134_v0  ;;  %v2999_v18 = vld [vmem:[%s4248_s23 + $0x18] sm:$0xff]  ;;  %v3000_v23 = vld [vmem:[%s4248_s23 + $0x20] sm:$0xff] }
  0x1f   : > { %3461 = vmatpush1.bf16.msra.mxu0 %v3460_v28  ;;  %3585 = vmatpush1.bf16.msra.mxu1 %v3460_v28  ;;  %v467_v17 = vsel %vm207_vm0, %v3022_v15, %v6134_v0  ;;  %v3023_v19 = vld [vmem:[%s4248_s23 + $0xd8] sm:$0xff]  ;;  %v237_v20 = vsel %vm207_vm0, %v2999_v18, %v6134_v0  ;;  %v3024_v24 = vld [vmem:[%s4248_s23 + $0xe0] sm:$0xff]  ;;  %v247_v25 = vsel %vm207_vm0, %v3000_v23, %v6134_v0  ;;  %v3001_v27 = vld [vmem:[%s4248_s23 + $0x28] sm:$0xff] }
  0x20   : > { %3463 = vmatprep.subr.bf16.mxu0 %v3462_v31  ;;  %3578 = vmatprep.subr.bf16.mxu1 %v3462_v31  ;;  %v477_v21 = vsel %vm207_vm0, %v3023_v19, %v6134_v0  ;;  %v487_v26 = vsel %vm207_vm0, %v3024_v24, %v6134_v0  ;;  %v3025_v28 = vld [vmem:[%s4248_s23 + $0xe8] sm:$0xff]  ;;  %v257_v29 = vsel %vm207_vm0, %v3001_v27, %v6134_v0  ;;  %v3002_v32 = vld [vmem:[%s4248_s23 + $0x30] sm:$0xff]  ;;  %v3004_v40 = vld [vmem:[%s4248_s23 + $0x40] sm:$0xff] }
  0x21   : > { %v497_v31 = vsel %vm207_vm0, %v3025_v28, %v6134_v0  ;;  %v3026_v33 = vld [vmem:[%s4248_s23 + $0xf0] sm:$0xff]  ;;  %v267_v34 = vsel %vm207_vm0, %v3002_v32, %v6134_v0  ;;  %v287_v41 = vsel %vm207_vm0, %v3004_v40, %v6134_v0  ;;  %v3005_v45 = vld [vmem:[%s4248_s23 + $0x48] sm:$0xff]  ;;  %v3007_v51 = vld [vmem:[%s4248_s23 + $0x58] sm:$0xff] }
  0x22   : > { %v507_v35 = vsel %vm207_vm0, %v3026_v33, %v6134_v0  ;;  %v297_v46 = vsel %vm207_vm0, %v3005_v45, %v6134_v0  ;;  %v3006_v47 = vld [vmem:[%s4248_s23 + $0x50] sm:$0xff]  ;;  %v317_v53 = vsel %vm207_vm0, %v3007_v51, %v6134_v0  ;;  %v3008_v54 = vld [vmem:[%s4248_s23 + $0x60] sm:$0xff]  ;;  %v3011_v62 = vld [vmem:[%s4248_s23 + $0x78] sm:$0xff] }
  0x23   : > { %3465 = vmatpush1.bf16.msra.mxu0 %v3464_v36  ;;  %3586 = vmatpush1.bf16.msra.mxu1 %v3464_v36  ;;  %v3003_v36 = vld [vmem:[%s4248_s23 + $0x38] sm:$0xff]  ;;  %v307_v48 = vsel %vm207_vm0, %v3006_v47, %v6134_v0  ;;  %v3010_v60 = vld [vmem:[%s4248_s23 + $0x70] sm:$0xff] }
  0x24   : > { %3467 = vmatprep.subr.bf16.mxu0 %v3466_v37  ;;  %3579 = vmatprep.subr.bf16.mxu1 %v3466_v37  ;;  %v3027_v37 = vld [vmem:[%s4248_s23 + $0xf8] sm:$0xff]  ;;  %v277_v38 = vsel %vm207_vm0, %v3003_v36, %v6134_v0  ;;  %v347_v61 = vsel %vm207_vm0, %v3010_v60, %v6134_v0 }
  0x25   : > { %v517_v39 = vsel %vm207_vm0, %v3027_v37, %v6134_v0 }
  0x27   : > { %3469 = vmatpush1.bf16.msra.mxu0 %v3468_v55  ;;  %3587 = vmatpush1.bf16.msra.mxu1 %v3468_v55  ;;  %v327_v55 = vsel %vm207_vm0, %v3008_v54, %v6134_v0 }
  0x28   : > { %3471 = vmatprep.subr.bf16.mxu0 %v3470_v58  ;;  %3580 = vmatprep.subr.bf16.mxu1 %v3470_v58  ;;  %v3009_v58 = vld [vmem:[%s4248_s23 + $0x68] sm:$0xff] }
  0x29   : > { %v337_v59 = vsel %vm207_vm0, %v3009_v58, %v6134_v0 }
  0x2b   : > { %3473 = vmatpush1.bf16.msra.mxu0 %v3472_v63  ;;  %3588 = vmatpush1.bf16.msra.mxu1 %v3472_v63  ;;  %v357_v63 = vsel %vm207_vm0, %v3011_v62, %v6134_v0 }
  0x2c   : > { %3475 = vmatprep.subr.bf16.mxu0 %v3474_v1  ;;  %3581 = vmatprep.subr.bf16.mxu1 %v3474_v1 }
  0x2f   : > { %3477 = vmatpush1.bf16.msra.mxu0 %v3476_v4  ;;  %3589 = vmatpush1.bf16.msra.mxu1 %v3476_v4 }
  0x32   : > { %651 = vmatmul.mubr.f32.vlgmr.msra.gmra.mrb[0].mxu0 %v208_v7  ;;  %795 = vmatmul.mubr.f32.vlgmr.msra.gmra.mrb[0].mxu1 %v447_v9 }
  0x33   : > { %656 = vmatprep.mubr.f32.mxu0 %v4122_v8  ;;  %800 = vmatprep.mubr.f32.mxu1 %v4122_v8 }
  0x36   : > { %657 = vmatmul.mubr.f32.gmra.mrb[2].mxu0 %v217_v12  ;;  %801 = vmatmul.mubr.f32.gmra.mrb[2].mxu1 %v457_v13 }
  0x37   : > { %662 = vmatprep.mubr.f32.mxu0 %v4122_v8  ;;  %806 = vmatprep.mubr.f32.mxu1 %v4122_v8 }
  0x3a   : > { %663 = vmatmul.mubr.f32.gmra.mrb[4].mxu0 %v227_v16  ;;  %807 = vmatmul.mubr.f32.gmra.mrb[4].mxu1 %v467_v17 }
  0x3b   : > { %668 = vmatprep.mubr.f32.mxu0 %v4122_v8  ;;  %812 = vmatprep.mubr.f32.mxu1 %v4122_v8 }
  0x3e   : > { %669 = vmatmul.mubr.f32.gmra.mrb[6].mxu0 %v237_v20  ;;  %813 = vmatmul.mubr.f32.gmra.mrb[6].mxu1 %v477_v21 }
  0x3f   : > { %674 = vmatprep.mubr.f32.mxu0 %v4122_v8  ;;  %818 = vmatprep.mubr.f32.mxu1 %v4122_v8 }
  0x42   : > { %675 = vmatmul.mubr.f32.gmra.mrb[8].mxu0 %v247_v25  ;;  %819 = vmatmul.mubr.f32.gmra.mrb[8].mxu1 %v487_v26 }
  0x43   : > { %680 = vmatprep.mubr.f32.mxu0 %v4122_v8  ;;  %824 = vmatprep.mubr.f32.mxu1 %v4122_v8 }
  0x46   : > { %681 = vmatmul.mubr.f32.gmra.mrb[10].mxu0 %v257_v29  ;;  %825 = vmatmul.mubr.f32.gmra.mrb[10].mxu1 %v497_v31 }
  0x47   : > { %686 = vmatprep.mubr.f32.mxu0 %v4122_v8  ;;  %830 = vmatprep.mubr.f32.mxu1 %v4122_v8 }
  0x4a   : > { %687 = vmatmul.mubr.f32.gmra.mrb[12].mxu0 %v267_v34  ;;  %831 = vmatmul.mubr.f32.gmra.mrb[12].mxu1 %v507_v35 }
  0x4b   : > { %692 = vmatprep.mubr.f32.mxu0 %v4122_v8  ;;  %836 = vmatprep.mubr.f32.mxu1 %v4122_v8 }
  0x4e   : > { %693 = vmatmul.mubr.f32.gmra.mrb[14].mxu0 %v277_v38  ;;  %837 = vmatmul.mubr.f32.gmra.mrb[14].mxu1 %v517_v39 }
  0x4f   : > { %698 = vmatprep.mubr.f32.mxu0 %v4122_v8 }
  0x52   : > { %699 = vmatmul.mubr.f32.gmra.mrb[16].mxu0 %v287_v41 }
  0x53   : > { %704 = vmatprep.mubr.f32.mxu0 %v4122_v8 }
  0x56   : > { %705 = vmatmul.mubr.f32.gmra.mrb[18].mxu0 %v297_v46 }
  0x57   : > { %710 = vmatprep.mubr.f32.mxu0 %v4122_v8 }
  0x5a   : > { %711 = vmatmul.mubr.f32.gmra.mrb[20].mxu0 %v307_v48 }
  0x5b   : > { %716 = vmatprep.mubr.f32.mxu0 %v4122_v8 }
  0x5e   : > { %717 = vmatmul.mubr.f32.gmra.mrb[22].mxu0 %v317_v53 }
  0x5f   : > { %722 = vmatprep.mubr.f32.mxu0 %v4122_v8 }
  0x62   : > { %723 = vmatmul.mubr.f32.gmra.mrb[24].mxu0 %v327_v55 }
  0x63   : > { %728 = vmatprep.mubr.f32.mxu0 %v4122_v8 }
  0x66   : > { %729 = vmatmul.mubr.f32.gmra.mrb[26].mxu0 %v337_v59 }
  0x67   : > { %734 = vmatprep.mubr.f32.mxu0 %v4122_v8 }
  0x6a   : > { %735 = vmatmul.mubr.f32.gmra.mrb[28].mxu0 %v347_v61 }
  0x6b   : > { %740 = vmatprep.mubr.f32.mxu0 %v4122_v8 }
  0x6e   : > { %741 = vmatmul.mubr.f32.gmra.mrb[30].mxu0 %v357_v63 }
  0x6f   : > { %746 = vmatprep.mubr.f32.mxu0 %v4122_v8 }
  0x72   : > { %747 = vmatmul.mubr.f32.gmra.mrb[32].mxu0 %v4260_v42  ;;  %v845_v42 = vsub.s32 0, %v4461_v30 }
  0x73   : > { %752 = vmatprep.mubr.f32.mxu0 %v4122_v8 }
  0x76   : > { %753 = vmatmul.mubr.f32.gmra.mrb[34].mxu0 %v4265_v43  ;;  %v553_v43 = vld [vmem:[%s6114_s2] sm:$0x1f] }
  0x77   : > { %758 = vmatprep.mubr.f32.mxu0 %v4122_v8 }
  0x7a   : > { %759 = vmatmul.mubr.f32.gmra.mrb[36].mxu0 %v4270_v44  ;;  %v4467_v44 = vrot.slane %v553_v43, %v845_v42 }
  0x7b   : > { %764 = vmatprep.mubr.f32.mxu0 %v4122_v8 }
  0x7e   : > { %765 = vmatmul.mubr.f32.gmra.mrb[38].mxu0 %v4283_v49 }
  0x7f   : > { %770 = vmatprep.mubr.f32.mxu0 %v4122_v8 }
  0x82   : > { %771 = vmatmul.mubr.f32.gmra.mrb[40].mxu0 %v4288_v50 }
  0x83   : > { %776 = vmatprep.mubr.f32.mxu0 %v4122_v8 }
  0x86   : > { %777 = vmatmul.mubr.f32.gmra.mrb[42].mxu0 %v4294_v52 }
  0x87   : > { %782 = vmatprep.mubr.f32.mxu0 %v4122_v8 }
  0x8a   : > { %783 = vmatmul.mubr.f32.gmra.mrb[44].mxu0 %v4301_v56 }
  0x8b   : > { %788 = vmatprep.mubr.f32.mxu0 %v4122_v8 }
  0x8e   : > { %789 = vmatmul.mubr.f32.gmra.mrb[46].mxu0 %v4306_v57 }
 0x105   : > { %v652_v49 = vpop.f32.mrb[0].mxu0  ;;  %v4469_v50 = vpop.f32.mrb[0].mxu1 }
 0x106   : > { %v4472_v52 = vadd.f32 %v4467_v44, %v652_v49  ;;  %v4474_v8 = vpop.f32.mrb[1].mxu0  ;;  %v4476_v56 = vpop.f32.mrb[1].mxu1 }
 0x107   : > { %6135 = vst [vmem:[#allocation9_spill] sm:$0xff] %v4476_v56 }
 0x108   : > { %879 = vmax.xlane.f32.xlu0 %v4472_v52 }
 0x109   : > { %v658_v22 = vpop.f32.mrb[2].mxu0  ;;  %v4479_v57 = vpop.f32.mrb[2].mxu1 }
 0x10a   : > { %v4482_v1 = vadd.f32 %v4467_v44, %v658_v22  ;;  %v4484_v2 = vpop.f32.mrb[3].mxu0  ;;  %v4486_v3 = vpop.f32.mrb[3].mxu1 }
 0x10b   : > { %6136 = vst [vmem:[#allocation10_spill] sm:$0xff] %v4486_v3  ;;  %v1171_v3 = vld [vmem:[%s6113_s1 + $0x20] sm:$0xff] }
 0x10c   : > { %881 = vmax.xlane.f32.xlu0 %v4482_v1 }
 0x10d   : > { %v664_v4 = vpop.f32.mrb[4].mxu0  ;;  %v4489_v5 = vpop.f32.mrb[4].mxu1 }
 0x10e   : > { %v4492_v6 = vadd.f32 %v4467_v44, %v664_v4  ;;  %v4494_v7 = vpop.f32.mrb[5].mxu0  ;;  %v4496_v9 = vpop.f32.mrb[5].mxu1 }
 0x10f   : > { %6137 = vst [vmem:[#allocation11_spill] sm:$0xff] %v4496_v9 }
 0x110   : > { %883 = vmax.xlane.f32.xlu1 %v4492_v6 }
 0x111   : > { %v670_v10 = vpop.f32.mrb[6].mxu0  ;;  %v4499_v11 = vpop.f32.mrb[6].mxu1 }
 0x112   : > { %v4502_v12 = vadd.f32 %v4467_v44, %v670_v10  ;;  %v4504_v13 = vpop.f32.mrb[7].mxu0  ;;  %v4506_v14 = vpop.f32.mrb[7].mxu1 }
 0x113   : > { %6138 = vst [vmem:[#allocation12_spill] sm:$0xff] %v4506_v14  ;;  %v4656_v14 = vadd.f32 %v4467_v44, %v4489_v5 }
 0x114   : > { %885 = vmax.xlane.f32.xlu1 %v4502_v12 }
 0x115   : > { %v676_v15 = vpop.f32.mrb[8].mxu0  ;;  %v4509_v16 = vpop.f32.mrb[8].mxu1 }
 0x116   : > { %v4512_v17 = vadd.f32 %v4467_v44, %v676_v15  ;;  %v4514_v18 = vpop.f32.mrb[9].mxu0  ;;  %v4516_v19 = vpop.f32.mrb[9].mxu1 }
 0x117   : > { %6139 = vst [vmem:[#allocation13_spill] sm:$0xff] %v4516_v19 }
 0x118   : > { %887 = vmax.xlane.f32.xlu0 %v4512_v17 }
 0x119   : > { %v682_v20 = vpop.f32.mrb[10].mxu0  ;;  %v4519_v21 = vpop.f32.mrb[10].mxu1 }
 0x11a   : > { %v4522_v23 = vadd.f32 %v4467_v44, %v682_v20  ;;  %v4524_v24 = vpop.f32.mrb[11].mxu0  ;;  %v4526_v25 = vpop.f32.mrb[11].mxu1  ;;  %v4676_v5 = vadd.f32 %v4467_v44, %v4519_v21  ;;  %v1169_v21 = vld [vmem:[%s6113_s1 + $0x10] sm:$0xff] }
 0x11b   : > { %6140 = vst [vmem:[#allocation14_spill] sm:$0xff] %v4526_v25  ;;  %v4641_v25 = vadd.f32 %v4467_v44, %v4469_v50  ;;  %v4662_v50 = vadd.f32 %v4467_v44, %v4499_v11 }
 0x11c   : > { %889 = vmax.xlane.f32.xlu1 %v4522_v23 }
 0x11d   : > { %v688_v26 = vpop.f32.mrb[12].mxu0  ;;  %v4529_v27 = vpop.f32.mrb[12].mxu1 }
 0x11e   : > { %v4532_v28 = vadd.f32 %v4467_v44, %v688_v26  ;;  %v4534_v29 = vpop.f32.mrb[13].mxu0  ;;  %v4536_v31 = vpop.f32.mrb[13].mxu1 }
 0x11f   : > { %6141 = vst [vmem:[#allocation15_spill] sm:$0xff] %v4536_v31 }
 0x120   : > { %891 = vmax.xlane.f32.xlu0 %v4532_v28 }
 0x121   : > { %v694_v32 = vpop.f32.mrb[14].mxu0  ;;  %v4539_v33 = vpop.f32.mrb[14].mxu1 }
 0x122   : > { %v4542_v34 = vadd.f32 %v4467_v44, %v694_v32  ;;  %v4544_v35 = vpop.f32.mrb[15].mxu0  ;;  %v4546_v36 = vpop.f32.mrb[15].mxu1  ;;  %v4680_v11 = vadd.f32 %v4467_v44, %v4539_v33  ;;  %v1170_v33 = vld [vmem:[%s6113_s1 + $0x18] sm:$0xff] }
 0x123   : > { %6142 = vst [vmem:[#allocation16_spill] sm:$0xff] %v4546_v36  ;;  %v3482_v56 = vpack.c.bf16 %v1170_v33, %v1169_v21  ;;  %v1173_v21 = vld [vmem:[%s6113_s1 + $0x30] sm:$0xff]  ;;  %v1174_v33 = vld [vmem:[%s6113_s1 + $0x38] sm:$0xff] }
 0x124   : > { %893 = vmax.xlane.f32.xlu1 %v4542_v34 }
 0x125   : > { %v700_v37 = vpop.f32.mrb[16].mxu0 }
 0x126   : > { %v4550_v38 = vadd.f32 %v4467_v44, %v700_v37  ;;  %v4552_v39 = vpop.f32.mrb[17].mxu0 }
 0x128   : > { %895 = vmax.xlane.f32.xlu0 %v4550_v38 }
 0x129   : > { %v706_v40 = vpop.f32.mrb[18].mxu0 }
 0x12a   : > { %v4556_v41 = vadd.f32 %v4467_v44, %v706_v40  ;;  %v4558_v45 = vpop.f32.mrb[19].mxu0 }
 0x12c   : > { %897 = vmax.xlane.f32.xlu1 %v4556_v41 }
 0x12d   : > { %v712_v46 = vpop.f32.mrb[20].mxu0 }
 0x12e   : > { %v4562_v47 = vadd.f32 %v4467_v44, %v712_v46  ;;  %v4564_v48 = vpop.f32.mrb[21].mxu0 }
 0x130   : > { %899 = vmax.xlane.f32.xlu0 %v4562_v47 }
 0x131   : > { %v718_v51 = vpop.f32.mrb[22].mxu0 }
 0x132   : > { %v4568_v53 = vadd.f32 %v4467_v44, %v718_v51  ;;  %v4570_v54 = vpop.f32.mrb[23].mxu0 }
 0x134   : > { %901 = vmax.xlane.f32.xlu1 %v4568_v53 }
 0x135   : > { %v724_v55 = vpop.f32.mrb[24].mxu0 }
 0x136   : > { %v4574_v58 = vadd.f32 %v4467_v44, %v724_v55  ;;  %v4576_v59 = vpop.f32.mrb[25].mxu0 }
 0x138   : > { %903 = vmax.xlane.f32.xlu0 %v4574_v58 }
 0x139   : > { %v730_v60 = vpop.f32.mrb[26].mxu0 }
 0x13a   : > { %v4580_v61 = vadd.f32 %v4467_v44, %v730_v60  ;;  %v4582_v62 = vpop.f32.mrb[27].mxu0 }
 0x13c   : > { %905 = vmax.xlane.f32.xlu1 %v4580_v61 }
 0x13d   : > { %v736_v63 = vpop.f32.mrb[28].mxu0 }
 0x13e   : > { %v4586_v42 = vadd.f32 %v4467_v44, %v736_v63  ;;  %v4588_v43 = vpop.f32.mrb[29].mxu0 }
 0x140   : > { %907 = vmax.xlane.f32.xlu0 %v4586_v42 }
 0x141   : > { %v742_v49 = vpop.f32.mrb[30].mxu0 }
 0x142   : > { %v4592_v22 = vadd.f32 %v4467_v44, %v742_v49  ;;  %v4594_v4 = vpop.f32.mrb[31].mxu0 }
 0x144   : > { %909 = vmax.xlane.f32.xlu1 %v4592_v22 }
 0x145   : > { %v748_v10 = vpop.f32.mrb[32].mxu0 }
 0x146   : > { %v4598_v15 = vadd.f32 %v4467_v44, %v748_v10  ;;  %v4600_v20 = vpop.f32.mrb[33].mxu0 }
 0x147   : > { %6143 = vst [vmem:[#allocation17_spill] sm:$0xff] %v4600_v20 }
 0x148   : > { %911 = vmax.xlane.f32.xlu0 %v4598_v15 }
 0x149   : > { %v754_v26 = vpop.f32.mrb[34].mxu0 }
 0x14a   : > { %v4604_v32 = vadd.f32 %v4467_v44, %v754_v26  ;;  %v4606_v37 = vpop.f32.mrb[35].mxu0 }
 0x14c   : > { %913 = vmax.xlane.f32.xlu1 %v4604_v32 }
 0x14d   : > { %v760_v40 = vpop.f32.mrb[36].mxu0 }
 0x14e   : > { %v4610_v46 = vadd.f32 %v4467_v44, %v760_v40  ;;  %v4612_v51 = vpop.f32.mrb[37].mxu0 }
 0x14f   : > { %6144 = vst [vmem:[#allocation18_spill] sm:$0xff] %v4612_v51 }
 0x150   : > { %915 = vmax.xlane.f32.xlu0 %v4610_v46 }
 0x151   : > { %v766_v55 = vpop.f32.mrb[38].mxu0 }
 0x152   : > { %v4616_v60 = vadd.f32 %v4467_v44, %v766_v55  ;;  %v4618_v63 = vpop.f32.mrb[39].mxu0 }
 0x153   : > { %6145 = vst [vmem:[#allocation19_spill] sm:$0xff] %v4618_v63  ;;  %v3490_v63 = vpack.c.bf16 %v1174_v33, %v1173_v21 }
 0x154   : > { %917 = vmax.xlane.f32.xlu1 %v4616_v60 }
 0x155   : > { %v772_v49 = vpop.f32.mrb[40].mxu0 }
 0x156   : > { %v4622_v10 = vadd.f32 %v4467_v44, %v772_v49  ;;  %v4624_v26 = vpop.f32.mrb[41].mxu0 }
 0x157   : > { %6146 = vst [vmem:[#allocation20_spill] sm:$0xff] %v4624_v26 }
 0x158   : > { %919 = vmax.xlane.f32.xlu0 %v4622_v10 }
 0x159   : > { %v778_v40 = vpop.f32.mrb[42].mxu0 }
 0x15a   : > { %v4628_v0 = vadd.f32 %v4467_v44, %v778_v40  ;;  %v4630_v31 = vpop.f32.mrb[43].mxu0 }
 0x15b   : > { %6147 = vst [vmem:[#allocation21_spill] sm:$0xff] %v4630_v31 }
 0x15c   : > { %921 = vmax.xlane.f32.xlu1 %v4628_v0 }
 0x15d   : > { %v784_v55 = vpop.f32.mrb[44].mxu0 }
 0x15e   : > { %v4634_v36 = vadd.f32 %v4467_v44, %v784_v55  ;;  %v4636_v19 = vpop.f32.mrb[45].mxu0  ;;  %v4652_v55 = vadd.f32 %v4467_v44, %v4479_v57  ;;  %v4670_v57 = vadd.f32 %v4467_v44, %v4529_v27  ;;  %v1168_v27 = vld [vmem:[%s6113_s1 + $0x8] sm:$0xff] }
 0x15f   : > { %6148 = vst [vmem:[#allocation22_spill] sm:$0xff] %v4636_v19  ;;  %v1172_v19 = vld [vmem:[%s6113_s1 + $0x28] sm:$0xff] }
 0x160   : > { %923 = vmax.xlane.f32.xlu0 %v4634_v36 }
 0x161   : > { %v790_v49 = vpop.f32.mrb[46].mxu0 }
 0x162   : > { %v4644_v40 = vadd.f32 %v4467_v44, %v790_v49  ;;  %v4646_v9 = vpop.f32.mrb[47].mxu0  ;;  %v4666_v49 = vadd.f32 %v4467_v44, %v4509_v16  ;;  %v1167_v16 = vld [vmem:[%s6113_s1] sm:$0xff] }
 0x163   : > { %6149 = vst [vmem:[#allocation23_spill] sm:$0xff] %v4646_v9  ;;  %v3478_v44 = vpack.c.bf16 %v1168_v27, %v1167_v16  ;;  %v3486_v16 = vpack.c.bf16 %v1172_v19, %v1171_v3 }
 0x164   : > { %927 = vmax.xlane.f32.xlu0 %v4641_v25  ;;  %925 = vmax.xlane.f32.xlu1 %v4644_v40 }
 0x165   : > { %3479 = vmatprep.subr.bf16.mxu1 %v3478_v44 }
 0x166   : > { %3481 = vmatpush3.bf16.msra.mxu1 %v3478_v44 }
 0x167   : > { %3483 = vmatprep.subr.bf16.mxu1 %v3482_v56 }
 0x168   : > { %931 = vmax.xlane.f32.xlu0 %v4656_v14  ;;  %929 = vmax.xlane.f32.xlu1 %v4652_v55 }
 0x16a   : > { %3485 = vmatpush3.bf16.msra.mxu1 %v3482_v56 }
 0x16b   : > { %3487 = vmatprep.subr.bf16.mxu1 %v3486_v16 }
 0x16c   : > { %935 = vmax.xlane.f32.xlu0 %v4666_v49  ;;  %933 = vmax.xlane.f32.xlu1 %v4662_v50 }
 0x16e   : > { %3489 = vmatpush3.bf16.msra.mxu1 %v3486_v16 }
 0x16f   : > { %3491 = vmatprep.subr.bf16.mxu1 %v3490_v63 }
 0x170   : > { %939 = vmax.xlane.f32.xlu0 %v4670_v57  ;;  %937 = vmax.xlane.f32.xlu1 %v4676_v5 }
 0x172   : > { %3493 = vmatpush3.bf16.msra.mxu1 %v3490_v63 }
 0x174   : > { %941 = vmax.xlane.f32.xlu1 %v4680_v11 }
 0x195   : > { %v880_v9 = vpop.xlane.xlu0 %879 }
 0x196   : > { %v943_v26 = vsub.f32 %v4472_v52, %v880_v9 }
 0x198   : > { %v975_v27 = vmul.f32 1.442695, %v943_v26 }
 0x199   : > { %v882_v31 = vpop.xlane.xlu0 %881 }
 0x19a   : > { %3599 = vpow2.f32 %v975_v27  ;;  %v944_v51 = vsub.f32 %v4482_v1, %v882_v31 }
 0x19c   : > { %v977_v52 = vmul.f32 1.442695, %v944_v51 }
 0x19d   : > { %v884_v9 = vpop.xlane.xlu1 %883 }
 0x19e   : > { %3601 = vpow2.f32 %v977_v52  ;;  %v945_v3 = vsub.f32 %v4492_v6, %v884_v9 }
 0x1a0   : > { %v979_v19 = vmul.f32 1.442695, %v945_v3 }
 0x1a1   : > { %v886_v26 = vpop.xlane.xlu1 %885 }
 0x1a2   : > { %3603 = vpow2.f32 %v979_v19  ;;  %v946_v44 = vsub.f32 %v4502_v12, %v886_v26  ;;  %v1176_v19 = vld [vmem:[%s6113_s1 + $0x48] sm:$0xff] }
 0x1a4   : > { %v4713_v20 = vpop.eup %3599  ;;  %v981_v27 = vmul.f32 1.442695, %v946_v44 }
 0x1a5   : > { %v888_v1 = vpop.xlane.xlu0 %887  ;;  %1039 = vadd.xlane.f32.xlu0 %v4713_v20 }
 0x1a6   : > { %3605 = vpow2.f32 %v981_v27  ;;  %v947_v56 = vsub.f32 %v4512_v17, %v888_v1 }
 0x1a8   : > { %v4717_v31 = vpop.eup %3601  ;;  %v983_v6 = vmul.f32 1.442695, %v947_v56  ;;  %v1178_v56 = vld [vmem:[%s6113_s1 + $0x58] sm:$0xff] }
 0x1a9   : > { %v890_v51 = vpop.xlane.xlu1 %889  ;;  %1041 = vadd.xlane.f32.xlu1 %v4717_v31 }
 0x1aa   : > { %3607 = vpow2.f32 %v983_v6  ;;  %v948_v16 = vsub.f32 %v4522_v23, %v890_v51  ;;  %v1175_v23 = vld [vmem:[%s6113_s1 + $0x40] sm:$0xff] }
 0x1ab   : > { %v3494_v26 = vpack.c.bf16 %v1176_v19, %v1175_v23  ;;  %v1181_v19 = vld [vmem:[%s6113_s1 + $0x70] sm:$0xff] }
 0x1ac   : > { %v4721_v12 = vpop.eup %3603  ;;  %v985_v63 = vmul.f32 1.442695, %v948_v16 }
 0x1ad   : > { %v892_v21 = vpop.xlane.xlu0 %891  ;;  %1043 = vadd.xlane.f32.xlu0 %v4721_v12  ;;  %3495 = vmatprep.subr.bf16.mxu1 %v3494_v26 }
 0x1ae   : > { %3609 = vpow2.f32 %v985_v63  ;;  %v949_v33 = vsub.f32 %v4532_v28, %v892_v21  ;;  %3497 = vmatpush3.bf16.msra.mxu1 %v3494_v26  ;;  %v1179_v21 = vld [vmem:[%s6113_s1 + $0x60] sm:$0xff]  ;;  %v1182_v26 = vld [vmem:[%s6113_s1 + $0x78] sm:$0xff] }
 0x1b0   : > { %v4725_v52 = vpop.eup %3605  ;;  %v987_v17 = vmul.f32 1.442695, %v949_v33  ;;  %v1180_v33 = vld [vmem:[%s6113_s1 + $0x68] sm:$0xff] }
 0x1b1   : > { %v894_v9 = vpop.xlane.xlu1 %893  ;;  %1045 = vadd.xlane.f32.xlu1 %v4725_v52 }
 0x1b2   : > { %3611 = vpow2.f32 %v987_v17  ;;  %v950_v3 = vsub.f32 %v4542_v34, %v894_v9  ;;  %v1177_v34 = vld [vmem:[%s6113_s1 + $0x50] sm:$0xff]  ;;  %v3502_v17 = vpack.c.bf16 %v1180_v33, %v1179_v21 }
 0x1b3   : > { %v3498_v6 = vpack.c.bf16 %v1178_v56, %v1177_v34 }
 0x1b4   : > { %v4735_v44 = vpop.eup %3607  ;;  %v989_v28 = vmul.f32 1.442695, %v950_v3 }
 0x1b5   : > { %v896_v27 = vpop.xlane.xlu0 %895  ;;  %1047 = vadd.xlane.f32.xlu0 %v4735_v44  ;;  %3499 = vmatprep.subr.bf16.mxu1 %v3498_v6 }
 0x1b6   : > { %3613 = vpow2.f32 %v989_v28  ;;  %v951_v1 = vsub.f32 %v4550_v38, %v896_v27  ;;  %3501 = vmatpush3.bf16.msra.mxu1 %v3498_v6  ;;  %v3506_v28 = vpack.c.bf16 %v1182_v26, %v1181_v19 }
 0x1b7   : > { %3503 = vmatprep.subr.bf16.mxu1 %v3502_v17 }
 0x1b8   : > { %v4745_v51 = vpop.eup %3609  ;;  %v991_v16 = vmul.f32 1.442695, %v951_v1 }
 0x1b9   : > { %v898_v63 = vpop.xlane.xlu1 %897  ;;  %1049 = vadd.xlane.f32.xlu1 %v4745_v51 }
 0x1ba   : > { %3615 = vpow2.f32 %v991_v16  ;;  %v952_v38 = vsub.f32 %v4556_v41, %v898_v63  ;;  %3505 = vmatpush3.bf16.msra.mxu1 %v3502_v17 }
 0x1bb   : > { %3507 = vmatprep.subr.bf16.mxu1 %v3506_v28 }
 0x1bc   : > { %v4755_v9 = vpop.eup %3611  ;;  %v993_v3 = vmul.f32 1.442695, %v952_v38 }
 0x1bd   : > { %v900_v23 = vpop.xlane.xlu0 %899  ;;  %1051 = vadd.xlane.f32.xlu0 %v4755_v9 }
 0x1be   : > { %3617 = vpow2.f32 %v993_v3  ;;  %v953_v41 = vsub.f32 %v4562_v47, %v900_v23  ;;  %3509 = vmatpush3.bf16.msra.mxu1 %v3506_v28 }
 0x1c0   : > { %v4765_v27 = vpop.eup %3613  ;;  %v995_v1 = vmul.f32 1.442695, %v953_v41 }
 0x1c1   : > { %v902_v34 = vpop.xlane.xlu1 %901  ;;  %1053 = vadd.xlane.f32.xlu1 %v4765_v27 }
 0x1c2   : > { %3619 = vpow2.f32 %v995_v1  ;;  %v954_v47 = vsub.f32 %v4568_v53, %v902_v34 }
 0x1c4   : > { %v4769_v56 = vpop.eup %3615  ;;  %v997_v6 = vmul.f32 1.442695, %v954_v47 }
 0x1c5   : > { %v904_v16 = vpop.xlane.xlu0 %903  ;;  %1055 = vadd.xlane.f32.xlu0 %v4769_v56 }
 0x1c6   : > { %3621 = vpow2.f32 %v997_v6  ;;  %v955_v63 = vsub.f32 %v4574_v58, %v904_v16 }
 0x1c8   : > { %v4773_v38 = vpop.eup %3617  ;;  %v999_v21 = vmul.f32 1.442695, %v955_v63 }
 0x1c9   : > { %v906_v33 = vpop.xlane.xlu1 %905  ;;  %1057 = vadd.xlane.f32.xlu1 %v4773_v38 }
 0x1ca   : > { %3623 = vpow2.f32 %v999_v21  ;;  %v956_v17 = vsub.f32 %v4580_v61, %v906_v33 }
 0x1cc   : > { %v4777_v53 = vpop.eup %3619  ;;  %v1001_v3 = vmul.f32 1.442695, %v956_v17 }
 0x1cd   : > { %v908_v23 = vpop.xlane.xlu0 %907  ;;  %1059 = vadd.xlane.f32.xlu0 %v4777_v53 }
 0x1ce   : > { %3625 = vpow2.f32 %v1001_v3  ;;  %v957_v41 = vsub.f32 %v4586_v42, %v908_v23 }
 0x1d0   : > { %v4781_v19 = vpop.eup %3621  ;;  %v1003_v58 = vmul.f32 1.442695, %v957_v41 }
 0x1d1   : > { %v910_v26 = vpop.xlane.xlu1 %909  ;;  %1061 = vadd.xlane.f32.xlu1 %v4781_v19 }
 0x1d2   : > { %3627 = vpow2.f32 %v1003_v58  ;;  %v958_v28 = vsub.f32 %v4592_v22, %v910_v26 }
 0x1d4   : > { %v4785_v1 = vpop.eup %3623  ;;  %v1005_v61 = vmul.f32 1.442695, %v958_v28 }
 0x1d5   : > { %v912_v34 = vpop.xlane.xlu0 %911  ;;  %1063 = vadd.xlane.f32.xlu0 %v4785_v1 }
 0x1d6   : > { %3629 = vpow2.f32 %v1005_v61  ;;  %v959_v47 = vsub.f32 %v4598_v15, %v912_v34 }
 0x1d8   : > { %v4789_v6 = vpop.eup %3625  ;;  %v1007_v42 = vmul.f32 1.442695, %v959_v47 }
 0x1d9   : > { %v914_v16 = vpop.xlane.xlu1 %913  ;;  %1065 = vadd.xlane.f32.xlu1 %v4789_v6 }
 0x1da   : > { %3631 = vpow2.f32 %v1007_v42  ;;  %v960_v63 = vsub.f32 %v4604_v32, %v914_v16 }
 0x1dc   : > { %v4793_v21 = vpop.eup %3627  ;;  %v1009_v22 = vmul.f32 1.442695, %v960_v63 }
 0x1dd   : > { %v916_v33 = vpop.xlane.xlu0 %915  ;;  %1067 = vadd.xlane.f32.xlu0 %v4793_v21 }
 0x1de   : > { %3633 = vpow2.f32 %v1009_v22  ;;  %v961_v17 = vsub.f32 %v4610_v46, %v916_v33 }
 0x1e0   : > { %v4797_v3 = vpop.eup %3629  ;;  %v1011_v15 = vmul.f32 1.442695, %v961_v17 }
 0x1e1   : > { %v918_v23 = vpop.xlane.xlu1 %917  ;;  %1069 = vadd.xlane.f32.xlu1 %v4797_v3 }
 0x1e2   : > { %3635 = vpow2.f32 %v1011_v15  ;;  %v962_v41 = vsub.f32 %v4616_v60, %v918_v23 }
 0x1e4   : > { %v4801_v58 = vpop.eup %3631  ;;  %v1013_v32 = vmul.f32 1.442695, %v962_v41 }
 0x1e5   : > { %v920_v26 = vpop.xlane.xlu0 %919  ;;  %1071 = vadd.xlane.f32.xlu0 %v4801_v58 }
 0x1e6   : > { %3637 = vpow2.f32 %v1013_v32  ;;  %v963_v28 = vsub.f32 %v4622_v10, %v920_v26 }
 0x1e8   : > { %v4805_v61 = vpop.eup %3633  ;;  %v1015_v46 = vmul.f32 1.442695, %v963_v28 }
 0x1e9   : > { %v922_v34 = vpop.xlane.xlu1 %921  ;;  %1073 = vadd.xlane.f32.xlu1 %v4805_v61 }
 0x1ea   : > { %3639 = vpow2.f32 %v1015_v46  ;;  %v964_v47 = vsub.f32 %v4628_v0, %v922_v34 }
 0x1ec   : > { %v4809_v42 = vpop.eup %3635  ;;  %v1017_v60 = vmul.f32 1.442695, %v964_v47 }
 0x1ed   : > { %1075 = vadd.xlane.f32.xlu0 %v4809_v42  ;;  %v924_v16 = vpop.xlane.xlu0 %923 }
 0x1ee   : > { %3641 = vpow2.f32 %v1017_v60  ;;  %v965_v63 = vsub.f32 %v4634_v36, %v924_v16 }
 0x1f0   : > { %v4813_v22 = vpop.eup %3637  ;;  %v1019_v10 = vmul.f32 1.442695, %v965_v63 }
 0x1f1   : > { %v928_v33 = vpop.xlane.xlu0 %927  ;;  %1077 = vadd.xlane.f32.xlu1 %v4813_v22  ;;  %v926_v17 = vpop.xlane.xlu1 %925 }
 0x1f2   : > { %3643 = vpow2.f32 %v1019_v10  ;;  %v967_v15 = vsub.f32 %v4641_v25, %v928_v33  ;;  %v966_v0 = vsub.f32 %v4644_v40, %v926_v17 }
 0x1f4   : > { %v4818_v23 = vpop.eup %3639  ;;  %v1023_v41 = vmul.f32 1.442695, %v967_v15  ;;  %v1021_v32 = vmul.f32 1.442695, %v966_v0 }
 0x1f5   : > { %1079 = vadd.xlane.f32.xlu0 %v4818_v23  ;;  %v932_v26 = vpop.xlane.xlu0 %931  ;;  %v930_v36 = vpop.xlane.xlu1 %929 }
 0x1f6   : > { %3645 = vpow2.f32 %v1023_v41  ;;  %v969_v28 = vsub.f32 %v4656_v14, %v932_v26  ;;  %v968_v46 = vsub.f32 %v4652_v55, %v930_v36 }
 0x1f7   : > { %3647 = vpow2.f32 %v1021_v32 }
 0x1f8   : > { %v4823_v34 = vpop.eup %3641  ;;  %v1027_v47 = vmul.f32 1.442695, %v969_v28  ;;  %v1025_v25 = vmul.f32 1.442695, %v968_v46 }
 0x1f9   : > { %v936_v60 = vpop.xlane.xlu0 %935  ;;  %1081 = vadd.xlane.f32.xlu1 %v4823_v34  ;;  %v934_v40 = vpop.xlane.xlu1 %933 }
 0x1fa   : > { %3649 = vpow2.f32 %v1027_v47  ;;  %v971_v16 = vsub.f32 %v4666_v49, %v936_v60  ;;  %v970_v63 = vsub.f32 %v4662_v50, %v934_v40 }
 0x1fb   : > { %3651 = vpow2.f32 %v1025_v25 }
 0x1fc   : > { %v4828_v10 = vpop.eup %3643  ;;  %v1031_v14 = vmul.f32 1.442695, %v971_v16  ;;  %v1029_v33 = vmul.f32 1.442695, %v970_v63 }
 0x1fd   : > { %1083 = vadd.xlane.f32.xlu0 %v4828_v10  ;;  %v940_v55 = vpop.xlane.xlu0 %939  ;;  %v938_v17 = vpop.xlane.xlu1 %937 }
 0x1fe   : > { %3653 = vpow2.f32 %v1031_v14  ;;  %v973_v15 = vsub.f32 %v4670_v57, %v940_v55  ;;  %v972_v0 = vsub.f32 %v4676_v5, %v938_v17 }
 0x1ff   : > { %3655 = vpow2.f32 %v1029_v33 }
 0x200   : > { %v4833_v41 = vpop.eup %3645  ;;  %v1035_v49 = vmul.f32 1.442695, %v973_v15  ;;  %v1033_v32 = vmul.f32 1.442695, %v972_v0 }
 0x201   : > { %v4835_v50 = vpop.eup %3647  ;;  %1087 = vadd.xlane.f32.xlu0 %v4833_v41  ;;  %v942_v26 = vpop.xlane.xlu1 %941 }
 0x202   : > { %3657 = vpow2.f32 %v1035_v49  ;;  %1085 = vadd.xlane.f32.xlu1 %v4835_v50  ;;  %v974_v36 = vsub.f32 %v4680_v11, %v942_v26 }
 0x203   : > { %3659 = vpow2.f32 %v1033_v32 }
 0x204   : > { %v4840_v28 = vpop.eup %3649  ;;  %v1037_v57 = vmul.f32 1.442695, %v974_v36 }
 0x205   : > { %v4842_v5 = vpop.eup %3651  ;;  %1091 = vadd.xlane.f32.xlu0 %v4840_v28 }
 0x206   : > { %3661 = vpow2.f32 %v1037_v57  ;;  %1089 = vadd.xlane.f32.xlu1 %v4842_v5 }
 0x208   : > { %v4846_v46 = vpop.eup %3653 }
 0x209   : > { %v4848_v47 = vpop.eup %3655  ;;  %1095 = vadd.xlane.f32.xlu0 %v4846_v46 }
 0x20a   : > { %1093 = vadd.xlane.f32.xlu1 %v4848_v47 }
 0x20c   : > { %v4852_v11 = vpop.eup %3657 }
 0x20d   : > { %v4854_v25 = vpop.eup %3659  ;;  %1099 = vadd.xlane.f32.xlu0 %v4852_v11 }
 0x20e   : > { %1097 = vadd.xlane.f32.xlu1 %v4854_v25 }
 0x210   : > { %v4858_v60 = vpop.eup %3661 }
 0x212   : > { %1101 = vadd.xlane.f32.xlu1 %v4858_v60 }
 0x232   : > { %v1040_v40 = vpop.xlane.xlu0 %1039 }
 0x233   : > { %3663 = vrcp.f32 %v1040_v40 }
 0x236   : > { %v1042_v16 = vpop.xlane.xlu1 %1041 }
 0x237   : > { %3665 = vrcp.f32 %v1042_v16 }
 0x23a   : > { %v1044_v63 = vpop.xlane.xlu0 %1043 }
 0x23b   : > { %3667 = vrcp.f32 %v1044_v63 }
 0x23d   : > { %v3664_v14 = vpop.eup %3663 }
 0x23e   : > { %v1046_v33 = vpop.xlane.xlu1 %1045  ;;  %v1135_v55 = vmul.f32 %v3664_v14, %v4713_v20 }
 0x23f   : > { %3669 = vrcp.f32 %v1046_v33 }
 0x240   : > { %3238 = vmatprep.mubr.f32.mxu1 %v1135_v55 }
 0x241   : > { %v3666_v17 = vpop.eup %3665 }
 0x242   : > { %v1048_v15 = vpop.xlane.xlu0 %1047  ;;  %v1136_v0 = vmul.f32 %v3666_v17, %v4717_v31 }
 0x243   : > { %3671 = vrcp.f32 %v1048_v15 }
 0x244   : > { %3239 = vmatmul.mubr.f32.vlgmr.msra.gmra.mrb[16].mxu1 %v1136_v0 }
 0x245   : > { %v3668_v49 = vpop.eup %3667 }
 0x246   : > { %v1050_v32 = vpop.xlane.xlu1 %1049  ;;  %v1137_v26 = vmul.f32 %v3668_v49, %v4721_v12 }
 0x247   : > { %3673 = vrcp.f32 %v1050_v32 }
 0x248   : > { %3241 = vmatprep.mubr.f32.mxu1 %v1137_v26 }
 0x249   : > { %v3670_v36 = vpop.eup %3669 }
 0x24a   : > { %v1052_v57 = vpop.xlane.xlu0 %1051  ;;  %v1138_v40 = vmul.f32 %v3670_v36, %v4725_v52 }
 0x24b   : > { %3675 = vrcp.f32 %v1052_v57 }
 0x24c   : > { %3242 = vmatmul.mubr.f32.gmra.mrb[18].mxu1 %v1138_v40 }
 0x24d   : > { %v3672_v20 = vpop.eup %3671 }
 0x24e   : > { %v1054_v16 = vpop.xlane.xlu1 %1053  ;;  %v1139_v63 = vmul.f32 %v3672_v20, %v4735_v44 }
 0x24f   : > { %3677 = vrcp.f32 %v1054_v16 }
 0x250   : > { %3244 = vmatprep.mubr.f32.mxu1 %v1139_v63 }
 0x251   : > { %v3674_v31 = vpop.eup %3673 }
 0x252   : > { %v1056_v14 = vpop.xlane.xlu0 %1055  ;;  %v1140_v33 = vmul.f32 %v3674_v31, %v4745_v51 }
 0x253   : > { %3679 = vrcp.f32 %v1056_v14 }
 0x254   : > { %3245 = vmatmul.mubr.f32.gmra.mrb[20].mxu1 %v1140_v33 }
 0x255   : > { %v3676_v12 = vpop.eup %3675 }
 0x256   : > { %v1058_v55 = vpop.xlane.xlu1 %1057  ;;  %v1141_v17 = vmul.f32 %v3676_v12, %v4755_v9 }
 0x257   : > { %3681 = vrcp.f32 %v1058_v55 }
 0x258   : > { %3247 = vmatprep.mubr.f32.mxu1 %v1141_v17 }
 0x259   : > { %v3678_v52 = vpop.eup %3677 }
 0x25a   : > { %v1060_v15 = vpop.xlane.xlu0 %1059  ;;  %v1142_v0 = vmul.f32 %v3678_v52, %v4765_v27 }
 0x25b   : > { %3683 = vrcp.f32 %v1060_v15 }
 0x25c   : > { %3248 = vmatmul.mubr.f32.gmra.mrb[22].mxu1 %v1142_v0 }
 0x25d   : > { %v3680_v44 = vpop.eup %3679 }
 0x25e   : > { %v1062_v49 = vpop.xlane.xlu1 %1061  ;;  %v1143_v32 = vmul.f32 %v3680_v44, %v4769_v56 }
 0x25f   : > { %3685 = vrcp.f32 %v1062_v49 }
 0x260   : > { %3250 = vmatprep.mubr.f32.mxu1 %v1143_v32 }
 0x261   : > { %v3682_v51 = vpop.eup %3681 }
 0x262   : > { %v1064_v26 = vpop.xlane.xlu0 %1063  ;;  %v1144_v36 = vmul.f32 %v3682_v51, %v4773_v38 }
 0x263   : > { %3687 = vrcp.f32 %v1064_v26 }
 0x264   : > { %3251 = vmatmul.mubr.f32.gmra.mrb[24].mxu1 %v1144_v36 }
 0x265   : > { %v3684_v9 = vpop.eup %3683 }
 0x266   : > { %v1066_v57 = vpop.xlane.xlu1 %1065  ;;  %v1145_v40 = vmul.f32 %v3684_v9, %v4777_v53 }
 0x267   : > { %3689 = vrcp.f32 %v1066_v57 }
 0x268   : > { %3253 = vmatprep.mubr.f32.mxu1 %v1145_v40 }
 0x269   : > { %v3686_v27 = vpop.eup %3685 }
 0x26a   : > { %v1068_v20 = vpop.xlane.xlu0 %1067  ;;  %v1146_v16 = vmul.f32 %v3686_v27, %v4781_v19 }
 0x26b   : > { %3691 = vrcp.f32 %v1068_v20 }
 0x26c   : > { %3254 = vmatmul.mubr.f32.gmra.mrb[26].mxu1 %v1146_v16 }
 0x26d   : > { %v3688_v56 = vpop.eup %3687 }
 0x26e   : > { %v1070_v63 = vpop.xlane.xlu1 %1069  ;;  %v1147_v31 = vmul.f32 %v3688_v56, %v4785_v1 }
 0x26f   : > { %3693 = vrcp.f32 %v1070_v63 }
 0x270   : > { %3256 = vmatprep.mubr.f32.mxu1 %v1147_v31 }
 0x271   : > { %v3690_v38 = vpop.eup %3689 }
 0x272   : > { %v1072_v14 = vpop.xlane.xlu0 %1071  ;;  %v1148_v33 = vmul.f32 %v3690_v38, %v4789_v6 }
 0x273   : > { %3695 = vrcp.f32 %v1072_v14 }
 0x274   : > { %3257 = vmatmul.mubr.f32.gmra.mrb[28].mxu1 %v1148_v33 }
 0x275   : > { %v3692_v53 = vpop.eup %3691 }
 0x276   : > { %v1074_v12 = vpop.xlane.xlu1 %1073  ;;  %v1149_v55 = vmul.f32 %v3692_v53, %v4793_v21 }
 0x277   : > { %3697 = vrcp.f32 %v1074_v12 }
 0x278   : > { %3259 = vmatprep.mubr.f32.mxu1 %v1149_v55 }
 0x279   : > { %v3694_v19 = vpop.eup %3693 }
 0x27a   : > { %v1076_v17 = vpop.xlane.xlu0 %1075  ;;  %v1150_v52 = vmul.f32 %v3694_v19, %v4797_v3 }
 0x27b   : > { %3699 = vrcp.f32 %v1076_v17 }
 0x27c   : > { %3260 = vmatmul.mubr.f32.gmra.mrb[30].mxu1 %v1150_v52 }
 0x27d   : > { %v3696_v1 = vpop.eup %3695 }
 0x27e   : > { %v1078_v15 = vpop.xlane.xlu1 %1077  ;;  %v1151_v0 = vmul.f32 %v3696_v1, %v4801_v58 }
 0x27f   : > { %3701 = vrcp.f32 %v1078_v15 }
 0x280   : > { %3262 = vmatprep.mubr.f32.mxu1 %v1151_v0 }
 0x281   : > { %v3698_v6 = vpop.eup %3697 }
 0x282   : > { %v1080_v44 = vpop.xlane.xlu0 %1079  ;;  %v1152_v49 = vmul.f32 %v3698_v6, %v4805_v61 }
 0x283   : > { %3703 = vrcp.f32 %v1080_v44  ;;  %v1442_v44 = vsub.s32 1, %v4461_v30 }
 0x284   : > { %3263 = vmatmul.mubr.f32.gmra.mrb[32].mxu1 %v1152_v49 }
 0x285   : > { %v3700_v21 = vpop.eup %3699 }
 0x286   : > { %v1082_v32 = vpop.xlane.xlu1 %1081  ;;  %v1153_v51 = vmul.f32 %v3700_v21, %v4809_v42 }
 0x287   : > { %3705 = vrcp.f32 %v1082_v32 }
 0x288   : > { %3265 = vmatprep.mubr.f32.mxu1 %v1153_v51 }
 0x289   : > { %v3702_v3 = vpop.eup %3701 }
 0x28a   : > { %v1084_v26 = vpop.xlane.xlu0 %1083  ;;  %v1154_v36 = vmul.f32 %v3702_v3, %v4813_v22 }
 0x28b   : > { %3707 = vrcp.f32 %v1084_v26 }
 0x28c   : > { %3266 = vmatmul.mubr.f32.gmra.mrb[34].mxu1 %v1154_v36 }
 0x28d   : > { %v3704_v58 = vpop.eup %3703 }
 0x28e   : > { %v1088_v9 = vpop.xlane.xlu0 %1087  ;;  %v1155_v57 = vmul.f32 %v3704_v58, %v4818_v23 }
 0x28f   : > { %3709 = vrcp.f32 %v1088_v9  ;;  %v1086_v61 = vpop.xlane.xlu1 %1085 }
 0x290   : > { %3711 = vrcp.f32 %v1086_v61  ;;  %3268 = vmatprep.mubr.f32.mxu1 %v1155_v57 }
 0x291   : > { %v3706_v40 = vpop.eup %3705 }
 0x292   : > { %v1092_v27 = vpop.xlane.xlu0 %1091  ;;  %v1156_v42 = vmul.f32 %v3706_v40, %v4823_v34 }
 0x293   : > { %3713 = vrcp.f32 %v1092_v27  ;;  %v1090_v20 = vpop.xlane.xlu1 %1089 }
 0x294   : > { %3715 = vrcp.f32 %v1090_v20  ;;  %3269 = vmatmul.mubr.f32.gmra.mrb[36].mxu1 %v1156_v42 }
 0x295   : > { %v3708_v16 = vpop.eup %3707 }
 0x296   : > { %v1096_v22 = vpop.xlane.xlu0 %1095  ;;  %v1157_v56 = vmul.f32 %v3708_v16, %v4828_v10 }
 0x297   : > { %3717 = vrcp.f32 %v1096_v22  ;;  %v1094_v63 = vpop.xlane.xlu1 %1093 }
 0x298   : > { %3719 = vrcp.f32 %v1094_v63  ;;  %3271 = vmatprep.mubr.f32.mxu1 %v1157_v56 }
 0x299   : > { %v3710_v23 = vpop.eup %3709 }
 0x29a   : > { %v3712_v31 = vpop.eup %3711  ;;  %v1100_v38 = vpop.xlane.xlu0 %1099  ;;  %v1159_v14 = vmul.f32 %v3710_v23, %v4833_v41 }
 0x29b   : > { %3721 = vrcp.f32 %v1100_v38  ;;  %v1098_v33 = vpop.xlane.xlu1 %1097  ;;  %v1158_v34 = vmul.f32 %v3712_v31, %v4835_v50 }
 0x29c   : > { %3723 = vrcp.f32 %v1098_v33 }
 0x29d   : > { %v3714_v53 = vpop.eup %3713  ;;  %3272 = vmatmul.mubr.f32.gmra.mrb[38].mxu1 %v1158_v34 }
 0x29e   : > { %v3716_v12 = vpop.eup %3715  ;;  %3274 = vmatprep.mubr.f32.mxu1 %v1159_v14  ;;  %v1161_v10 = vmul.f32 %v3714_v53, %v4840_v28 }
 0x29f   : > { %v1102_v55 = vpop.xlane.xlu1 %1101  ;;  %v1160_v19 = vmul.f32 %v3716_v12, %v4842_v5 }
 0x2a0   : > { %3725 = vrcp.f32 %v1102_v55 }
 0x2a1   : > { %v3718_v17 = vpop.eup %3717  ;;  %3275 = vmatmul.mubr.f32.gmra.mrb[40].mxu1 %v1160_v19 }
 0x2a2   : > { %v3720_v52 = vpop.eup %3719  ;;  %3277 = vmatprep.mubr.f32.mxu1 %v1161_v10  ;;  %v1163_v41 = vmul.f32 %v3718_v17, %v4846_v46  ;;  %v4111_v46 = vld [vmem:[%s6114_s2] sm:$0x1f] }
 0x2a3   : > { %v1162_v1 = vmul.f32 %v3720_v52, %v4848_v47  ;;  %v4897_v47 = vrot.slane %v4111_v46, %v1442_v44  ;;  %v6152_v44 = vld [vmem:[#allocation18_spill] sm:$0xff] }
 0x2a5   : > { %v3722_v50 = vpop.eup %3721  ;;  %3278 = vmatmul.mubr.f32.gmra.mrb[42].mxu1 %v1162_v1 }
 0x2a6   : > { %v3724_v15 = vpop.eup %3723  ;;  %3280 = vmatprep.mubr.f32.mxu1 %v1163_v41  ;;  %v1165_v0 = vmul.f32 %v3722_v50, %v4852_v11  ;;  %v6150_v50 = vld [vmem:[#allocation17_spill] sm:$0xff] }
 0x2a7   : > { %v1164_v28 = vmul.f32 %v3724_v15, %v4854_v25 }
 0x2a9   : > { %3281 = vmatmul.mubr.f32.gmra.mrb[44].mxu1 %v1164_v28  ;;  %v6151_v28 = vld [vmem:[#allocation19_spill] sm:$0xff] }
 0x2aa   : > { %v3726_v6 = vpop.eup %3725  ;;  %3283 = vmatprep.mubr.f32.mxu1 %v1165_v0 }
 0x2ab   : > { %v1166_v5 = vmul.f32 %v3726_v6, %v4858_v60 }
 0x2ad   : > { %3284 = vmatmul.mubr.f32.gmra.mrb[46].mxu1 %v1166_v5 }
 0x317   : > { %v3240_v49 = vpop.f32.mrb[16].mxu1 }
 0x318   : > { %v1409_v21 = vadd.f32 %v3240_v49, %v4484_v2  ;;  %v1249_v11 = vpop.f32.mrb[17].mxu1 }
 0x319   : > { %v1408_v25 = vadd.f32 %v1249_v11, %v4474_v8  ;;  %v6153_v11 = vld [vmem:[#allocation21_spill] sm:$0xff] }
 0x31a   : > { %v4902_v32 = vadd.f32 %v4897_v47, %v1409_v21 }
 0x31b   : > { %v4905_v60 = vadd.f32 %v4897_v47, %v1408_v25 }
 0x31c   : > { %1478 = vmax.xlane.f32.xlu1 %v4902_v32 }
 0x31d   : > { %1476 = vmax.xlane.f32.xlu0 %v4905_v60 }
 0x31f   : > { %v3243_v51 = vpop.f32.mrb[18].mxu1 }
 0x320   : > { %v1411_v3 = vadd.f32 %v3243_v51, %v4504_v13  ;;  %v1259_v26 = vpop.f32.mrb[19].mxu1 }
 0x321   : > { %v1410_v36 = vadd.f32 %v1259_v26, %v4494_v7 }
 0x322   : > { %v4912_v2 = vadd.f32 %v4897_v47, %v1411_v3  ;;  %v6154_v3 = vld [vmem:[#allocation20_spill] sm:$0xff] }
 0x323   : > { %v4915_v8 = vadd.f32 %v4897_v47, %v1410_v36 }
 0x324   : > { %1482 = vmax.xlane.f32.xlu1 %v4912_v2 }
 0x325   : > { %1480 = vmax.xlane.f32.xlu0 %v4915_v8 }
 0x327   : > { %v3246_v58 = vpop.f32.mrb[20].mxu1 }
 0x328   : > { %v1413_v9 = vadd.f32 %v3246_v58, %v4524_v24  ;;  %v1269_v57 = vpop.f32.mrb[21].mxu1 }
 0x329   : > { %v1412_v61 = vadd.f32 %v1269_v57, %v4514_v18  ;;  %v6155_v57 = vld [vmem:[#allocation23_spill] sm:$0xff] }
 0x32a   : > { %v4922_v13 = vadd.f32 %v4897_v47, %v1413_v9 }
 0x32b   : > { %v4925_v7 = vadd.f32 %v4897_v47, %v1412_v61 }
 0x32c   : > { %1486 = vmax.xlane.f32.xlu1 %v4922_v13 }
 0x32d   : > { %1484 = vmax.xlane.f32.xlu0 %v4925_v7 }
 0x32f   : > { %v3249_v40 = vpop.f32.mrb[22].mxu1 }
 0x330   : > { %v1415_v27 = vadd.f32 %v3249_v40, %v4544_v35  ;;  %v1279_v42 = vpop.f32.mrb[23].mxu1 }
 0x331   : > { %v1414_v20 = vadd.f32 %v1279_v42, %v4534_v29 }
 0x332   : > { %v4932_v24 = vadd.f32 %v4897_v47, %v1415_v27  ;;  %v6156_v27 = vld [vmem:[#allocation22_spill] sm:$0xff] }
 0x333   : > { %v4935_v18 = vadd.f32 %v4897_v47, %v1414_v20 }
 0x334   : > { %1490 = vmax.xlane.f32.xlu1 %v4932_v24 }
 0x335   : > { %1488 = vmax.xlane.f32.xlu0 %v4935_v18 }
 0x337   : > { %v3252_v16 = vpop.f32.mrb[24].mxu1 }
 0x338   : > { %v1417_v22 = vadd.f32 %v3252_v16, %v4558_v45  ;;  %v1289_v56 = vpop.f32.mrb[25].mxu1 }
 0x339   : > { %v1416_v63 = vadd.f32 %v1289_v56, %v4552_v39  ;;  %v6157_v56 = vld [vmem:[#allocation10_spill] sm:$0xff] }
 0x33a   : > { %v4942_v35 = vadd.f32 %v4897_v47, %v1417_v22 }
 0x33b   : > { %v4945_v29 = vadd.f32 %v4897_v47, %v1416_v63 }
 0x33c   : > { %1494 = vmax.xlane.f32.xlu1 %v4942_v35 }
 0x33d   : > { %1492 = vmax.xlane.f32.xlu0 %v4945_v29 }
 0x33f   : > { %v3255_v23 = vpop.f32.mrb[26].mxu1 }
 0x340   : > { %v1419_v31 = vadd.f32 %v3255_v23, %v4570_v54  ;;  %v1299_v38 = vpop.f32.mrb[27].mxu1 }
 0x341   : > { %v1418_v14 = vadd.f32 %v1299_v38, %v4564_v48 }
 0x342   : > { %v4952_v45 = vadd.f32 %v4897_v47, %v1419_v31  ;;  %v6158_v31 = vld [vmem:[#allocation9_spill] sm:$0xff] }
 0x343   : > { %v4955_v39 = vadd.f32 %v4897_v47, %v1418_v14 }
 0x344   : > { %1498 = vmax.xlane.f32.xlu1 %v4952_v45 }
 0x345   : > { %1496 = vmax.xlane.f32.xlu0 %v4955_v39 }
 0x347   : > { %v3258_v33 = vpop.f32.mrb[28].mxu1 }
 0x348   : > { %v1421_v34 = vadd.f32 %v3258_v33, %v4582_v62  ;;  %v1309_v53 = vpop.f32.mrb[29].mxu1 }
 0x349   : > { %v1420_v12 = vadd.f32 %v1309_v53, %v4576_v59  ;;  %v6159_v53 = vld [vmem:[#allocation12_spill] sm:$0xff] }
 0x34a   : > { %v4962_v54 = vadd.f32 %v4897_v47, %v1421_v34 }
 0x34b   : > { %v4965_v48 = vadd.f32 %v4897_v47, %v1420_v12 }
 0x34c   : > { %1502 = vmax.xlane.f32.xlu1 %v4962_v54 }
 0x34d   : > { %1500 = vmax.xlane.f32.xlu0 %v4965_v48 }
 0x34f   : > { %v3261_v10 = vpop.f32.mrb[30].mxu1 }
 0x350   : > { %v1423_v55 = vadd.f32 %v3261_v10, %v4594_v4  ;;  %v1319_v19 = vpop.f32.mrb[31].mxu1 }
 0x351   : > { %v1422_v17 = vadd.f32 %v1319_v19, %v4588_v43 }
 0x352   : > { %v4972_v62 = vadd.f32 %v4897_v47, %v1423_v55  ;;  %v6160_v55 = vld [vmem:[#allocation11_spill] sm:$0xff] }
 0x353   : > { %v4975_v59 = vadd.f32 %v4897_v47, %v1422_v17 }
 0x354   : > { %1506 = vmax.xlane.f32.xlu1 %v4972_v62 }
 0x355   : > { %1504 = vmax.xlane.f32.xlu0 %v4975_v59 }
 0x357   : > { %v3264_v52 = vpop.f32.mrb[32].mxu1 }
 0x358   : > { %v1425_v41 = vadd.f32 %v3264_v52, %v4606_v37  ;;  %v1329_v1 = vpop.f32.mrb[33].mxu1 }
 0x359   : > { %v1424_v15 = vadd.f32 %v1329_v1, %v6150_v50  ;;  %v6161_v1 = vld [vmem:[#allocation14_spill] sm:$0xff] }
 0x35a   : > { %v4982_v4 = vadd.f32 %v4897_v47, %v1425_v41 }
 0x35b   : > { %v4985_v43 = vadd.f32 %v4897_v47, %v1424_v15 }
 0x35c   : > { %1510 = vmax.xlane.f32.xlu1 %v4982_v4 }
 0x35d   : > { %1508 = vmax.xlane.f32.xlu0 %v4985_v43 }
 0x35f   : > { %v3267_v0 = vpop.f32.mrb[34].mxu1 }
 0x360   : > { %v1427_v6 = vadd.f32 %v3267_v0, %v6151_v28  ;;  %v1339_v5 = vpop.f32.mrb[35].mxu1  ;;  %v6162_v0 = vld [vmem:[#allocation13_spill] sm:$0xff] }
 0x361   : > { %v1426_v46 = vadd.f32 %v1339_v5, %v6152_v44 }
 0x362   : > { %v4992_v37 = vadd.f32 %v4897_v47, %v1427_v6 }
 0x363   : > { %v4995_v49 = vadd.f32 %v4897_v47, %v1426_v46  ;;  %v6163_v46 = vld [vmem:[#allocation16_spill] sm:$0xff] }
 0x364   : > { %1514 = vmax.xlane.f32.xlu1 %v4992_v37 }
 0x365   : > { %1512 = vmax.xlane.f32.xlu0 %v4995_v49 }
 0x367   : > { %v3270_v21 = vpop.f32.mrb[36].mxu1 }
 0x368   : > { %v1429_v25 = vadd.f32 %v3270_v21, %v6153_v11  ;;  %v1349_v51 = vpop.f32.mrb[37].mxu1 }
 0x369   : > { %v1428_v26 = vadd.f32 %v1349_v51, %v6154_v3 }
 0x36a   : > { %v5002_v36 = vadd.f32 %v4897_v47, %v1429_v25  ;;  %v6164_v25 = vld [vmem:[#allocation15_spill] sm:$0xff] }
 0x36b   : > { %v5005_v58 = vadd.f32 %v4897_v47, %v1428_v26 }
 0x36c   : > { %1518 = vmax.xlane.f32.xlu1 %v5002_v36 }
 0x36d   : > { %1516 = vmax.xlane.f32.xlu0 %v5005_v58 }
 0x370   : > { %v3273_v9 = vpop.f32.mrb[38].mxu1 }
 0x371   : > { %v1431_v61 = vadd.f32 %v3273_v9, %v6155_v57  ;;  %v1359_v40 = vpop.f32.mrb[39].mxu1  ;;  %v3028_v9 = vld [vmem:[%s6113_s1 + $0x80] sm:$0xff]  ;;  %v3029_v57 = vld [vmem:[%s6113_s1 + $0x88] sm:$0xff] }
 0x372   : > { %v1430_v42 = vadd.f32 %v1359_v40, %v6156_v27  ;;  %v3510_v40 = vpack.c.bf16 %v3029_v57, %v3028_v9 }
 0x373   : > { %v5012_v20 = vadd.f32 %v4897_v47, %v1431_v61  ;;  %v3030_v61 = vld [vmem:[%s6113_s1 + $0x90] sm:$0xff] }
 0x374   : > { %v3276_v16 = vpop.f32.mrb[40].mxu1  ;;  %v5015_v22 = vadd.f32 %v4897_v47, %v1430_v42  ;;  %v3032_v42 = vld [vmem:[%s6113_s1 + $0xa0] sm:$0xff]  ;;  %3511 = vmatprep.subr.bf16.mxu1 %v3510_v40 }
 0x375   : > { %v1433_v63 = vadd.f32 %v3276_v16, %v6157_v56  ;;  %v1369_v23 = vpop.f32.mrb[41].mxu1  ;;  %1522 = vmax.xlane.f32.xlu1 %v5012_v20  ;;  %v3033_v16 = vld [vmem:[%s6113_s1 + $0xa8] sm:$0xff]  ;;  %3513 = vmatpush3.bf16.msra.mxu1 %v3510_v40 }
 0x376   : > { %v1432_v38 = vadd.f32 %v1369_v23, %v6158_v31  ;;  %1520 = vmax.xlane.f32.xlu0 %v5015_v22  ;;  %v3518_v56 = vpack.c.bf16 %v3033_v16, %v3032_v42  ;;  %v3034_v23 = vld [vmem:[%s6113_s1 + $0xb0] sm:$0xff]  ;;  %v3035_v31 = vld [vmem:[%s6113_s1 + $0xb8] sm:$0xff] }
 0x377   : > { %v5022_v14 = vadd.f32 %v4897_v47, %v1433_v63  ;;  %v3038_v16 = vld [vmem:[%s6113_s1 + $0xd0] sm:$0xff] }
 0x378   : > { %v3279_v33 = vpop.f32.mrb[42].mxu1  ;;  %v5025_v34 = vadd.f32 %v4897_v47, %v1432_v38 }
 0x379   : > { %v1435_v12 = vadd.f32 %v3279_v33, %v6159_v53  ;;  %v1379_v10 = vpop.f32.mrb[43].mxu1  ;;  %1526 = vmax.xlane.f32.xlu1 %v5022_v14 }
 0x37a   : > { %v1434_v19 = vadd.f32 %v1379_v10, %v6160_v55  ;;  %1524 = vmax.xlane.f32.xlu0 %v5025_v34  ;;  %v3522_v10 = vpack.c.bf16 %v3035_v31, %v3034_v23  ;;  %v3041_v31 = vld [vmem:[%s6113_s1 + $0xe8] sm:$0xff] }
 0x37b   : > { %v5032_v17 = vadd.f32 %v4897_v47, %v1435_v12 }
 0x37c   : > { %v3282_v52 = vpop.f32.mrb[44].mxu1  ;;  %v5035_v41 = vadd.f32 %v4897_v47, %v1434_v19  ;;  %v3036_v19 = vld [vmem:[%s6113_s1 + $0xc0] sm:$0xff] }
 0x37d   : > { %v1437_v50 = vadd.f32 %v3282_v52, %v6161_v1  ;;  %v1389_v15 = vpop.f32.mrb[45].mxu1  ;;  %1530 = vmax.xlane.f32.xlu1 %v5032_v17  ;;  %v3037_v52 = vld [vmem:[%s6113_s1 + $0xc8] sm:$0xff] }
 0x37e   : > { %v1436_v28 = vadd.f32 %v1389_v15, %v6162_v0  ;;  %1528 = vmax.xlane.f32.xlu0 %v5035_v41 }
 0x37f   : > { %v5042_v6 = vadd.f32 %v4897_v47, %v1437_v50 }
 0x380   : > { %v3285_v5 = vpop.f32.mrb[46].mxu1  ;;  %v5045_v44 = vadd.f32 %v4897_v47, %v1436_v28 }
 0x381   : > { %v1439_v21 = vadd.f32 %v3285_v5, %v6163_v46  ;;  %v1399_v11 = vpop.f32.mrb[47].mxu1  ;;  %1534 = vmax.xlane.f32.xlu1 %v5042_v6 }
 0x382   : > { %v1438_v51 = vadd.f32 %v1399_v11, %v6164_v25  ;;  %1532 = vmax.xlane.f32.xlu0 %v5045_v44 }
 0x383   : > { %v5052_v3 = vadd.f32 %v4897_v47, %v1439_v21 }
 0x384   : > { %v5055_v26 = vadd.f32 %v4897_v47, %v1438_v51  ;;  %v3031_v47 = vld [vmem:[%s6113_s1 + $0x98] sm:$0xff] }
 0x385   : > { %1538 = vmax.xlane.f32.xlu1 %v5052_v3  ;;  %v3514_v27 = vpack.c.bf16 %v3031_v47, %v3030_v61 }
 0x386   : > { %1536 = vmax.xlane.f32.xlu0 %v5055_v26 }
 0x387   : > { %3515 = vmatprep.subr.bf16.mxu1 %v3514_v27 }
 0x388   : > { %3517 = vmatpush3.bf16.msra.mxu1 %v3514_v27 }
 0x389   : > { %3519 = vmatprep.subr.bf16.mxu1 %v3518_v56 }
 0x38c   : > { %3521 = vmatpush3.bf16.msra.mxu1 %v3518_v56  ;;  %v3039_v56 = vld [vmem:[%s6113_s1 + $0xd8] sm:$0xff] }
 0x38d   : > { %3523 = vmatprep.subr.bf16.mxu1 %v3522_v10  ;;  %v3530_v23 = vpack.c.bf16 %v3039_v56, %v3038_v16 }
 0x390   : > { %3525 = vmatpush3.bf16.msra.mxu1 %v3522_v10 }
 0x3a9   : > { %v1479_v63 = vpop.xlane.xlu1 %1478 }
 0x3aa   : > { %v1541_v38 = vsub.f32 %v4902_v32, %v1479_v63  ;;  %v1477_v33 = vpop.xlane.xlu0 %1476  ;;  %v3526_v32 = vpack.c.bf16 %v3037_v52, %v3036_v19  ;;  %v3043_v52 = vld [vmem:[%s6113_s1 + $0xf8] sm:$0xff] }
 0x3ab   : > { %v1540_v53 = vsub.f32 %v4905_v60, %v1477_v33 }
 0x3ac   : > { %v1574_v12 = vmul.f32 1.442695, %v1541_v38  ;;  %3527 = vmatprep.subr.bf16.mxu1 %v3526_v32 }
 0x3ad   : > { %v1572_v55 = vmul.f32 1.442695, %v1540_v53  ;;  %3529 = vmatpush3.bf16.msra.mxu1 %v3526_v32 }
 0x3ae   : > { %3727 = vpow2.f32 %v1574_v12  ;;  %3531 = vmatprep.subr.bf16.mxu1 %v3530_v23 }
 0x3af   : > { %3729 = vpow2.f32 %v1572_v55 }
 0x3b1   : > { %v1483_v1 = vpop.xlane.xlu1 %1482  ;;  %3533 = vmatpush3.bf16.msra.mxu1 %v3530_v23 }
 0x3b2   : > { %v1543_v60 = vsub.f32 %v4912_v2, %v1483_v1  ;;  %v1481_v50 = vpop.xlane.xlu0 %1480 }
 0x3b3   : > { %v1542_v15 = vsub.f32 %v4915_v8, %v1481_v50 }
 0x3b4   : > { %v1578_v0 = vmul.f32 1.442695, %v1543_v60 }
 0x3b5   : > { %v1576_v28 = vmul.f32 1.442695, %v1542_v15 }
 0x3b6   : > { %3731 = vpow2.f32 %v1578_v0 }
 0x3b7   : > { %3733 = vpow2.f32 %v1576_v28 }
 0x3b8   : > { %v5093_v5 = vpop.eup %3727 }
 0x3b9   : > { %v5095_v46 = vpop.eup %3729  ;;  %v1487_v21 = vpop.xlane.xlu1 %1486  ;;  %1638 = vadd.xlane.f32.xlu1 %v5093_v5 }
 0x3ba   : > { %v1545_v11 = vsub.f32 %v4922_v13, %v1487_v21  ;;  %v1485_v2 = vpop.xlane.xlu0 %1484  ;;  %1636 = vadd.xlane.f32.xlu0 %v5095_v46 }
 0x3bb   : > { %v1544_v8 = vsub.f32 %v4925_v7, %v1485_v2 }
 0x3bc   : > { %v1582_v25 = vmul.f32 1.442695, %v1545_v11 }
 0x3bd   : > { %v1580_v51 = vmul.f32 1.442695, %v1544_v8 }
 0x3be   : > { %3735 = vpow2.f32 %v1582_v25 }
 0x3bf   : > { %3737 = vpow2.f32 %v1580_v51 }
 0x3c0   : > { %v5101_v9 = vpop.eup %3731 }
 0x3c1   : > { %v5103_v57 = vpop.eup %3733  ;;  %v1491_v61 = vpop.xlane.xlu1 %1490  ;;  %1642 = vadd.xlane.f32.xlu1 %v5101_v9 }
 0x3c2   : > { %v1547_v40 = vsub.f32 %v4932_v24, %v1491_v61  ;;  %v1489_v47 = vpop.xlane.xlu0 %1488  ;;  %1640 = vadd.xlane.f32.xlu0 %v5103_v57  ;;  %v3040_v24 = vld [vmem:[%s6113_s1 + $0xe0] sm:$0xff] }
 0x3c3   : > { %v1546_v13 = vsub.f32 %v4935_v18, %v1489_v47  ;;  %v3534_v53 = vpack.c.bf16 %v3041_v31, %v3040_v24 }
 0x3c4   : > { %v1586_v27 = vmul.f32 1.442695, %v1547_v40 }
 0x3c5   : > { %v1584_v7 = vmul.f32 1.442695, %v1546_v13  ;;  %3535 = vmatprep.subr.bf16.mxu1 %v3534_v53 }
 0x3c6   : > { %3739 = vpow2.f32 %v1586_v27  ;;  %3537 = vmatpush3.bf16.msra.mxu1 %v3534_v53 }
 0x3c7   : > { %3741 = vpow2.f32 %v1584_v7 }
 0x3c8   : > { %v5109_v42 = vpop.eup %3735 }
 0x3c9   : > { %v5120_v63 = vpop.eup %3737  ;;  %v1495_v18 = vpop.xlane.xlu1 %1494  ;;  %1646 = vadd.xlane.f32.xlu1 %v5109_v42 }
 0x3ca   : > { %v1549_v38 = vsub.f32 %v4942_v35, %v1495_v18  ;;  %v1493_v33 = vpop.xlane.xlu0 %1492  ;;  %1644 = vadd.xlane.f32.xlu0 %v5120_v63  ;;  %v3042_v35 = vld [vmem:[%s6113_s1 + $0xf0] sm:$0xff] }
 0x3cb   : > { %v1548_v12 = vsub.f32 %v4945_v29, %v1493_v33  ;;  %v3538_v1 = vpack.c.bf16 %v3043_v52, %v3042_v35 }
 0x3cc   : > { %v1590_v10 = vmul.f32 1.442695, %v1549_v38 }
 0x3cd   : > { %v1588_v55 = vmul.f32 1.442695, %v1548_v12  ;;  %3539 = vmatprep.subr.bf16.mxu1 %v3538_v1 }
 0x3ce   : > { %3743 = vpow2.f32 %v1590_v10  ;;  %3541 = vmatpush3.bf16.msra.mxu1 %v3538_v1 }
 0x3cf   : > { %3745 = vpow2.f32 %v1588_v55 }
 0x3d0   : > { %v5129_v19 = vpop.eup %3739 }
 0x3d1   : > { %v5137_v32 = vpop.eup %3741  ;;  %v1499_v29 = vpop.xlane.xlu1 %1498  ;;  %1650 = vadd.xlane.f32.xlu1 %v5129_v19 }
 0x3d2   : > { %v1551_v60 = vsub.f32 %v4952_v45, %v1499_v29  ;;  %v1497_v50 = vpop.xlane.xlu0 %1496  ;;  %1648 = vadd.xlane.f32.xlu0 %v5137_v32 }
 0x3d3   : > { %v1550_v15 = vsub.f32 %v4955_v39, %v1497_v50 }
 0x3d4   : > { %v1594_v0 = vmul.f32 1.442695, %v1551_v60 }
 0x3d5   : > { %v1592_v28 = vmul.f32 1.442695, %v1550_v15 }
 0x3d6   : > { %3747 = vpow2.f32 %v1594_v0 }
 0x3d7   : > { %3749 = vpow2.f32 %v1592_v28 }
 0x3d8   : > { %v5143_v21 = vpop.eup %3743 }
 0x3d9   : > { %v5145_v11 = vpop.eup %3745  ;;  %v1503_v2 = vpop.xlane.xlu1 %1502  ;;  %1654 = vadd.xlane.f32.xlu1 %v5143_v21 }
 0x3da   : > { %v1553_v45 = vsub.f32 %v4962_v54, %v1503_v2  ;;  %v1501_v8 = vpop.xlane.xlu0 %1500  ;;  %1652 = vadd.xlane.f32.xlu0 %v5145_v11 }
 0x3db   : > { %v1552_v39 = vsub.f32 %v4965_v48, %v1501_v8 }
 0x3dc   : > { %v1598_v25 = vmul.f32 1.442695, %v1553_v45 }
 0x3dd   : > { %v1596_v51 = vmul.f32 1.442695, %v1552_v39 }
 0x3de   : > { %3751 = vpow2.f32 %v1598_v25 }
 0x3df   : > { %3753 = vpow2.f32 %v1596_v51 }
 0x3e0   : > { %v5151_v61 = vpop.eup %3747 }
 0x3e1   : > { %v5153_v40 = vpop.eup %3749  ;;  %v1507_v47 = vpop.xlane.xlu1 %1506  ;;  %1658 = vadd.xlane.f32.xlu1 %v5151_v61 }
 0x3e2   : > { %v1555_v13 = vsub.f32 %v4972_v62, %v1507_v47  ;;  %v1505_v27 = vpop.xlane.xlu0 %1504  ;;  %1656 = vadd.xlane.f32.xlu0 %v5153_v40 }
 0x3e3   : > { %v1554_v54 = vsub.f32 %v4975_v59, %v1505_v27 }
 0x3e4   : > { %v1602_v7 = vmul.f32 1.442695, %v1555_v13 }
 0x3e5   : > { %v1600_v48 = vmul.f32 1.442695, %v1554_v54 }
 0x3e6   : > { %3755 = vpow2.f32 %v1602_v7 }
 0x3e7   : > { %3757 = vpow2.f32 %v1600_v48 }
 0x3e8   : > { %v5159_v16 = vpop.eup %3751 }
 0x3e9   : > { %v5161_v56 = vpop.eup %3753  ;;  %v1511_v24 = vpop.xlane.xlu1 %1510  ;;  %1662 = vadd.xlane.f32.xlu1 %v5159_v16 }
 0x3ea   : > { %v1557_v18 = vsub.f32 %v4982_v4, %v1511_v24  ;;  %v1509_v23 = vpop.xlane.xlu0 %1508  ;;  %1660 = vadd.xlane.f32.xlu0 %v5161_v56 }
 0x3eb   : > { %v1556_v62 = vsub.f32 %v4985_v43, %v1509_v23 }
 0x3ec   : > { %v1606_v31 = vmul.f32 1.442695, %v1557_v18 }
 0x3ed   : > { %v1604_v59 = vmul.f32 1.442695, %v1556_v62 }
 0x3ee   : > { %3759 = vpow2.f32 %v1606_v31 }
 0x3ef   : > { %3761 = vpow2.f32 %v1604_v59 }
 0x3f0   : > { %v5167_v38 = vpop.eup %3755 }
 0x3f1   : > { %v5169_v33 = vpop.eup %3757  ;;  %v1515_v53 = vpop.xlane.xlu1 %1514  ;;  %1666 = vadd.xlane.f32.xlu1 %v5167_v38 }
 0x3f2   : > { %v1559_v12 = vsub.f32 %v4992_v37, %v1515_v53  ;;  %v1513_v10 = vpop.xlane.xlu0 %1512  ;;  %1664 = vadd.xlane.f32.xlu0 %v5169_v33 }
 0x3f3   : > { %v1558_v4 = vsub.f32 %v4995_v49, %v1513_v10 }
 0x3f4   : > { %v1610_v55 = vmul.f32 1.442695, %v1559_v12 }
 0x3f5   : > { %v1608_v43 = vmul.f32 1.442695, %v1558_v4 }
 0x3f6   : > { %3763 = vpow2.f32 %v1610_v55 }
 0x3f7   : > { %3765 = vpow2.f32 %v1608_v43 }
 0x3f8   : > { %v5175_v35 = vpop.eup %3759 }
 0x3f9   : > { %v5177_v52 = vpop.eup %3761  ;;  %v1519_v29 = vpop.xlane.xlu1 %1518  ;;  %1670 = vadd.xlane.f32.xlu1 %v5175_v35 }
 0x3fa   : > { %v1561_v1 = vsub.f32 %v5002_v36, %v1519_v29  ;;  %v1517_v60 = vpop.xlane.xlu0 %1516  ;;  %1668 = vadd.xlane.f32.xlu0 %v5177_v52 }
 0x3fb   : > { %v1560_v37 = vsub.f32 %v5005_v58, %v1517_v60 }
 0x3fc   : > { %v1614_v50 = vmul.f32 1.442695, %v1561_v1 }
 0x3fd   : > { %v1612_v49 = vmul.f32 1.442695, %v1560_v37 }
 0x3fe   : > { %3767 = vpow2.f32 %v1614_v50 }
 0x3ff   : > { %3769 = vpow2.f32 %v1612_v49 }
 0x400   : > { %v5183_v15 = vpop.eup %3763 }
 0x401   : > { %v5185_v0 = vpop.eup %3765  ;;  %1674 = vadd.xlane.f32.xlu1 %v5183_v15 }
 0x402   : > { %v1523_v28 = vpop.xlane.xlu1 %1522  ;;  %1672 = vadd.xlane.f32.xlu0 %v5185_v0 }
 0x403   : > { %v1563_v36 = vsub.f32 %v5012_v20, %v1523_v28  ;;  %v1521_v2 = vpop.xlane.xlu0 %1520 }
 0x404   : > { %v1562_v45 = vsub.f32 %v5015_v22, %v1521_v2 }
 0x405   : > { %v1618_v8 = vmul.f32 1.442695, %v1563_v36 }
 0x406   : > { %v1616_v58 = vmul.f32 1.442695, %v1562_v45  ;;  %v1527_v39 = vpop.xlane.xlu1 %1526 }
 0x407   : > { %3771 = vpow2.f32 %v1618_v8  ;;  %v1565_v25 = vsub.f32 %v5022_v14, %v1527_v39  ;;  %v1525_v51 = vpop.xlane.xlu0 %1524 }
 0x408   : > { %v5192_v47 = vpop.eup %3767  ;;  %3773 = vpow2.f32 %v1616_v58  ;;  %v1564_v13 = vsub.f32 %v5025_v34, %v1525_v51 }
 0x409   : > { %v5195_v27 = vpop.eup %3769  ;;  %v1622_v54 = vmul.f32 1.442695, %v1565_v25  ;;  %1678 = vadd.xlane.f32.xlu1 %v5192_v47 }
 0x40a   : > { %v1620_v20 = vmul.f32 1.442695, %v1564_v13  ;;  %v1531_v7 = vpop.xlane.xlu1 %1530  ;;  %1676 = vadd.xlane.f32.xlu0 %v5195_v27 }
 0x40b   : > { %3775 = vpow2.f32 %v1622_v54  ;;  %v1567_v22 = vsub.f32 %v5032_v17, %v1531_v7  ;;  %v1529_v48 = vpop.xlane.xlu0 %1528 }
 0x40c   : > { %3777 = vpow2.f32 %v1620_v20  ;;  %v1566_v14 = vsub.f32 %v5035_v41, %v1529_v48 }
 0x40d   : > { %v1626_v24 = vmul.f32 1.442695, %v1567_v22 }
 0x40e   : > { %v1624_v18 = vmul.f32 1.442695, %v1566_v14  ;;  %v1535_v23 = vpop.xlane.xlu1 %1534 }
 0x40f   : > { %3779 = vpow2.f32 %v1626_v24  ;;  %v1569_v34 = vsub.f32 %v5042_v6, %v1535_v23  ;;  %v1533_v62 = vpop.xlane.xlu0 %1532 }
 0x410   : > { %3781 = vpow2.f32 %v1624_v18  ;;  %v1568_v31 = vsub.f32 %v5045_v44, %v1533_v62 }
 0x411   : > { %v5203_v59 = vpop.eup %3771  ;;  %v1630_v53 = vmul.f32 1.442695, %v1569_v34 }
 0x412   : > { %v5205_v12 = vpop.eup %3773  ;;  %v1628_v17 = vmul.f32 1.442695, %v1568_v31  ;;  %1682 = vadd.xlane.f32.xlu1 %v5203_v59  ;;  %v1539_v10 = vpop.xlane.xlu1 %1538 }
 0x413   : > { %3783 = vpow2.f32 %v1630_v53  ;;  %v1571_v41 = vsub.f32 %v5052_v3, %v1539_v10  ;;  %1680 = vadd.xlane.f32.xlu0 %v5205_v12  ;;  %v1537_v4 = vpop.xlane.xlu0 %1536 }
 0x414   : > { %3785 = vpow2.f32 %v1628_v17  ;;  %v1570_v6 = vsub.f32 %v5055_v26, %v1537_v4 }
 0x415   : > { %v5211_v55 = vpop.eup %3775  ;;  %v1634_v44 = vmul.f32 1.442695, %v1571_v41 }
 0x416   : > { %v5213_v43 = vpop.eup %3777  ;;  %v1632_v29 = vmul.f32 1.442695, %v1570_v6  ;;  %1686 = vadd.xlane.f32.xlu1 %v5211_v55 }
 0x417   : > { %3787 = vpow2.f32 %v1634_v44  ;;  %1684 = vadd.xlane.f32.xlu0 %v5213_v43 }
 0x418   : > { %3789 = vpow2.f32 %v1632_v29 }
 0x419   : > { %v5217_v1 = vpop.eup %3779 }
 0x41a   : > { %v5219_v3 = vpop.eup %3781  ;;  %1690 = vadd.xlane.f32.xlu1 %v5217_v1 }
 0x41b   : > { %1688 = vadd.xlane.f32.xlu0 %v5219_v3 }
 0x41d   : > { %v5223_v26 = vpop.eup %3783 }
 0x41e   : > { %v5225_v60 = vpop.eup %3785  ;;  %1694 = vadd.xlane.f32.xlu1 %v5223_v26 }
 0x41f   : > { %1692 = vadd.xlane.f32.xlu0 %v5225_v60 }
 0x421   : > { %v5229_v37 = vpop.eup %3787 }
 0x422   : > { %v5231_v50 = vpop.eup %3789  ;;  %1698 = vadd.xlane.f32.xlu1 %v5229_v37 }
 0x423   : > { %1696 = vadd.xlane.f32.xlu0 %v5231_v50 }
 0x446   : > { %v1639_v49 = vpop.xlane.xlu1 %1638 }
 0x447   : > { %3791 = vrcp.f32 %v1639_v49  ;;  %v1637_v28 = vpop.xlane.xlu0 %1636 }
 0x448   : > { %3793 = vrcp.f32 %v1637_v28 }
 0x44e   : > { %v1643_v36 = vpop.xlane.xlu1 %1642 }
 0x44f   : > { %3795 = vrcp.f32 %v1643_v36  ;;  %v1641_v2 = vpop.xlane.xlu0 %1640 }
 0x450   : > { %3797 = vrcp.f32 %v1641_v2 }
 0x451   : > { %v3792_v45 = vpop.eup %3791 }
 0x452   : > { %v3794_v8 = vpop.eup %3793  ;;  %v1733_v39 = vmul.f32 %v3792_v45, %v5093_v5 }
 0x453   : > { %v1732_v58 = vmul.f32 %v3794_v8, %v5095_v46 }
 0x455   : > { %3318 = vmatprep.mubr.f32.mxu1 %v1732_v58 }
 0x456   : > { %3319 = vmatmul.mubr.f32.vlgmr.msra.gmra.mrb[48].mxu1 %v1733_v39  ;;  %v1647_v25 = vpop.xlane.xlu1 %1646 }
 0x457   : > { %3799 = vrcp.f32 %v1647_v25  ;;  %v1645_v51 = vpop.xlane.xlu0 %1644 }
 0x458   : > { %3801 = vrcp.f32 %v1645_v51 }
 0x459   : > { %v3796_v13 = vpop.eup %3795 }
 0x45a   : > { %v3798_v54 = vpop.eup %3797  ;;  %v1735_v7 = vmul.f32 %v3796_v13, %v5101_v9 }
 0x45b   : > { %v1734_v20 = vmul.f32 %v3798_v54, %v5103_v57 }
 0x45d   : > { %3321 = vmatprep.mubr.f32.mxu1 %v1734_v20 }
 0x45e   : > { %3322 = vmatmul.mubr.f32.gmra.mrb[50].mxu1 %v1735_v7  ;;  %v1651_v22 = vpop.xlane.xlu1 %1650 }
 0x45f   : > { %3803 = vrcp.f32 %v1651_v22  ;;  %v1649_v48 = vpop.xlane.xlu0 %1648 }
 0x460   : > { %3805 = vrcp.f32 %v1649_v48 }
 0x461   : > { %v3800_v46 = vpop.eup %3799 }
 0x462   : > { %v3802_v5 = vpop.eup %3801  ;;  %v1737_v24 = vmul.f32 %v3800_v46, %v5109_v42 }
 0x463   : > { %v1736_v14 = vmul.f32 %v3802_v5, %v5120_v63 }
 0x465   : > { %3324 = vmatprep.mubr.f32.mxu1 %v1736_v14 }
 0x466   : > { %3325 = vmatmul.mubr.f32.gmra.mrb[52].mxu1 %v1737_v24  ;;  %v1655_v18 = vpop.xlane.xlu1 %1654 }
 0x467   : > { %3807 = vrcp.f32 %v1655_v18  ;;  %v1653_v23 = vpop.xlane.xlu0 %1652 }
 0x468   : > { %3809 = vrcp.f32 %v1653_v23 }
 0x469   : > { %v3804_v57 = vpop.eup %3803 }
 0x46a   : > { %v3806_v9 = vpop.eup %3805  ;;  %v1739_v62 = vmul.f32 %v3804_v57, %v5129_v19 }
 0x46b   : > { %v1738_v34 = vmul.f32 %v3806_v9, %v5137_v32 }
 0x46d   : > { %3327 = vmatprep.mubr.f32.mxu1 %v1738_v34 }
 0x46e   : > { %3328 = vmatmul.mubr.f32.gmra.mrb[54].mxu1 %v1739_v62  ;;  %v1659_v31 = vpop.xlane.xlu1 %1658 }
 0x46f   : > { %3811 = vrcp.f32 %v1659_v31  ;;  %v1657_v53 = vpop.xlane.xlu0 %1656 }
 0x470   : > { %3813 = vrcp.f32 %v1657_v53 }
 0x471   : > { %v3808_v63 = vpop.eup %3807 }
 0x472   : > { %v3810_v42 = vpop.eup %3809  ;;  %v1741_v10 = vmul.f32 %v3808_v63, %v5143_v21 }
 0x473   : > { %v1740_v17 = vmul.f32 %v3810_v42, %v5145_v11 }
 0x475   : > { %3330 = vmatprep.mubr.f32.mxu1 %v1740_v17 }
 0x476   : > { %3331 = vmatmul.mubr.f32.gmra.mrb[56].mxu1 %v1741_v10  ;;  %v1663_v41 = vpop.xlane.xlu1 %1662 }
 0x477   : > { %3815 = vrcp.f32 %v1663_v41  ;;  %v1661_v4 = vpop.xlane.xlu0 %1660 }
 0x478   : > { %3817 = vrcp.f32 %v1661_v4 }
 0x479   : > { %v3812_v32 = vpop.eup %3811 }
 0x47a   : > { %v3814_v19 = vpop.eup %3813  ;;  %v1743_v44 = vmul.f32 %v3812_v32, %v5151_v61 }
 0x47b   : > { %v1742_v6 = vmul.f32 %v3814_v19, %v5153_v40 }
 0x47d   : > { %3333 = vmatprep.mubr.f32.mxu1 %v1742_v6 }
 0x47e   : > { %3334 = vmatmul.mubr.f32.gmra.mrb[58].mxu1 %v1743_v44  ;;  %v1667_v29 = vpop.xlane.xlu1 %1666 }
 0x47f   : > { %3819 = vrcp.f32 %v1667_v29  ;;  %v1665_v49 = vpop.xlane.xlu0 %1664 }
 0x480   : > { %3821 = vrcp.f32 %v1665_v49 }
 0x481   : > { %v3816_v11 = vpop.eup %3815 }
 0x482   : > { %v3818_v21 = vpop.eup %3817  ;;  %v1745_v36 = vmul.f32 %v3816_v11, %v5159_v16 }
 0x483   : > { %v1744_v28 = vmul.f32 %v3818_v21, %v5161_v56 }
 0x485   : > { %3336 = vmatprep.mubr.f32.mxu1 %v1744_v28 }
 0x486   : > { %3337 = vmatmul.mubr.f32.gmra.mrb[60].mxu1 %v1745_v36  ;;  %v1671_v2 = vpop.xlane.xlu1 %1670 }
 0x487   : > { %3823 = vrcp.f32 %v1671_v2  ;;  %v1669_v45 = vpop.xlane.xlu0 %1668 }
 0x488   : > { %3825 = vrcp.f32 %v1669_v45 }
 0x489   : > { %v3820_v40 = vpop.eup %3819 }
 0x48a   : > { %v3822_v61 = vpop.eup %3821  ;;  %v1747_v58 = vmul.f32 %v3820_v40, %v5167_v38 }
 0x48b   : > { %v1746_v8 = vmul.f32 %v3822_v61, %v5169_v33 }
 0x48d   : > { %3339 = vmatprep.mubr.f32.mxu1 %v1746_v8 }
 0x48e   : > { %3340 = vmatmul.mubr.f32.gmra.mrb[62].mxu1 %v1747_v58  ;;  %v1675_v39 = vpop.xlane.xlu1 %1674 }
 0x48f   : > { %3827 = vrcp.f32 %v1675_v39  ;;  %v1673_v25 = vpop.xlane.xlu0 %1672 }
 0x490   : > { %3829 = vrcp.f32 %v1673_v25 }
 0x491   : > { %v3824_v56 = vpop.eup %3823 }
 0x492   : > { %v3826_v16 = vpop.eup %3825  ;;  %v1749_v13 = vmul.f32 %v3824_v56, %v5175_v35 }
 0x493   : > { %v1748_v51 = vmul.f32 %v3826_v16, %v5177_v52 }
 0x495   : > { %3342 = vmatprep.mubr.f32.mxu1 %v1748_v51 }
 0x496   : > { %3343 = vmatmul.mubr.f32.gmra.mrb[64].mxu1 %v1749_v13  ;;  %v1679_v54 = vpop.xlane.xlu1 %1678 }
 0x497   : > { %3831 = vrcp.f32 %v1679_v54  ;;  %v1677_v20 = vpop.xlane.xlu0 %1676 }
 0x498   : > { %3833 = vrcp.f32 %v1677_v20 }
 0x499   : > { %v3828_v33 = vpop.eup %3827 }
 0x49a   : > { %v3830_v38 = vpop.eup %3829  ;;  %v1751_v22 = vmul.f32 %v3828_v33, %v5183_v15 }
 0x49b   : > { %v1750_v7 = vmul.f32 %v3830_v38, %v5185_v0 }
 0x49d   : > { %3345 = vmatprep.mubr.f32.mxu1 %v1750_v7 }
 0x49e   : > { %3346 = vmatmul.mubr.f32.gmra.mrb[66].mxu1 %v1751_v22 }
 0x49f   : > { %v1683_v48 = vpop.xlane.xlu1 %1682 }
 0x4a0   : > { %3835 = vrcp.f32 %v1683_v48  ;;  %v1681_v46 = vpop.xlane.xlu0 %1680 }
 0x4a1   : > { %v3832_v52 = vpop.eup %3831  ;;  %3837 = vrcp.f32 %v1681_v46 }
 0x4a2   : > { %v3834_v35 = vpop.eup %3833  ;;  %v1753_v18 = vmul.f32 %v3832_v52, %v5192_v47 }
 0x4a3   : > { %v1687_v5 = vpop.xlane.xlu1 %1686  ;;  %v1752_v14 = vmul.f32 %v3834_v35, %v5195_v27 }
 0x4a4   : > { %3839 = vrcp.f32 %v1687_v5  ;;  %v1685_v24 = vpop.xlane.xlu0 %1684 }
 0x4a5   : > { %3841 = vrcp.f32 %v1685_v24  ;;  %3348 = vmatprep.mubr.f32.mxu1 %v1752_v14 }
 0x4a6   : > { %3349 = vmatmul.mubr.f32.gmra.mrb[68].mxu1 %v1753_v18 }
 0x4a7   : > { %v1691_v0 = vpop.xlane.xlu1 %1690 }
 0x4a8   : > { %3843 = vrcp.f32 %v1691_v0  ;;  %v1689_v15 = vpop.xlane.xlu0 %1688 }
 0x4a9   : > { %3845 = vrcp.f32 %v1689_v15 }
 0x4aa   : > { %v3836_v23 = vpop.eup %3835 }
 0x4ab   : > { %v3838_v57 = vpop.eup %3837  ;;  %v1695_v9 = vpop.xlane.xlu1 %1694  ;;  %v1755_v27 = vmul.f32 %v3836_v23, %v5203_v59 }
 0x4ac   : > { %3847 = vrcp.f32 %v1695_v9  ;;  %v1693_v34 = vpop.xlane.xlu0 %1692  ;;  %v1754_v62 = vmul.f32 %v3838_v57, %v5205_v12 }
 0x4ad   : > { %3849 = vrcp.f32 %v1693_v34 }
 0x4ae   : > { %v3840_v31 = vpop.eup %3839  ;;  %3351 = vmatprep.mubr.f32.mxu1 %v1754_v62 }
 0x4af   : > { %v3842_v47 = vpop.eup %3841  ;;  %3352 = vmatmul.mubr.f32.gmra.mrb[70].mxu1 %v1755_v27  ;;  %v1699_v53 = vpop.xlane.xlu1 %1698  ;;  %v1757_v17 = vmul.f32 %v3840_v31, %v5211_v55 }
 0x4b0   : > { %3851 = vrcp.f32 %v1699_v53  ;;  %v1697_v63 = vpop.xlane.xlu0 %1696  ;;  %v1756_v42 = vmul.f32 %v3842_v47, %v5213_v43 }
 0x4b1   : > { %3853 = vrcp.f32 %v1697_v63 }
 0x4b2   : > { %v3844_v10 = vpop.eup %3843  ;;  %3354 = vmatprep.mubr.f32.mxu1 %v1756_v42 }
 0x4b3   : > { %v3846_v41 = vpop.eup %3845  ;;  %3355 = vmatmul.mubr.f32.gmra.mrb[72].mxu1 %v1757_v17  ;;  %v1759_v59 = vmul.f32 %v3844_v10, %v5217_v1  ;;  %v1783_v1 = vsub.s32 2, %v4461_v30 }
 0x4b4   : > { %v1758_v12 = vmul.f32 %v3846_v41, %v5219_v3  ;;  %v5271_v3 = vld [vmem:[%s6114_s2] sm:$0x1f] }
 0x4b6   : > { %v3848_v4 = vpop.eup %3847  ;;  %3357 = vmatprep.mubr.f32.mxu1 %v1758_v12 }
 0x4b7   : > { %v3850_v32 = vpop.eup %3849  ;;  %3358 = vmatmul.mubr.f32.gmra.mrb[74].mxu1 %v1759_v59  ;;  %v1761_v6 = vmul.f32 %v3848_v4, %v5223_v26 }
 0x4b8   : > { %v1760_v19 = vmul.f32 %v3850_v32, %v5225_v60  ;;  %v5274_v60 = vrot.slane %v5271_v3, %v1783_v1 }
 0x4ba   : > { %v3852_v43 = vpop.eup %3851  ;;  %3360 = vmatprep.mubr.f32.mxu1 %v1760_v19 }
 0x4bb   : > { %v3854_v44 = vpop.eup %3853  ;;  %3361 = vmatmul.mubr.f32.gmra.mrb[76].mxu1 %v1761_v6  ;;  %v1763_v29 = vmul.f32 %v3852_v43, %v5229_v37 }
 0x4bc   : > { %v1762_v55 = vmul.f32 %v3854_v44, %v5231_v50 }
 0x4be   : > { %3363 = vmatprep.mubr.f32.mxu1 %v1762_v55 }
 0x4bf   : > { %3364 = vmatmul.mubr.f32.gmra.mrb[78].mxu1 %v1763_v29 }
 0x529   : > { %v3320_v26 = vpop.f32.mrb[48].mxu1 }
 0x52a   : > { %v5277_v49 = vadd.f32 %v3320_v26, %v5274_v60  ;;  %v1851_v11 = vpop.f32.mrb[49].mxu1 }
 0x52b   : > { %v5280_v50 = vadd.f32 %v1851_v11, %v5274_v60 }
 0x52c   : > { %2012 = vmax.xlane.f32.xlu1 %v5277_v49 }
 0x52d   : > { %2010 = vmax.xlane.f32.xlu0 %v5280_v50 }
 0x531   : > { %v3323_v37 = vpop.f32.mrb[50].mxu1 }
 0x532   : > { %v5285_v21 = vadd.f32 %v3323_v37, %v5274_v60  ;;  %v1861_v28 = vpop.f32.mrb[51].mxu1 }
 0x533   : > { %v5288_v36 = vadd.f32 %v1861_v28, %v5274_v60  ;;  %v3044_v28 = vld [vmem:[%s6113_s1 + $0x100] sm:$0xff] }
 0x534   : > { %2016 = vmax.xlane.f32.xlu1 %v5285_v21 }
 0x535   : > { %2014 = vmax.xlane.f32.xlu0 %v5288_v36 }
 0x539   : > { %v3326_v2 = vpop.f32.mrb[52].mxu1 }
 0x53a   : > { %v5293_v45 = vadd.f32 %v3326_v2, %v5274_v60  ;;  %v1871_v40 = vpop.f32.mrb[53].mxu1  ;;  %v3045_v2 = vld [vmem:[%s6113_s1 + $0x108] sm:$0xff] }
 0x53b   : > { %v5296_v61 = vadd.f32 %v1871_v40, %v5274_v60  ;;  %v3542_v40 = vpack.c.bf16 %v3045_v2, %v3044_v28 }
 0x53c   : > { %2020 = vmax.xlane.f32.xlu1 %v5293_v45 }
 0x53d   : > { %2018 = vmax.xlane.f32.xlu0 %v5296_v61  ;;  %3543 = vmatprep.subr.bf16.mxu0 %v3542_v40 }
 0x53e   : > { %3545 = vmatpush3.bf16.msra.mxu0 %v3542_v40 }
 0x541   : > { %v3329_v8 = vpop.f32.mrb[54].mxu1 }
 0x542   : > { %v5301_v58 = vadd.f32 %v3329_v8, %v5274_v60  ;;  %v1881_v39 = vpop.f32.mrb[55].mxu1  ;;  %v3047_v8 = vld [vmem:[%s6113_s1 + $0x118] sm:$0xff] }
 0x543   : > { %v5304_v25 = vadd.f32 %v1881_v39, %v5274_v60  ;;  %v3048_v39 = vld [vmem:[%s6113_s1 + $0x120] sm:$0xff] }
 0x544   : > { %2024 = vmax.xlane.f32.xlu1 %v5301_v58 }
 0x545   : > { %2022 = vmax.xlane.f32.xlu0 %v5304_v25 }
 0x549   : > { %v3332_v56 = vpop.f32.mrb[56].mxu1 }
 0x54a   : > { %v5309_v16 = vadd.f32 %v3332_v56, %v5274_v60  ;;  %v1891_v51 = vpop.f32.mrb[57].mxu1 }
 0x54b   : > { %v5312_v13 = vadd.f32 %v1891_v51, %v5274_v60  ;;  %v3049_v51 = vld [vmem:[%s6113_s1 + $0x128] sm:$0xff] }
 0x54c   : > { %2028 = vmax.xlane.f32.xlu1 %v5309_v16 }
 0x54d   : > { %2026 = vmax.xlane.f32.xlu0 %v5312_v13 }
 0x551   : > { %v3335_v54 = vpop.f32.mrb[58].mxu1 }
 0x552   : > { %v5317_v20 = vadd.f32 %v3335_v54, %v5274_v60  ;;  %v1901_v33 = vpop.f32.mrb[59].mxu1  ;;  %v3550_v54 = vpack.c.bf16 %v3049_v51, %v3048_v39 }
 0x553   : > { %v5320_v38 = vadd.f32 %v1901_v33, %v5274_v60  ;;  %v3050_v33 = vld [vmem:[%s6113_s1 + $0x130] sm:$0xff] }
 0x554   : > { %2032 = vmax.xlane.f32.xlu1 %v5317_v20 }
 0x555   : > { %2030 = vmax.xlane.f32.xlu0 %v5320_v38 }
 0x559   : > { %v3338_v7 = vpop.f32.mrb[60].mxu1 }
 0x55a   : > { %v5325_v22 = vadd.f32 %v3338_v7, %v5274_v60  ;;  %v1911_v48 = vpop.f32.mrb[61].mxu1  ;;  %v3051_v7 = vld [vmem:[%s6113_s1 + $0x138] sm:$0xff] }
 0x55b   : > { %v5328_v46 = vadd.f32 %v1911_v48, %v5274_v60  ;;  %v3554_v48 = vpack.c.bf16 %v3051_v7, %v3050_v33  ;;  %v3055_v33 = vld [vmem:[%s6113_s1 + $0x158] sm:$0xff] }
 0x55c   : > { %2036 = vmax.xlane.f32.xlu1 %v5325_v22 }
 0x55d   : > { %2034 = vmax.xlane.f32.xlu0 %v5328_v46 }
 0x561   : > { %v3341_v52 = vpop.f32.mrb[62].mxu1 }
 0x562   : > { %v5333_v35 = vadd.f32 %v3341_v52, %v5274_v60  ;;  %v1921_v5 = vpop.f32.mrb[63].mxu1 }
 0x563   : > { %v5336_v14 = vadd.f32 %v1921_v5, %v5274_v60  ;;  %v3052_v5 = vld [vmem:[%s6113_s1 + $0x140] sm:$0xff] }
 0x564   : > { %2040 = vmax.xlane.f32.xlu1 %v5333_v35 }
 0x565   : > { %2038 = vmax.xlane.f32.xlu0 %v5336_v14 }
 0x569   : > { %v3344_v24 = vpop.f32.mrb[64].mxu1 }
 0x56a   : > { %v5341_v18 = vadd.f32 %v3344_v24, %v5274_v60  ;;  %v1931_v0 = vpop.f32.mrb[65].mxu1  ;;  %v3053_v24 = vld [vmem:[%s6113_s1 + $0x148] sm:$0xff] }
 0x56b   : > { %v5344_v15 = vadd.f32 %v1931_v0, %v5274_v60 }
 0x56c   : > { %2044 = vmax.xlane.f32.xlu1 %v5341_v18 }
 0x56d   : > { %2042 = vmax.xlane.f32.xlu0 %v5344_v15 }
 0x571   : > { %v3347_v23 = vpop.f32.mrb[66].mxu1 }
 0x572   : > { %v5349_v57 = vadd.f32 %v3347_v23, %v5274_v60  ;;  %v1941_v9 = vpop.f32.mrb[67].mxu1 }
 0x573   : > { %v5352_v34 = vadd.f32 %v1941_v9, %v5274_v60 }
 0x574   : > { %2048 = vmax.xlane.f32.xlu1 %v5349_v57 }
 0x575   : > { %2046 = vmax.xlane.f32.xlu0 %v5352_v34 }
 0x579   : > { %v3350_v62 = vpop.f32.mrb[68].mxu1 }
 0x57a   : > { %v5357_v27 = vadd.f32 %v3350_v62, %v5274_v60  ;;  %v1951_v31 = vpop.f32.mrb[69].mxu1 }
 0x57b   : > { %v5360_v47 = vadd.f32 %v1951_v31, %v5274_v60  ;;  %v3558_v31 = vpack.c.bf16 %v3053_v24, %v3052_v5 }
 0x57c   : > { %2052 = vmax.xlane.f32.xlu1 %v5357_v27 }
 0x57d   : > { %2050 = vmax.xlane.f32.xlu0 %v5360_v47 }
 0x582   : > { %v3353_v53 = vpop.f32.mrb[70].mxu1 }
 0x583   : > { %v5365_v63 = vadd.f32 %v3353_v53, %v5274_v60  ;;  %v1961_v42 = vpop.f32.mrb[71].mxu1 }
 0x584   : > { %v5368_v17 = vadd.f32 %v1961_v42, %v5274_v60 }
 0x585   : > { %2056 = vmax.xlane.f32.xlu1 %v5365_v63 }
 0x586   : > { %2054 = vmax.xlane.f32.xlu0 %v5368_v17  ;;  %v3356_v10 = vpop.f32.mrb[72].mxu1 }
 0x587   : > { %v5373_v41 = vadd.f32 %v3356_v10, %v5274_v60  ;;  %v1971_v12 = vpop.f32.mrb[73].mxu1 }
 0x588   : > { %v5376_v59 = vadd.f32 %v1971_v12, %v5274_v60 }
 0x589   : > { %2060 = vmax.xlane.f32.xlu1 %v5373_v41 }
 0x58a   : > { %2058 = vmax.xlane.f32.xlu0 %v5376_v59  ;;  %v3359_v4 = vpop.f32.mrb[74].mxu1 }
 0x58b   : > { %v5381_v32 = vadd.f32 %v3359_v4, %v5274_v60  ;;  %v1981_v19 = vpop.f32.mrb[75].mxu1 }
 0x58c   : > { %v5384_v6 = vadd.f32 %v1981_v19, %v5274_v60 }
 0x58d   : > { %2064 = vmax.xlane.f32.xlu1 %v5381_v32 }
 0x58e   : > { %2062 = vmax.xlane.f32.xlu0 %v5384_v6  ;;  %v3362_v43 = vpop.f32.mrb[76].mxu1 }
 0x58f   : > { %v5389_v44 = vadd.f32 %v3362_v43, %v5274_v60  ;;  %v1991_v55 = vpop.f32.mrb[77].mxu1 }
 0x590   : > { %v5392_v29 = vadd.f32 %v1991_v55, %v5274_v60 }
 0x591   : > { %2068 = vmax.xlane.f32.xlu1 %v5389_v44 }
 0x592   : > { %2066 = vmax.xlane.f32.xlu0 %v5392_v29  ;;  %v3365_v1 = vpop.f32.mrb[78].mxu1 }
 0x593   : > { %v5397_v26 = vadd.f32 %v3365_v1, %v5274_v60  ;;  %v2001_v11 = vpop.f32.mrb[79].mxu1 }
 0x594   : > { %v5400_v37 = vadd.f32 %v2001_v11, %v5274_v60  ;;  %v3046_v60 = vld [vmem:[%s6113_s1 + $0x110] sm:$0xff] }
 0x595   : > { %2072 = vmax.xlane.f32.xlu1 %v5397_v26  ;;  %v3546_v56 = vpack.c.bf16 %v3047_v8, %v3046_v60 }
 0x596   : > { %2070 = vmax.xlane.f32.xlu0 %v5400_v37 }
 0x597   : > { %3547 = vmatprep.subr.bf16.mxu0 %v3546_v56 }
 0x598   : > { %3549 = vmatpush3.bf16.msra.mxu0 %v3546_v56 }
 0x599   : > { %3551 = vmatprep.subr.bf16.mxu0 %v3550_v54 }
 0x59c   : > { %3553 = vmatpush3.bf16.msra.mxu0 %v3550_v54  ;;  %v3054_v54 = vld [vmem:[%s6113_s1 + $0x150] sm:$0xff] }
 0x59d   : > { %3555 = vmatprep.subr.bf16.mxu0 %v3554_v48 }
 0x5a0   : > { %3557 = vmatpush3.bf16.msra.mxu0 %v3554_v48 }
 0x5a1   : > { %3559 = vmatprep.subr.bf16.mxu0 %v3558_v31 }
 0x5a4   : > { %3561 = vmatpush3.bf16.msra.mxu0 %v3558_v31  ;;  %v3059_v31 = vld [vmem:[%s6113_s1 + $0x178] sm:$0xff] }
 0x5b9   : > { %v2013_v52 = vpop.xlane.xlu1 %2012 }
 0x5ba   : > { %v2075_v0 = vsub.f32 %v5277_v49, %v2013_v52  ;;  %v2011_v23 = vpop.xlane.xlu0 %2010 }
 0x5bb   : > { %v2074_v9 = vsub.f32 %v5280_v50, %v2011_v23  ;;  %v3057_v23 = vld [vmem:[%s6113_s1 + $0x168] sm:$0xff] }
 0x5bc   : > { %v2108_v62 = vmul.f32 1.442695, %v2075_v0  ;;  %v3056_v0 = vld [vmem:[%s6113_s1 + $0x160] sm:$0xff] }
 0x5bd   : > { %v2106_v53 = vmul.f32 1.442695, %v2074_v9 }
 0x5be   : > { %3855 = vpow2.f32 %v2108_v62  ;;  %v3566_v62 = vpack.c.bf16 %v3057_v23, %v3056_v0 }
 0x5bf   : > { %3857 = vpow2.f32 %v2106_v53 }
 0x5c1   : > { %v2017_v42 = vpop.xlane.xlu1 %2016 }
 0x5c2   : > { %v2077_v10 = vsub.f32 %v5285_v21, %v2017_v42  ;;  %v2015_v12 = vpop.xlane.xlu0 %2014 }
 0x5c3   : > { %v2076_v4 = vsub.f32 %v5288_v36, %v2015_v12 }
 0x5c4   : > { %v2112_v49 = vmul.f32 1.442695, %v2077_v10 }
 0x5c5   : > { %v2110_v19 = vmul.f32 1.442695, %v2076_v4 }
 0x5c6   : > { %3859 = vpow2.f32 %v2112_v49 }
 0x5c7   : > { %3861 = vpow2.f32 %v2110_v19 }
 0x5c8   : > { %v5438_v50 = vpop.eup %3855 }
 0x5c9   : > { %v5440_v43 = vpop.eup %3857  ;;  %2172 = vadd.xlane.f32.xlu1 %v5438_v50  ;;  %v2021_v55 = vpop.xlane.xlu1 %2020 }
 0x5ca   : > { %v2079_v1 = vsub.f32 %v5293_v45, %v2021_v55  ;;  %v2019_v11 = vpop.xlane.xlu0 %2018  ;;  %2170 = vadd.xlane.f32.xlu0 %v5440_v43 }
 0x5cb   : > { %v2078_v21 = vsub.f32 %v5296_v61, %v2019_v11 }
 0x5cc   : > { %v2116_v36 = vmul.f32 1.442695, %v2079_v1 }
 0x5cd   : > { %v2114_v28 = vmul.f32 1.442695, %v2078_v21 }
 0x5ce   : > { %3863 = vpow2.f32 %v2116_v36 }
 0x5cf   : > { %3865 = vpow2.f32 %v2114_v28 }
 0x5d0   : > { %v5446_v2 = vpop.eup %3859 }
 0x5d1   : > { %v5448_v40 = vpop.eup %3861  ;;  %2176 = vadd.xlane.f32.xlu1 %v5446_v2  ;;  %v2025_v60 = vpop.xlane.xlu1 %2024 }
 0x5d2   : > { %v2081_v8 = vsub.f32 %v5301_v58, %v2025_v60  ;;  %v2023_v39 = vpop.xlane.xlu0 %2022  ;;  %2174 = vadd.xlane.f32.xlu0 %v5448_v40 }
 0x5d3   : > { %v2080_v45 = vsub.f32 %v5304_v25, %v2023_v39  ;;  %v3562_v25 = vpack.c.bf16 %v3055_v33, %v3054_v54 }
 0x5d4   : > { %v2120_v56 = vmul.f32 1.442695, %v2081_v8 }
 0x5d5   : > { %v2118_v61 = vmul.f32 1.442695, %v2080_v45  ;;  %3563 = vmatprep.subr.bf16.mxu0 %v3562_v25 }
 0x5d6   : > { %3867 = vpow2.f32 %v2120_v56  ;;  %3565 = vmatpush3.bf16.msra.mxu0 %v3562_v25 }
 0x5d7   : > { %3869 = vpow2.f32 %v2118_v61  ;;  %3567 = vmatprep.subr.bf16.mxu0 %v3566_v62 }
 0x5d8   : > { %v5454_v51 = vpop.eup %3863 }
 0x5d9   : > { %v5462_v58 = vpop.eup %3865  ;;  %2180 = vadd.xlane.f32.xlu1 %v5454_v51  ;;  %v2029_v7 = vpop.xlane.xlu1 %2028 }
 0x5da   : > { %v2083_v48 = vsub.f32 %v5309_v16, %v2029_v7  ;;  %v2027_v52 = vpop.xlane.xlu0 %2026  ;;  %2178 = vadd.xlane.f32.xlu0 %v5462_v58  ;;  %3569 = vmatpush3.bf16.msra.mxu0 %v3566_v62 }
 0x5db   : > { %v2082_v5 = vsub.f32 %v5312_v13, %v2027_v52  ;;  %v3058_v13 = vld [vmem:[%s6113_s1 + $0x170] sm:$0xff] }
 0x5dc   : > { %v2124_v24 = vmul.f32 1.442695, %v2083_v48  ;;  %v3570_v10 = vpack.c.bf16 %v3059_v31, %v3058_v13 }
 0x5dd   : > { %v2122_v9 = vmul.f32 1.442695, %v2082_v5 }
 0x5de   : > { %3871 = vpow2.f32 %v2124_v24  ;;  %3571 = vmatprep.subr.bf16.mxu0 %v3570_v10 }
 0x5df   : > { %3873 = vpow2.f32 %v2122_v9  ;;  %3573 = vmatpush3.bf16.msra.mxu0 %v3570_v10 }
 0x5e0   : > { %v5474_v16 = vpop.eup %3867 }
 0x5e1   : > { %v5482_v53 = vpop.eup %3869  ;;  %2184 = vadd.xlane.f32.xlu1 %v5474_v16  ;;  %v2033_v42 = vpop.xlane.xlu1 %2032 }
 0x5e2   : > { %v2085_v12 = vsub.f32 %v5317_v20, %v2033_v42  ;;  %v2031_v4 = vpop.xlane.xlu0 %2030  ;;  %2182 = vadd.xlane.f32.xlu0 %v5482_v53 }
 0x5e3   : > { %v2084_v49 = vsub.f32 %v5320_v38, %v2031_v4 }
 0x5e4   : > { %v2128_v19 = vmul.f32 1.442695, %v2085_v12 }
 0x5e5   : > { %v2126_v55 = vmul.f32 1.442695, %v2084_v49 }
 0x5e6   : > { %3875 = vpow2.f32 %v2128_v19 }
 0x5e7   : > { %3877 = vpow2.f32 %v2126_v55 }
 0x5e8   : > { %v5488_v1 = vpop.eup %3871 }
 0x5e9   : > { %v5490_v11 = vpop.eup %3873  ;;  %2188 = vadd.xlane.f32.xlu1 %v5488_v1  ;;  %v2037_v21 = vpop.xlane.xlu1 %2036 }
 0x5ea   : > { %v2087_v20 = vsub.f32 %v5325_v22, %v2037_v21  ;;  %v2035_v36 = vpop.xlane.xlu0 %2034  ;;  %2186 = vadd.xlane.f32.xlu0 %v5490_v11 }
 0x5eb   : > { %v2086_v38 = vsub.f32 %v5328_v46, %v2035_v36 }
 0x5ec   : > { %v2132_v28 = vmul.f32 1.442695, %v2087_v20 }
 0x5ed   : > { %v2130_v60 = vmul.f32 1.442695, %v2086_v38 }
 0x5ee   : > { %3879 = vpow2.f32 %v2132_v28 }
 0x5ef   : > { %3881 = vpow2.f32 %v2130_v60 }
 0x5f0   : > { %v5496_v8 = vpop.eup %3875 }
 0x5f1   : > { %v5498_v39 = vpop.eup %3877  ;;  %2192 = vadd.xlane.f32.xlu1 %v5496_v8  ;;  %v2041_v45 = vpop.xlane.xlu1 %2040 }
 0x5f2   : > { %v2089_v56 = vsub.f32 %v5333_v35, %v2041_v45  ;;  %v2039_v61 = vpop.xlane.xlu0 %2038  ;;  %2190 = vadd.xlane.f32.xlu0 %v5498_v39 }
 0x5f3   : > { %v2088_v22 = vsub.f32 %v5336_v14, %v2039_v61 }
 0x5f4   : > { %v2136_v54 = vmul.f32 1.442695, %v2089_v56 }
 0x5f5   : > { %v2134_v46 = vmul.f32 1.442695, %v2088_v22 }
 0x5f6   : > { %3883 = vpow2.f32 %v2136_v54 }
 0x5f7   : > { %3885 = vpow2.f32 %v2134_v46 }
 0x5f8   : > { %v5504_v33 = vpop.eup %3879 }
 0x5f9   : > { %v5506_v7 = vpop.eup %3881  ;;  %2196 = vadd.xlane.f32.xlu1 %v5504_v33  ;;  %v2045_v25 = vpop.xlane.xlu1 %2044 }
 0x5fa   : > { %v2091_v48 = vsub.f32 %v5341_v18, %v2045_v25  ;;  %v2043_v52 = vpop.xlane.xlu0 %2042  ;;  %2194 = vadd.xlane.f32.xlu0 %v5506_v7 }
 0x5fb   : > { %v2090_v35 = vsub.f32 %v5344_v15, %v2043_v52 }
 0x5fc   : > { %v2140_v5 = vmul.f32 1.442695, %v2091_v48 }
 0x5fd   : > { %v2138_v14 = vmul.f32 1.442695, %v2090_v35 }
 0x5fe   : > { %3887 = vpow2.f32 %v2140_v5 }
 0x5ff   : > { %3889 = vpow2.f32 %v2138_v14 }
 0x600   : > { %v5512_v24 = vpop.eup %3883 }
 0x601   : > { %v5514_v0 = vpop.eup %3885  ;;  %2200 = vadd.xlane.f32.xlu1 %v5512_v24  ;;  %v2049_v23 = vpop.xlane.xlu1 %2048 }
 0x602   : > { %v2093_v9 = vsub.f32 %v5349_v57, %v2049_v23  ;;  %v2047_v62 = vpop.xlane.xlu0 %2046  ;;  %2198 = vadd.xlane.f32.xlu0 %v5514_v0 }
 0x603   : > { %v2092_v18 = vsub.f32 %v5352_v34, %v2047_v62 }
 0x604   : > { %v2144_v13 = vmul.f32 1.442695, %v2093_v9 }
 0x605   : > { %v2142_v15 = vmul.f32 1.442695, %v2092_v18 }
 0x606   : > { %3891 = vpow2.f32 %v2144_v13 }
 0x607   : > { %3893 = vpow2.f32 %v2142_v15 }
 0x608   : > { %v5520_v31 = vpop.eup %3887 }
 0x609   : > { %v5522_v42 = vpop.eup %3889  ;;  %2204 = vadd.xlane.f32.xlu1 %v5520_v31  ;;  %v2053_v10 = vpop.xlane.xlu1 %2052 }
 0x60a   : > { %v2095_v12 = vsub.f32 %v5357_v27, %v2053_v10  ;;  %v2051_v4 = vpop.xlane.xlu0 %2050  ;;  %2202 = vadd.xlane.f32.xlu0 %v5522_v42 }
 0x60b   : > { %v2094_v57 = vsub.f32 %v5360_v47, %v2051_v4 }
 0x60c   : > { %v2148_v49 = vmul.f32 1.442695, %v2095_v12 }
 0x60d   : > { %v2146_v34 = vmul.f32 1.442695, %v2094_v57 }
 0x60e   : > { %3895 = vpow2.f32 %v2148_v49 }
 0x60f   : > { %3897 = vpow2.f32 %v2146_v34 }
 0x610   : > { %v5528_v19 = vpop.eup %3891 }
 0x611   : > { %v5530_v55 = vpop.eup %3893  ;;  %2208 = vadd.xlane.f32.xlu1 %v5528_v19 }
 0x612   : > { %v2057_v21 = vpop.xlane.xlu1 %2056  ;;  %2206 = vadd.xlane.f32.xlu0 %v5530_v55 }
 0x613   : > { %v2097_v27 = vsub.f32 %v5365_v63, %v2057_v21  ;;  %v2055_v20 = vpop.xlane.xlu0 %2054 }
 0x614   : > { %v2096_v36 = vsub.f32 %v5368_v17, %v2055_v20 }
 0x615   : > { %v2152_v38 = vmul.f32 1.442695, %v2097_v27 }
 0x616   : > { %v2150_v47 = vmul.f32 1.442695, %v2096_v36  ;;  %v2061_v28 = vpop.xlane.xlu1 %2060 }
 0x617   : > { %3899 = vpow2.f32 %v2152_v38  ;;  %v2099_v60 = vsub.f32 %v5373_v41, %v2061_v28  ;;  %v2059_v45 = vpop.xlane.xlu0 %2058 }
 0x618   : > { %v5537_v56 = vpop.eup %3895  ;;  %3901 = vpow2.f32 %v2150_v47  ;;  %v2098_v61 = vsub.f32 %v5376_v59, %v2059_v45 }
 0x619   : > { %v5540_v22 = vpop.eup %3897  ;;  %v2156_v54 = vmul.f32 1.442695, %v2099_v60  ;;  %2212 = vadd.xlane.f32.xlu1 %v5537_v56 }
 0x61a   : > { %v2154_v63 = vmul.f32 1.442695, %v2098_v61  ;;  %v2065_v46 = vpop.xlane.xlu1 %2064  ;;  %2210 = vadd.xlane.f32.xlu0 %v5540_v22 }
 0x61b   : > { %3903 = vpow2.f32 %v2156_v54  ;;  %v2101_v17 = vsub.f32 %v5381_v32, %v2065_v46  ;;  %v2063_v25 = vpop.xlane.xlu0 %2062 }
 0x61c   : > { %3905 = vpow2.f32 %v2154_v63  ;;  %v2100_v41 = vsub.f32 %v5384_v6, %v2063_v25 }
 0x61d   : > { %v2160_v48 = vmul.f32 1.442695, %v2101_v17 }
 0x61e   : > { %v2158_v52 = vmul.f32 1.442695, %v2100_v41  ;;  %v2069_v35 = vpop.xlane.xlu1 %2068 }
 0x61f   : > { %3907 = vpow2.f32 %v2160_v48  ;;  %v2103_v59 = vsub.f32 %v5389_v44, %v2069_v35  ;;  %v2067_v5 = vpop.xlane.xlu0 %2066 }
 0x620   : > { %3909 = vpow2.f32 %v2158_v52  ;;  %v2102_v14 = vsub.f32 %v5392_v29, %v2067_v5 }
 0x621   : > { %v5548_v23 = vpop.eup %3899  ;;  %v2164_v9 = vmul.f32 1.442695, %v2103_v59 }
 0x622   : > { %v5550_v62 = vpop.eup %3901  ;;  %v2162_v32 = vmul.f32 1.442695, %v2102_v14  ;;  %2216 = vadd.xlane.f32.xlu1 %v5548_v23  ;;  %v2073_v18 = vpop.xlane.xlu1 %2072 }
 0x623   : > { %3911 = vpow2.f32 %v2164_v9  ;;  %v2105_v6 = vsub.f32 %v5397_v26, %v2073_v18  ;;  %2214 = vadd.xlane.f32.xlu0 %v5550_v62  ;;  %v2071_v13 = vpop.xlane.xlu0 %2070 }
 0x624   : > { %3913 = vpow2.f32 %v2162_v32  ;;  %v2104_v44 = vsub.f32 %v5400_v37, %v2071_v13 }
 0x625   : > { %v5556_v15 = vpop.eup %3903  ;;  %v2168_v29 = vmul.f32 1.442695, %v2105_v6 }
 0x626   : > { %v5558_v10 = vpop.eup %3905  ;;  %v2166_v12 = vmul.f32 1.442695, %v2104_v44  ;;  %2220 = vadd.xlane.f32.xlu1 %v5556_v15 }
 0x627   : > { %3915 = vpow2.f32 %v2168_v29  ;;  %2218 = vadd.xlane.f32.xlu0 %v5558_v10 }
 0x628   : > { %3917 = vpow2.f32 %v2166_v12 }
 0x629   : > { %v5562_v4 = vpop.eup %3907 }
 0x62a   : > { %v5564_v26 = vpop.eup %3909  ;;  %2224 = vadd.xlane.f32.xlu1 %v5562_v4 }
 0x62b   : > { %2222 = vadd.xlane.f32.xlu0 %v5564_v26 }
 0x62d   : > { %v5568_v37 = vpop.eup %3911 }
 0x62e   : > { %v5570_v57 = vpop.eup %3913  ;;  %2228 = vadd.xlane.f32.xlu1 %v5568_v37 }
 0x62f   : > { %2226 = vadd.xlane.f32.xlu0 %v5570_v57 }
 0x631   : > { %v5574_v49 = vpop.eup %3915 }
 0x632   : > { %v5576_v34 = vpop.eup %3917  ;;  %2232 = vadd.xlane.f32.xlu1 %v5574_v49 }
 0x633   : > { %2230 = vadd.xlane.f32.xlu0 %v5576_v34 }
 0x656   : > { %v2173_v21 = vpop.xlane.xlu1 %2172 }
 0x657   : > { %3919 = vrcp.f32 %v2173_v21  ;;  %v2171_v27 = vpop.xlane.xlu0 %2170 }
 0x658   : > { %3921 = vrcp.f32 %v2171_v27 }
 0x65e   : > { %v2177_v20 = vpop.xlane.xlu1 %2176 }
 0x65f   : > { %3923 = vrcp.f32 %v2177_v20  ;;  %v2175_v36 = vpop.xlane.xlu0 %2174 }
 0x660   : > { %3925 = vrcp.f32 %v2175_v36 }
 0x661   : > { %v3920_v38 = vpop.eup %3919 }
 0x662   : > { %v3922_v47 = vpop.eup %3921  ;;  %v5584_v60 = vmul.f32 %v3920_v38, %v5438_v50 }
 0x663   : > { %v5581_v28 = vmul.f32 %v3922_v47, %v5440_v43 }
 0x665   : > { %3398 = vmatprep.mubr.f32.mxu0 %v5581_v28 }
 0x666   : > { %3399 = vmatmul.mubr.f32.vlgmr.msra.gmra.mrb[48].mxu0 %v5584_v60  ;;  %v2181_v45 = vpop.xlane.xlu1 %2180 }
 0x667   : > { %3927 = vrcp.f32 %v2181_v45  ;;  %v2179_v61 = vpop.xlane.xlu0 %2178 }
 0x668   : > { %3929 = vrcp.f32 %v2179_v61 }
 0x669   : > { %v3924_v54 = vpop.eup %3923 }
 0x66a   : > { %v3926_v63 = vpop.eup %3925  ;;  %v5592_v17 = vmul.f32 %v3924_v54, %v5446_v2 }
 0x66b   : > { %v5589_v46 = vmul.f32 %v3926_v63, %v5448_v40 }
 0x66d   : > { %3401 = vmatprep.mubr.f32.mxu0 %v5589_v46 }
 0x66e   : > { %3402 = vmatmul.mubr.f32.gmra.mrb[50].mxu0 %v5592_v17  ;;  %v2185_v50 = vpop.xlane.xlu1 %2184 }
 0x66f   : > { %3931 = vrcp.f32 %v2185_v50  ;;  %v2183_v43 = vpop.xlane.xlu0 %2182 }
 0x670   : > { %3933 = vrcp.f32 %v2183_v43 }
 0x671   : > { %v3928_v25 = vpop.eup %3927 }
 0x672   : > { %v3930_v41 = vpop.eup %3929  ;;  %v5600_v52 = vmul.f32 %v3928_v25, %v5454_v51 }
 0x673   : > { %v5597_v48 = vmul.f32 %v3930_v41, %v5462_v58 }
 0x675   : > { %3404 = vmatprep.mubr.f32.mxu0 %v5597_v48 }
 0x676   : > { %3405 = vmatmul.mubr.f32.gmra.mrb[52].mxu0 %v5600_v52  ;;  %v2189_v2 = vpop.xlane.xlu1 %2188 }
 0x677   : > { %3935 = vrcp.f32 %v2189_v2  ;;  %v2187_v40 = vpop.xlane.xlu0 %2186 }
 0x678   : > { %3937 = vrcp.f32 %v2187_v40 }
 0x679   : > { %v3932_v35 = vpop.eup %3931 }
 0x67a   : > { %v3934_v59 = vpop.eup %3933  ;;  %v5608_v14 = vmul.f32 %v3932_v35, %v5474_v16 }
 0x67b   : > { %v5605_v5 = vmul.f32 %v3934_v59, %v5482_v53 }
 0x67d   : > { %3407 = vmatprep.mubr.f32.mxu0 %v5605_v5 }
 0x67e   : > { %3408 = vmatmul.mubr.f32.gmra.mrb[54].mxu0 %v5608_v14  ;;  %v2193_v51 = vpop.xlane.xlu1 %2192 }
 0x67f   : > { %3939 = vrcp.f32 %v2193_v51  ;;  %v2191_v58 = vpop.xlane.xlu0 %2190 }
 0x680   : > { %3941 = vrcp.f32 %v2191_v58 }
 0x681   : > { %v3936_v9 = vpop.eup %3935 }
 0x682   : > { %v3938_v32 = vpop.eup %3937  ;;  %v5616_v6 = vmul.f32 %v3936_v9, %v5488_v1 }
 0x683   : > { %v5613_v18 = vmul.f32 %v3938_v32, %v5490_v11 }
 0x685   : > { %3410 = vmatprep.mubr.f32.mxu0 %v5613_v18 }
 0x686   : > { %3411 = vmatmul.mubr.f32.gmra.mrb[56].mxu0 %v5616_v6  ;;  %v2197_v16 = vpop.xlane.xlu1 %2196 }
 0x687   : > { %3943 = vrcp.f32 %v2197_v16  ;;  %v2195_v53 = vpop.xlane.xlu0 %2194 }
 0x688   : > { %3945 = vrcp.f32 %v2195_v53 }
 0x689   : > { %v3940_v13 = vpop.eup %3939 }
 0x68a   : > { %v3942_v44 = vpop.eup %3941  ;;  %v5624_v12 = vmul.f32 %v3940_v13, %v5496_v8 }
 0x68b   : > { %v5621_v29 = vmul.f32 %v3942_v44, %v5498_v39 }
 0x68d   : > { %3413 = vmatprep.mubr.f32.mxu0 %v5621_v29 }
 0x68e   : > { %3414 = vmatmul.mubr.f32.gmra.mrb[58].mxu0 %v5624_v12  ;;  %v2201_v1 = vpop.xlane.xlu1 %2200 }
 0x68f   : > { %3947 = vrcp.f32 %v2201_v1  ;;  %v2199_v11 = vpop.xlane.xlu0 %2198 }
 0x690   : > { %3949 = vrcp.f32 %v2199_v11 }
 0x691   : > { %v3944_v21 = vpop.eup %3943 }
 0x692   : > { %v3946_v27 = vpop.eup %3945  ;;  %v5632_v36 = vmul.f32 %v3944_v21, %v5504_v33 }
 0x693   : > { %v5629_v20 = vmul.f32 %v3946_v27, %v5506_v7 }
 0x695   : > { %3416 = vmatprep.mubr.f32.mxu0 %v5629_v20 }
 0x696   : > { %3417 = vmatmul.mubr.f32.gmra.mrb[60].mxu0 %v5632_v36  ;;  %v2205_v8 = vpop.xlane.xlu1 %2204 }
 0x697   : > { %3951 = vrcp.f32 %v2205_v8  ;;  %v2203_v39 = vpop.xlane.xlu0 %2202 }
 0x698   : > { %3953 = vrcp.f32 %v2203_v39 }
 0x699   : > { %v3948_v38 = vpop.eup %3947 }
 0x69a   : > { %v3950_v47 = vpop.eup %3949  ;;  %v5640_v61 = vmul.f32 %v3948_v38, %v5512_v24 }
 0x69b   : > { %v5637_v45 = vmul.f32 %v3950_v47, %v5514_v0 }
 0x69d   : > { %3419 = vmatprep.mubr.f32.mxu0 %v5637_v45 }
 0x69e   : > { %3420 = vmatmul.mubr.f32.gmra.mrb[62].mxu0 %v5640_v61  ;;  %v2209_v33 = vpop.xlane.xlu1 %2208 }
 0x69f   : > { %3955 = vrcp.f32 %v2209_v33  ;;  %v2207_v7 = vpop.xlane.xlu0 %2206 }
 0x6a0   : > { %3957 = vrcp.f32 %v2207_v7 }
 0x6a1   : > { %v3952_v54 = vpop.eup %3951 }
 0x6a2   : > { %v3954_v63 = vpop.eup %3953  ;;  %v5648_v43 = vmul.f32 %v3952_v54, %v5520_v31 }
 0x6a3   : > { %v5645_v50 = vmul.f32 %v3954_v63, %v5522_v42 }
 0x6a5   : > { %3422 = vmatprep.mubr.f32.mxu0 %v5645_v50 }
 0x6a6   : > { %3423 = vmatmul.mubr.f32.gmra.mrb[64].mxu0 %v5648_v43  ;;  %v2213_v24 = vpop.xlane.xlu1 %2212 }
 0x6a7   : > { %3959 = vrcp.f32 %v2213_v24  ;;  %v2211_v0 = vpop.xlane.xlu0 %2210 }
 0x6a8   : > { %3961 = vrcp.f32 %v2211_v0 }
 0x6a9   : > { %v3956_v25 = vpop.eup %3955 }
 0x6aa   : > { %v3958_v41 = vpop.eup %3957  ;;  %v5656_v40 = vmul.f32 %v3956_v25, %v5528_v19 }
 0x6ab   : > { %v5653_v2 = vmul.f32 %v3958_v41, %v5530_v55 }
 0x6ac   : > { %6166 = vst [vmem:[#allocation19_spill] sm:$0xff] %v5656_v40 }
 0x6ad   : > { %6165 = vst [vmem:[#allocation17_spill] sm:$0xff] %v5653_v2  ;;  %3425 = vmatprep.mubr.f32.mxu0 %v5653_v2 }
 0x6ae   : > { %3426 = vmatmul.mubr.f32.gmra.mrb[66].mxu0 %v5656_v40 }
 0x6af   : > { %v2217_v31 = vpop.xlane.xlu1 %2216 }
 0x6b0   : > { %3963 = vrcp.f32 %v2217_v31  ;;  %v2215_v42 = vpop.xlane.xlu0 %2214 }
 0x6b1   : > { %v3960_v35 = vpop.eup %3959  ;;  %3965 = vrcp.f32 %v2215_v42 }
 0x6b2   : > { %v3962_v59 = vpop.eup %3961  ;;  %v5664_v9 = vmul.f32 %v3960_v35, %v5537_v56 }
 0x6b3   : > { %v2221_v51 = vpop.xlane.xlu1 %2220  ;;  %v5661_v58 = vmul.f32 %v3962_v59, %v5540_v22 }
 0x6b4   : > { %3967 = vrcp.f32 %v2221_v51  ;;  %v2219_v55 = vpop.xlane.xlu0 %2218  ;;  %6168 = vst [vmem:[#allocation21_spill] sm:$0xff] %v5664_v9 }
 0x6b5   : > { %6167 = vst [vmem:[#allocation18_spill] sm:$0xff] %v5661_v58  ;;  %3969 = vrcp.f32 %v2219_v55  ;;  %3428 = vmatprep.mubr.f32.mxu0 %v5661_v58 }
 0x6b6   : > { %3429 = vmatmul.mubr.f32.gmra.mrb[68].mxu0 %v5664_v9 }
 0x6b7   : > { %v2225_v19 = vpop.xlane.xlu1 %2224 }
 0x6b8   : > { %3971 = vrcp.f32 %v2225_v19  ;;  %v2223_v32 = vpop.xlane.xlu0 %2222 }
 0x6b9   : > { %3973 = vrcp.f32 %v2223_v32 }
 0x6ba   : > { %v3964_v16 = vpop.eup %3963 }
 0x6bb   : > { %v3966_v53 = vpop.eup %3965  ;;  %v2229_v13 = vpop.xlane.xlu1 %2228  ;;  %v5672_v56 = vmul.f32 %v3964_v16, %v5548_v23 }
 0x6bc   : > { %3975 = vrcp.f32 %v2229_v13  ;;  %v2227_v22 = vpop.xlane.xlu0 %2226  ;;  %v5669_v44 = vmul.f32 %v3966_v53, %v5550_v62 }
 0x6bd   : > { %3977 = vrcp.f32 %v2227_v22  ;;  %6170 = vst [vmem:[#allocation23_spill] sm:$0xff] %v5672_v56 }
 0x6be   : > { %6169 = vst [vmem:[#allocation20_spill] sm:$0xff] %v5669_v44  ;;  %v3968_v1 = vpop.eup %3967  ;;  %3431 = vmatprep.mubr.f32.mxu0 %v5669_v44 }
 0x6bf   : > { %v3970_v11 = vpop.eup %3969  ;;  %3432 = vmatmul.mubr.f32.gmra.mrb[70].mxu0 %v5672_v56  ;;  %v2233_v21 = vpop.xlane.xlu1 %2232  ;;  %v5680_v62 = vmul.f32 %v3968_v1, %v5556_v15 }
 0x6c0   : > { %3979 = vrcp.f32 %v2233_v21  ;;  %v2231_v27 = vpop.xlane.xlu0 %2230  ;;  %v5677_v8 = vmul.f32 %v3970_v11, %v5558_v10 }
 0x6c1   : > { %3981 = vrcp.f32 %v2231_v27  ;;  %6172 = vst [vmem:[#allocation10_spill] sm:$0xff] %v5680_v62 }
 0x6c2   : > { %6171 = vst [vmem:[#allocation22_spill] sm:$0xff] %v5677_v8  ;;  %v3972_v39 = vpop.eup %3971  ;;  %3434 = vmatprep.mubr.f32.mxu0 %v5677_v8 }
 0x6c3   : > { %v3974_v23 = vpop.eup %3973  ;;  %3435 = vmatmul.mubr.f32.gmra.mrb[72].mxu0 %v5680_v62  ;;  %v5688_v47 = vmul.f32 %v3972_v39, %v5562_v4 }
 0x6c4   : > { %v5685_v38 = vmul.f32 %v3974_v23, %v5564_v26 }
 0x6c5   : > { %6174 = vst [vmem:[#allocation12_spill] sm:$0xff] %v5688_v47 }
 0x6c6   : > { %6173 = vst [vmem:[#allocation9_spill] sm:$0xff] %v5685_v38  ;;  %v3976_v33 = vpop.eup %3975  ;;  %3437 = vmatprep.mubr.f32.mxu0 %v5685_v38 }
 0x6c7   : > { %v3978_v10 = vpop.eup %3977  ;;  %3438 = vmatmul.mubr.f32.gmra.mrb[74].mxu0 %v5688_v47  ;;  %v5696_v7 = vmul.f32 %v3976_v33, %v5568_v37 }
 0x6c8   : > { %v5693_v15 = vmul.f32 %v3978_v10, %v5570_v57  ;;  %v2317_v57 = vsub.s32 3, %v4461_v30 }
 0x6c9   : > { %6176 = vst [vmem:[#allocation14_spill] sm:$0xff] %v5696_v7 }
 0x6ca   : > { %6175 = vst [vmem:[#allocation11_spill] sm:$0xff] %v5693_v15  ;;  %v3980_v54 = vpop.eup %3979  ;;  %3440 = vmatprep.mubr.f32.mxu0 %v5693_v15  ;;  %v5710_v37 = vrot.slane %v5271_v3, %v2317_v57 }
 0x6cb   : > { %v3982_v26 = vpop.eup %3981  ;;  %3441 = vmatmul.mubr.f32.gmra.mrb[76].mxu0 %v5696_v7  ;;  %v5704_v63 = vmul.f32 %v3980_v54, %v5574_v49 }
 0x6cc   : > { %v5701_v4 = vmul.f32 %v3982_v26, %v5576_v34 }
 0x6cd   : > { %6178 = vst [vmem:[#allocation16_spill] sm:$0xff] %v5704_v63 }
 0x6ce   : > { %6177 = vst [vmem:[#allocation13_spill] sm:$0xff] %v5701_v4  ;;  %3443 = vmatprep.mubr.f32.mxu0 %v5701_v4 }
 0x6cf   : > { %3444 = vmatmul.mubr.f32.gmra.mrb[78].mxu0 %v5704_v63 }
 0x739   : > { %v3400_v24 = vpop.f32.mrb[48].mxu0 }
 0x73a   : > { %v5713_v0 = vadd.f32 %v3400_v24, %v5710_v37  ;;  %v2385_v25 = vpop.f32.mrb[49].mxu0 }
 0x73b   : > { %v5716_v34 = vadd.f32 %v2385_v25, %v5710_v37 }
 0x73c   : > { %2546 = vmax.xlane.f32.xlu1 %v5713_v0 }
 0x73d   : > { %2544 = vmax.xlane.f32.xlu0 %v5716_v34 }
 0x741   : > { %v3403_v49 = vpop.f32.mrb[50].mxu0 }
 0x742   : > { %v5721_v41 = vadd.f32 %v3403_v49, %v5710_v37  ;;  %v2395_v31 = vpop.f32.mrb[51].mxu0 }
 0x743   : > { %v5724_v3 = vadd.f32 %v2395_v31, %v5710_v37 }
 0x744   : > { %2550 = vmax.xlane.f32.xlu1 %v5721_v41 }
 0x745   : > { %2548 = vmax.xlane.f32.xlu0 %v5724_v3 }
 0x749   : > { %v3406_v42 = vpop.f32.mrb[52].mxu0 }
 0x74a   : > { %v5729_v35 = vadd.f32 %v3406_v42, %v5710_v37  ;;  %v2405_v59 = vpop.f32.mrb[53].mxu0 }
 0x74b   : > { %v5732_v51 = vadd.f32 %v2405_v59, %v5710_v37 }
 0x74c   : > { %2554 = vmax.xlane.f32.xlu1 %v5729_v35 }
 0x74d   : > { %2552 = vmax.xlane.f32.xlu0 %v5732_v51 }
 0x751   : > { %v3409_v55 = vpop.f32.mrb[54].mxu0 }
 0x752   : > { %v5737_v19 = vadd.f32 %v3409_v55, %v5710_v37  ;;  %v2415_v32 = vpop.f32.mrb[55].mxu0 }
 0x753   : > { %v5740_v16 = vadd.f32 %v2415_v32, %v5710_v37 }
 0x754   : > { %2558 = vmax.xlane.f32.xlu1 %v5737_v19 }
 0x755   : > { %2556 = vmax.xlane.f32.xlu0 %v5740_v16 }
 0x759   : > { %v3412_v53 = vpop.f32.mrb[56].mxu0 }
 0x75a   : > { %v5745_v13 = vadd.f32 %v3412_v53, %v5710_v37  ;;  %v2425_v22 = vpop.f32.mrb[57].mxu0 }
 0x75b   : > { %v5748_v1 = vadd.f32 %v2425_v22, %v5710_v37 }
 0x75c   : > { %2562 = vmax.xlane.f32.xlu1 %v5745_v13 }
 0x75d   : > { %2560 = vmax.xlane.f32.xlu0 %v5748_v1 }
 0x761   : > { %v3415_v11 = vpop.f32.mrb[58].mxu0 }
 0x762   : > { %v5753_v21 = vadd.f32 %v3415_v11, %v5710_v37  ;;  %v2435_v27 = vpop.f32.mrb[59].mxu0 }
 0x763   : > { %v5756_v39 = vadd.f32 %v2435_v27, %v5710_v37 }
 0x764   : > { %2566 = vmax.xlane.f32.xlu1 %v5753_v21 }
 0x765   : > { %2564 = vmax.xlane.f32.xlu0 %v5756_v39 }
 0x769   : > { %v3418_v23 = vpop.f32.mrb[60].mxu0 }
 0x76a   : > { %v5761_v33 = vadd.f32 %v3418_v23, %v5710_v37  ;;  %v2445_v10 = vpop.f32.mrb[61].mxu0 }
 0x76b   : > { %v5764_v54 = vadd.f32 %v2445_v10, %v5710_v37 }
 0x76c   : > { %2570 = vmax.xlane.f32.xlu1 %v5761_v33 }
 0x76d   : > { %2568 = vmax.xlane.f32.xlu0 %v5764_v54 }
 0x771   : > { %v3421_v26 = vpop.f32.mrb[62].mxu0 }
 0x772   : > { %v5769_v57 = vadd.f32 %v3421_v26, %v5710_v37  ;;  %v2455_v24 = vpop.f32.mrb[63].mxu0 }
 0x773   : > { %v5772_v25 = vadd.f32 %v2455_v24, %v5710_v37 }
 0x774   : > { %2574 = vmax.xlane.f32.xlu1 %v5769_v57 }
 0x775   : > { %2572 = vmax.xlane.f32.xlu0 %v5772_v25 }
 0x779   : > { %v3424_v49 = vpop.f32.mrb[64].mxu0 }
 0x77a   : > { %v5777_v31 = vadd.f32 %v3424_v49, %v5710_v37  ;;  %v2465_v42 = vpop.f32.mrb[65].mxu0 }
 0x77b   : > { %v5780_v59 = vadd.f32 %v2465_v42, %v5710_v37 }
 0x77c   : > { %2578 = vmax.xlane.f32.xlu1 %v5777_v31 }
 0x77d   : > { %2576 = vmax.xlane.f32.xlu0 %v5780_v59 }
 0x781   : > { %v3427_v55 = vpop.f32.mrb[66].mxu0 }
 0x782   : > { %v5785_v32 = vadd.f32 %v3427_v55, %v5710_v37  ;;  %v2475_v53 = vpop.f32.mrb[67].mxu0 }
 0x783   : > { %v5788_v22 = vadd.f32 %v2475_v53, %v5710_v37 }
 0x784   : > { %2582 = vmax.xlane.f32.xlu1 %v5785_v32 }
 0x785   : > { %2580 = vmax.xlane.f32.xlu0 %v5788_v22 }
 0x789   : > { %v3430_v11 = vpop.f32.mrb[68].mxu0 }
 0x78a   : > { %v5793_v27 = vadd.f32 %v3430_v11, %v5710_v37  ;;  %v2485_v23 = vpop.f32.mrb[69].mxu0 }
 0x78b   : > { %v5796_v10 = vadd.f32 %v2485_v23, %v5710_v37 }
 0x78c   : > { %2586 = vmax.xlane.f32.xlu1 %v5793_v27 }
 0x78d   : > { %2584 = vmax.xlane.f32.xlu0 %v5796_v10 }
 0x792   : > { %v3433_v26 = vpop.f32.mrb[70].mxu0 }
 0x793   : > { %v5801_v24 = vadd.f32 %v3433_v26, %v5710_v37  ;;  %v2495_v49 = vpop.f32.mrb[71].mxu0 }
 0x794   : > { %v5804_v42 = vadd.f32 %v2495_v49, %v5710_v37 }
 0x795   : > { %2590 = vmax.xlane.f32.xlu1 %v5801_v24 }
 0x796   : > { %2588 = vmax.xlane.f32.xlu0 %v5804_v42  ;;  %v3436_v55 = vpop.f32.mrb[72].mxu0 }
 0x797   : > { %v5809_v53 = vadd.f32 %v3436_v55, %v5710_v37  ;;  %v2505_v11 = vpop.f32.mrb[73].mxu0 }
 0x798   : > { %v5812_v23 = vadd.f32 %v2505_v11, %v5710_v37 }
 0x799   : > { %2594 = vmax.xlane.f32.xlu1 %v5809_v53 }
 0x79a   : > { %2592 = vmax.xlane.f32.xlu0 %v5812_v23  ;;  %v3439_v26 = vpop.f32.mrb[74].mxu0 }
 0x79b   : > { %v5817_v49 = vadd.f32 %v3439_v26, %v5710_v37  ;;  %v2515_v4 = vpop.f32.mrb[75].mxu0 }
 0x79c   : > { %v5820_v63 = vadd.f32 %v2515_v4, %v5710_v37 }
 0x79d   : > { %2598 = vmax.xlane.f32.xlu1 %v5817_v49 }
 0x79e   : > { %2596 = vmax.xlane.f32.xlu0 %v5820_v63  ;;  %v3442_v55 = vpop.f32.mrb[76].mxu0 }
 0x79f   : > { %v5825_v11 = vadd.f32 %v3442_v55, %v5710_v37  ;;  %v2525_v15 = vpop.f32.mrb[77].mxu0 }
 0x7a0   : > { %v5828_v7 = vadd.f32 %v2525_v15, %v5710_v37 }
 0x7a1   : > { %2602 = vmax.xlane.f32.xlu1 %v5825_v11 }
 0x7a2   : > { %2600 = vmax.xlane.f32.xlu0 %v5828_v7  ;;  %v3445_v26 = vpop.f32.mrb[78].mxu0 }
 0x7a3   : > { %v5833_v4 = vadd.f32 %v3445_v26, %v5710_v37  ;;  %v2535_v38 = vpop.f32.mrb[79].mxu0 }
 0x7a4   : > { %v5836_v47 = vadd.f32 %v2535_v38, %v5710_v37 }
 0x7a5   : > { %2606 = vmax.xlane.f32.xlu1 %v5833_v4 }
 0x7a6   : > { %2604 = vmax.xlane.f32.xlu0 %v5836_v47 }
 0x7c9   : > { %v2547_v55 = vpop.xlane.xlu1 %2546 }
 0x7ca   : > { %v2609_v15 = vsub.f32 %v5713_v0, %v2547_v55  ;;  %v2545_v8 = vpop.xlane.xlu0 %2544 }
 0x7cb   : > { %v2608_v62 = vsub.f32 %v5716_v34, %v2545_v8 }
 0x7cc   : > { %v2642_v44 = vmul.f32 1.442695, %v2609_v15 }
 0x7cd   : > { %v2640_v56 = vmul.f32 1.442695, %v2608_v62 }
 0x7ce   : > { %3983 = vpow2.f32 %v2642_v44 }
 0x7cf   : > { %3985 = vpow2.f32 %v2640_v56 }
 0x7d1   : > { %v2551_v26 = vpop.xlane.xlu1 %2550 }
 0x7d2   : > { %v2611_v58 = vsub.f32 %v5721_v41, %v2551_v26  ;;  %v2549_v9 = vpop.xlane.xlu0 %2548 }
 0x7d3   : > { %v2610_v38 = vsub.f32 %v5724_v3, %v2549_v9 }
 0x7d4   : > { %v2646_v37 = vmul.f32 1.442695, %v2611_v58 }
 0x7d5   : > { %v2644_v2 = vmul.f32 1.442695, %v2610_v38 }
 0x7d6   : > { %3987 = vpow2.f32 %v2646_v37 }
 0x7d7   : > { %3989 = vpow2.f32 %v2644_v2 }
 0x7d8   : > { %v5844_v40 = vpop.eup %3983 }
 0x7d9   : > { %v5846_v0 = vpop.eup %3985  ;;  %2706 = vadd.xlane.f32.xlu1 %v5844_v40  ;;  %v2555_v8 = vpop.xlane.xlu1 %2554 }
 0x7da   : > { %v2613_v44 = vsub.f32 %v5729_v35, %v2555_v8  ;;  %v2553_v56 = vpop.xlane.xlu0 %2552  ;;  %2704 = vadd.xlane.f32.xlu0 %v5846_v0 }
 0x7db   : > { %v2612_v62 = vsub.f32 %v5732_v51, %v2553_v56 }
 0x7dc   : > { %v2650_v34 = vmul.f32 1.442695, %v2613_v44 }
 0x7dd   : > { %v2648_v9 = vmul.f32 1.442695, %v2612_v62 }
 0x7de   : > { %3991 = vpow2.f32 %v2650_v34 }
 0x7df   : > { %3993 = vpow2.f32 %v2648_v9 }
 0x7e0   : > { %v5852_v58 = vpop.eup %3987 }
 0x7e1   : > { %v5854_v2 = vpop.eup %3989  ;;  %2710 = vadd.xlane.f32.xlu1 %v5852_v58  ;;  %v2559_v41 = vpop.xlane.xlu1 %2558 }
 0x7e2   : > { %v2615_v3 = vsub.f32 %v5737_v19, %v2559_v41  ;;  %v2557_v55 = vpop.xlane.xlu0 %2556  ;;  %2708 = vadd.xlane.f32.xlu0 %v5854_v2 }
 0x7e3   : > { %v2614_v35 = vsub.f32 %v5740_v16, %v2557_v55 }
 0x7e4   : > { %v2654_v15 = vmul.f32 1.442695, %v2615_v3 }
 0x7e5   : > { %v2652_v51 = vmul.f32 1.442695, %v2614_v35 }
 0x7e6   : > { %3995 = vpow2.f32 %v2654_v15 }
 0x7e7   : > { %3997 = vpow2.f32 %v2652_v51 }
 0x7e8   : > { %v5860_v26 = vpop.eup %3991 }
 0x7e9   : > { %v5862_v38 = vpop.eup %3993  ;;  %2714 = vadd.xlane.f32.xlu1 %v5860_v26  ;;  %v2563_v37 = vpop.xlane.xlu1 %2562 }
 0x7ea   : > { %v2617_v8 = vsub.f32 %v5745_v13, %v2563_v37  ;;  %v2561_v44 = vpop.xlane.xlu0 %2560  ;;  %2712 = vadd.xlane.f32.xlu0 %v5862_v38 }
 0x7eb   : > { %v2616_v19 = vsub.f32 %v5748_v1, %v2561_v44 }
 0x7ec   : > { %v2658_v56 = vmul.f32 1.442695, %v2617_v8 }
 0x7ed   : > { %v2656_v16 = vmul.f32 1.442695, %v2616_v19 }
 0x7ee   : > { %3999 = vpow2.f32 %v2658_v56 }
 0x7ef   : > { %4001 = vpow2.f32 %v2656_v16 }
 0x7f0   : > { %v5868_v62 = vpop.eup %3995 }
 0x7f1   : > { %v5870_v34 = vpop.eup %3997  ;;  %2718 = vadd.xlane.f32.xlu1 %v5868_v62  ;;  %v2567_v9 = vpop.xlane.xlu1 %2566 }
 0x7f2   : > { %v2619_v41 = vsub.f32 %v5753_v21, %v2567_v9  ;;  %v2565_v3 = vpop.xlane.xlu0 %2564  ;;  %2716 = vadd.xlane.f32.xlu0 %v5870_v34 }
 0x7f3   : > { %v2618_v13 = vsub.f32 %v5756_v39, %v2565_v3 }
 0x7f4   : > { %v2662_v55 = vmul.f32 1.442695, %v2619_v41 }
 0x7f5   : > { %v2660_v1 = vmul.f32 1.442695, %v2618_v13 }
 0x7f6   : > { %4003 = vpow2.f32 %v2662_v55 }
 0x7f7   : > { %4005 = vpow2.f32 %v2660_v1 }
 0x7f8   : > { %v5876_v35 = vpop.eup %3999 }
 0x7f9   : > { %v5878_v15 = vpop.eup %4001  ;;  %2722 = vadd.xlane.f32.xlu1 %v5876_v35  ;;  %v2571_v51 = vpop.xlane.xlu1 %2570 }
 0x7fa   : > { %v2621_v37 = vsub.f32 %v5761_v33, %v2571_v51  ;;  %v2569_v8 = vpop.xlane.xlu0 %2568  ;;  %2720 = vadd.xlane.f32.xlu0 %v5878_v15 }
 0x7fb   : > { %v2620_v21 = vsub.f32 %v5764_v54, %v2569_v8 }
 0x7fc   : > { %v2666_v44 = vmul.f32 1.442695, %v2621_v37 }
 0x7fd   : > { %v2664_v39 = vmul.f32 1.442695, %v2620_v21 }
 0x7fe   : > { %4007 = vpow2.f32 %v2666_v44 }
 0x7ff   : > { %4009 = vpow2.f32 %v2664_v39 }
 0x800   : > { %v5884_v19 = vpop.eup %4003 }
 0x801   : > { %v5886_v56 = vpop.eup %4005  ;;  %2726 = vadd.xlane.f32.xlu1 %v5884_v19  ;;  %v2575_v16 = vpop.xlane.xlu1 %2574 }
 0x802   : > { %v2623_v9 = vsub.f32 %v5769_v57, %v2575_v16  ;;  %v2573_v41 = vpop.xlane.xlu0 %2572  ;;  %2724 = vadd.xlane.f32.xlu0 %v5886_v56 }
 0x803   : > { %v2622_v33 = vsub.f32 %v5772_v25, %v2573_v41 }
 0x804   : > { %v2670_v3 = vmul.f32 1.442695, %v2623_v9 }
 0x805   : > { %v2668_v54 = vmul.f32 1.442695, %v2622_v33 }
 0x806   : > { %4011 = vpow2.f32 %v2670_v3 }
 0x807   : > { %4013 = vpow2.f32 %v2668_v54 }
 0x808   : > { %v5892_v13 = vpop.eup %4007 }
 0x809   : > { %v5894_v55 = vpop.eup %4009  ;;  %2730 = vadd.xlane.f32.xlu1 %v5892_v13  ;;  %v2579_v1 = vpop.xlane.xlu1 %2578 }
 0x80a   : > { %v2625_v51 = vsub.f32 %v5777_v31, %v2579_v1  ;;  %v2577_v37 = vpop.xlane.xlu0 %2576  ;;  %2728 = vadd.xlane.f32.xlu0 %v5894_v55 }
 0x80b   : > { %v2624_v57 = vsub.f32 %v5780_v59, %v2577_v37 }
 0x80c   : > { %v2674_v8 = vmul.f32 1.442695, %v2625_v51 }
 0x80d   : > { %v2672_v25 = vmul.f32 1.442695, %v2624_v57 }
 0x80e   : > { %4015 = vpow2.f32 %v2674_v8 }
 0x80f   : > { %4017 = vpow2.f32 %v2672_v25 }
 0x810   : > { %v5900_v21 = vpop.eup %4011 }
 0x811   : > { %v5902_v44 = vpop.eup %4013  ;;  %2734 = vadd.xlane.f32.xlu1 %v5900_v21  ;;  %v2583_v39 = vpop.xlane.xlu1 %2582 }
 0x812   : > { %v2627_v16 = vsub.f32 %v5785_v32, %v2583_v39  ;;  %v2581_v9 = vpop.xlane.xlu0 %2580  ;;  %2732 = vadd.xlane.f32.xlu0 %v5902_v44 }
 0x813   : > { %v2626_v31 = vsub.f32 %v5788_v22, %v2581_v9 }
 0x814   : > { %v2678_v41 = vmul.f32 1.442695, %v2627_v16 }
 0x815   : > { %v2676_v59 = vmul.f32 1.442695, %v2626_v31 }
 0x816   : > { %4019 = vpow2.f32 %v2678_v41 }
 0x817   : > { %4021 = vpow2.f32 %v2676_v59 }
 0x818   : > { %v5908_v33 = vpop.eup %4015 }
 0x819   : > { %v5910_v3 = vpop.eup %4017  ;;  %2738 = vadd.xlane.f32.xlu1 %v5908_v33  ;;  %v2587_v54 = vpop.xlane.xlu1 %2586 }
 0x81a   : > { %v2629_v1 = vsub.f32 %v5793_v27, %v2587_v54  ;;  %v2585_v51 = vpop.xlane.xlu0 %2584  ;;  %2736 = vadd.xlane.f32.xlu0 %v5910_v3 }
 0x81b   : > { %v2628_v32 = vsub.f32 %v5796_v10, %v2585_v51 }
 0x81c   : > { %v2682_v37 = vmul.f32 1.442695, %v2629_v1 }
 0x81d   : > { %v2680_v22 = vmul.f32 1.442695, %v2628_v32 }
 0x81e   : > { %4023 = vpow2.f32 %v2682_v37 }
 0x81f   : > { %4025 = vpow2.f32 %v2680_v22 }
 0x820   : > { %v5916_v57 = vpop.eup %4019 }
 0x821   : > { %v5918_v8 = vpop.eup %4021  ;;  %2742 = vadd.xlane.f32.xlu1 %v5916_v57 }
 0x822   : > { %v2591_v25 = vpop.xlane.xlu1 %2590  ;;  %2740 = vadd.xlane.f32.xlu0 %v5918_v8 }
 0x823   : > { %v2631_v27 = vsub.f32 %v5801_v24, %v2591_v25  ;;  %v2589_v39 = vpop.xlane.xlu0 %2588 }
 0x824   : > { %v2630_v16 = vsub.f32 %v5804_v42, %v2589_v39 }
 0x825   : > { %v2686_v9 = vmul.f32 1.442695, %v2631_v27 }
 0x826   : > { %v2684_v10 = vmul.f32 1.442695, %v2630_v16  ;;  %v2595_v31 = vpop.xlane.xlu1 %2594 }
 0x827   : > { %4027 = vpow2.f32 %v2686_v9  ;;  %v2633_v41 = vsub.f32 %v5809_v53, %v2595_v31  ;;  %v2593_v59 = vpop.xlane.xlu0 %2592 }
 0x828   : > { %v5925_v54 = vpop.eup %4023  ;;  %4029 = vpow2.f32 %v2684_v10  ;;  %v2632_v1 = vsub.f32 %v5812_v23, %v2593_v59 }
 0x829   : > { %v5928_v51 = vpop.eup %4025  ;;  %v2690_v32 = vmul.f32 1.442695, %v2633_v41  ;;  %2746 = vadd.xlane.f32.xlu1 %v5925_v54 }
 0x82a   : > { %v2688_v24 = vmul.f32 1.442695, %v2632_v1  ;;  %v2599_v37 = vpop.xlane.xlu1 %2598  ;;  %2744 = vadd.xlane.f32.xlu0 %v5928_v51 }
 0x82b   : > { %4031 = vpow2.f32 %v2690_v32  ;;  %v2635_v42 = vsub.f32 %v5817_v49, %v2599_v37  ;;  %v2597_v22 = vpop.xlane.xlu0 %2596 }
 0x82c   : > { %4033 = vpow2.f32 %v2688_v24  ;;  %v2634_v53 = vsub.f32 %v5820_v63, %v2597_v22 }
 0x82d   : > { %v2694_v25 = vmul.f32 1.442695, %v2635_v42 }
 0x82e   : > { %v2692_v27 = vmul.f32 1.442695, %v2634_v53  ;;  %v2603_v39 = vpop.xlane.xlu1 %2602 }
 0x82f   : > { %4035 = vpow2.f32 %v2694_v25  ;;  %v2637_v23 = vsub.f32 %v5825_v11, %v2603_v39  ;;  %v2601_v16 = vpop.xlane.xlu0 %2600 }
 0x830   : > { %4037 = vpow2.f32 %v2692_v27  ;;  %v2636_v9 = vsub.f32 %v5828_v7, %v2601_v16  ;;  %v4113_v16 = vld [vmem:[%s6114_s2] sm:$0x1f] }
 0x831   : > { %v5936_v10 = vpop.eup %4027  ;;  %v2698_v31 = vmul.f32 1.442695, %v2637_v23  ;;  %v2834_v23 = vsub.s32 4, %v4461_v30 }
 0x832   : > { %v5938_v41 = vpop.eup %4029  ;;  %v2696_v49 = vmul.f32 1.442695, %v2636_v9  ;;  %2750 = vadd.xlane.f32.xlu1 %v5936_v10  ;;  %v2607_v59 = vpop.xlane.xlu1 %2606 }
 0x833   : > { %4039 = vpow2.f32 %v2698_v31  ;;  %v2639_v63 = vsub.f32 %v5833_v4, %v2607_v59  ;;  %2748 = vadd.xlane.f32.xlu0 %v5938_v41  ;;  %v2605_v1 = vpop.xlane.xlu0 %2604  ;;  %v5972_v9 = vrot.slane %v4113_v16, %v2834_v23 }
 0x834   : > { %4041 = vpow2.f32 %v2696_v49  ;;  %v2638_v11 = vsub.f32 %v5836_v47, %v2605_v1 }
 0x835   : > { %v5944_v32 = vpop.eup %4031  ;;  %v2702_v7 = vmul.f32 1.442695, %v2639_v63  ;;  %v2837_v1 = vmul.f32 %v5972_v9, %v5584_v60  ;;  %v2836_v30 = vmul.f32 %v5972_v9, %v5581_v28  ;;  %v2839_v16 = vmul.f32 %v5972_v9, %v5592_v17 }
 0x836   : > { %v5946_v24 = vpop.eup %4033  ;;  %v2700_v37 = vmul.f32 1.442695, %v2638_v11  ;;  %2754 = vadd.xlane.f32.xlu1 %v5944_v32  ;;  %v2838_v28 = vmul.f32 %v5972_v9, %v5589_v46  ;;  %v2841_v17 = vmul.f32 %v5972_v9, %v5600_v52  ;;  %v2840_v46 = vmul.f32 %v5972_v9, %v5597_v48 }
 0x837   : > { %4043 = vpow2.f32 %v2702_v7  ;;  %2752 = vadd.xlane.f32.xlu0 %v5946_v24  ;;  %v2843_v52 = vmul.f32 %v5972_v9, %v5608_v14  ;;  %v2842_v48 = vmul.f32 %v5972_v9, %v5605_v5  ;;  %v2845_v14 = vmul.f32 %v5972_v9, %v5616_v6 }
 0x838   : > { %4045 = vpow2.f32 %v2700_v37  ;;  %v2844_v5 = vmul.f32 %v5972_v9, %v5613_v18  ;;  %v2847_v6 = vmul.f32 %v5972_v9, %v5624_v12  ;;  %v2846_v18 = vmul.f32 %v5972_v9, %v5621_v29 }
 0x839   : > { %v5950_v42 = vpop.eup %4035  ;;  %v2849_v12 = vmul.f32 %v5972_v9, %v5632_v36  ;;  %v2848_v29 = vmul.f32 %v5972_v9, %v5629_v20  ;;  %v2851_v36 = vmul.f32 %v5972_v9, %v5640_v61  ;;  %v2850_v20 = vmul.f32 %v5972_v9, %v5637_v45 }
 0x83a   : > { %v5952_v4 = vpop.eup %4037  ;;  %2758 = vadd.xlane.f32.xlu1 %v5950_v42  ;;  %v2853_v61 = vmul.f32 %v5972_v9, %v5648_v43  ;;  %v2852_v45 = vmul.f32 %v5972_v9, %v5645_v50  ;;  %v6179_v43 = vld [vmem:[#allocation19_spill] sm:$0xff]  ;;  %v6180_v50 = vld [vmem:[#allocation17_spill] sm:$0xff] }
 0x83b   : > { %2756 = vadd.xlane.f32.xlu0 %v5952_v4 }
 0x83d   : > { %v5956_v47 = vpop.eup %4039 }
 0x83e   : > { %v5958_v22 = vpop.eup %4041  ;;  %2762 = vadd.xlane.f32.xlu1 %v5956_v47 }
 0x83f   : > { %2760 = vadd.xlane.f32.xlu0 %v5958_v22 }
 0x841   : > { %v5962_v53 = vpop.eup %4043 }
 0x842   : > { %v5964_v25 = vpop.eup %4045  ;;  %2766 = vadd.xlane.f32.xlu1 %v5962_v53 }
 0x843   : > { %2764 = vadd.xlane.f32.xlu0 %v5964_v25 }
 0x866   : > { %v2707_v27 = vpop.xlane.xlu1 %2706 }
 0x867   : > { %4047 = vrcp.f32 %v2707_v27  ;;  %v2705_v39 = vpop.xlane.xlu0 %2704 }
 0x868   : > { %4049 = vrcp.f32 %v2705_v39 }
 0x86e   : > { %v2711_v31 = vpop.xlane.xlu1 %2710 }
 0x86f   : > { %4051 = vrcp.f32 %v2711_v31  ;;  %v2709_v49 = vpop.xlane.xlu0 %2708 }
 0x870   : > { %4053 = vrcp.f32 %v2709_v49 }
 0x871   : > { %v4048_v59 = vpop.eup %4047 }
 0x872   : > { %v4050_v63 = vpop.eup %4049  ;;  %v2801_v11 = vmul.f32 %v4048_v59, %v5844_v40 }
 0x873   : > { %v2800_v7 = vmul.f32 %v4050_v63, %v5846_v0 }
 0x874   : > { %v2869_v37 = vadd.f32 %v2837_v1, %v2801_v11 }
 0x875   : > { %v2868_v27 = vadd.f32 %v2836_v30, %v2800_v7 }
 0x876   : > { %2901 = vst [vmem:[%s5982_s7 + $0x8] sm:$0xff] %v2869_v37  ;;  %v2715_v60 = vpop.xlane.xlu1 %2714 }
 0x877   : > { %2900 = vst [vmem:[%s5982_s7] sm:$0xff] %v2868_v27  ;;  %4055 = vrcp.f32 %v2715_v60  ;;  %v2713_v40 = vpop.xlane.xlu0 %2712 }
 0x878   : > { %4057 = vrcp.f32 %v2713_v40 }
 0x879   : > { %v4052_v39 = vpop.eup %4051 }
 0x87a   : > { %v4054_v23 = vpop.eup %4053  ;;  %v2803_v31 = vmul.f32 %v4052_v39, %v5852_v58 }
 0x87b   : > { %v2802_v0 = vmul.f32 %v4054_v23, %v5854_v2 }
 0x87c   : > { %v2871_v49 = vadd.f32 %v2839_v16, %v2803_v31 }
 0x87d   : > { %v2870_v59 = vadd.f32 %v2838_v28, %v2802_v0 }
 0x87e   : > { %2903 = vst [vmem:[%s5982_s7 + $0x18] sm:$0xff] %v2871_v49  ;;  %v2719_v63 = vpop.xlane.xlu1 %2718 }
 0x87f   : > { %2902 = vst [vmem:[%s5982_s7 + $0x10] sm:$0xff] %v2870_v59  ;;  %4059 = vrcp.f32 %v2719_v63  ;;  %v2717_v1 = vpop.xlane.xlu0 %2716 }
 0x880   : > { %4061 = vrcp.f32 %v2717_v1 }
 0x881   : > { %v4056_v11 = vpop.eup %4055 }
 0x882   : > { %v4058_v30 = vpop.eup %4057  ;;  %v2805_v58 = vmul.f32 %v4056_v11, %v5860_v26 }
 0x883   : > { %v2804_v2 = vmul.f32 %v4058_v30, %v5862_v38 }
 0x884   : > { %v2873_v7 = vadd.f32 %v2841_v17, %v2805_v58 }
 0x885   : > { %v2872_v37 = vadd.f32 %v2840_v46, %v2804_v2 }
 0x886   : > { %2905 = vst [vmem:[%s5982_s7 + $0x28] sm:$0xff] %v2873_v7  ;;  %v2723_v27 = vpop.xlane.xlu1 %2722 }
 0x887   : > { %2904 = vst [vmem:[%s5982_s7 + $0x20] sm:$0xff] %v2872_v37  ;;  %4063 = vrcp.f32 %v2723_v27  ;;  %v2721_v60 = vpop.xlane.xlu0 %2720 }
 0x888   : > { %4065 = vrcp.f32 %v2721_v60 }
 0x889   : > { %v4060_v40 = vpop.eup %4059 }
 0x88a   : > { %v4062_v39 = vpop.eup %4061  ;;  %v2807_v26 = vmul.f32 %v4060_v40, %v5868_v62 }
 0x88b   : > { %v2806_v38 = vmul.f32 %v4062_v39, %v5870_v34 }
 0x88c   : > { %v2875_v23 = vadd.f32 %v2843_v52, %v2807_v26 }
 0x88d   : > { %v2874_v16 = vadd.f32 %v2842_v48, %v2806_v38 }
 0x88e   : > { %2907 = vst [vmem:[%s5982_s7 + $0x38] sm:$0xff] %v2875_v23  ;;  %v2727_v31 = vpop.xlane.xlu1 %2726 }
 0x88f   : > { %2906 = vst [vmem:[%s5982_s7 + $0x30] sm:$0xff] %v2874_v16  ;;  %4067 = vrcp.f32 %v2727_v31  ;;  %v2725_v28 = vpop.xlane.xlu0 %2724 }
 0x890   : > { %4069 = vrcp.f32 %v2725_v28 }
 0x891   : > { %v4064_v0 = vpop.eup %4063 }
 0x892   : > { %v4066_v49 = vpop.eup %4065  ;;  %v2809_v62 = vmul.f32 %v4064_v0, %v5876_v35 }
 0x893   : > { %v2808_v34 = vmul.f32 %v4066_v49, %v5878_v15 }
 0x894   : > { %v2877_v59 = vadd.f32 %v2845_v14, %v2809_v62 }
 0x895   : > { %v2876_v63 = vadd.f32 %v2844_v5, %v2808_v34 }
 0x896   : > { %2909 = vst [vmem:[%s5982_s7 + $0x48] sm:$0xff] %v2877_v59  ;;  %v2731_v1 = vpop.xlane.xlu1 %2730 }
 0x897   : > { %2908 = vst [vmem:[%s5982_s7 + $0x40] sm:$0xff] %v2876_v63  ;;  %4071 = vrcp.f32 %v2731_v1  ;;  %v2729_v11 = vpop.xlane.xlu0 %2728 }
 0x898   : > { %4073 = vrcp.f32 %v2729_v11 }
 0x899   : > { %v4068_v30 = vpop.eup %4067 }
 0x89a   : > { %v4070_v17 = vpop.eup %4069  ;;  %v2811_v35 = vmul.f32 %v4068_v30, %v5884_v19 }
 0x89b   : > { %v2810_v15 = vmul.f32 %v4070_v17, %v5886_v56 }
 0x89c   : > { %v2879_v58 = vadd.f32 %v2847_v6, %v2811_v35 }
 0x89d   : > { %v2878_v46 = vadd.f32 %v2846_v18, %v2810_v15  ;;  %v6181_v15 = vld [vmem:[#allocation21_spill] sm:$0xff] }
 0x89e   : > { %2911 = vst [vmem:[%s5982_s7 + $0x58] sm:$0xff] %v2879_v58  ;;  %v2735_v2 = vpop.xlane.xlu1 %2734 }
 0x89f   : > { %2910 = vst [vmem:[%s5982_s7 + $0x50] sm:$0xff] %v2878_v46  ;;  %4075 = vrcp.f32 %v2735_v2  ;;  %v2733_v7 = vpop.xlane.xlu0 %2732  ;;  %v6182_v46 = vld [vmem:[#allocation18_spill] sm:$0xff] }
 0x8a0   : > { %4077 = vrcp.f32 %v2733_v7 }
 0x8a1   : > { %v4072_v37 = vpop.eup %4071 }
 0x8a2   : > { %v4074_v27 = vpop.eup %4073  ;;  %v2813_v19 = vmul.f32 %v4072_v37, %v5892_v13 }
 0x8a3   : > { %v2812_v56 = vmul.f32 %v4074_v27, %v5894_v55 }
 0x8a4   : > { %v2881_v60 = vadd.f32 %v2849_v12, %v2813_v19 }
 0x8a5   : > { %v2880_v40 = vadd.f32 %v2848_v29, %v2812_v56 }
 0x8a6   : > { %2913 = vst [vmem:[%s5982_s7 + $0x68] sm:$0xff] %v2881_v60  ;;  %v2739_v39 = vpop.xlane.xlu1 %2738  ;;  %v6183_v60 = vld [vmem:[#allocation23_spill] sm:$0xff] }
 0x8a7   : > { %2912 = vst [vmem:[%s5982_s7 + $0x60] sm:$0xff] %v2880_v40  ;;  %4079 = vrcp.f32 %v2739_v39  ;;  %v2737_v52 = vpop.xlane.xlu0 %2736  ;;  %v2859_v40 = vmul.f32 %v5972_v9, %v6183_v60 }
 0x8a8   : > { %4081 = vrcp.f32 %v2737_v52  ;;  %v6184_v52 = vld [vmem:[#allocation20_spill] sm:$0xff] }
 0x8a9   : > { %v4076_v26 = vpop.eup %4075 }
 0x8aa   : > { %v4078_v48 = vpop.eup %4077  ;;  %v2815_v13 = vmul.f32 %v4076_v26, %v5900_v21  ;;  %v2858_v26 = vmul.f32 %v5972_v9, %v6184_v52 }
 0x8ab   : > { %v2814_v55 = vmul.f32 %v4078_v48, %v5902_v44 }
 0x8ac   : > { %v2883_v38 = vadd.f32 %v2851_v36, %v2815_v13 }
 0x8ad   : > { %v2882_v23 = vadd.f32 %v2850_v20, %v2814_v55 }
 0x8ae   : > { %2915 = vst [vmem:[%s5982_s7 + $0x78] sm:$0xff] %v2883_v38  ;;  %v2743_v16 = vpop.xlane.xlu1 %2742 }
 0x8af   : > { %2914 = vst [vmem:[%s5982_s7 + $0x70] sm:$0xff] %v2882_v23  ;;  %4083 = vrcp.f32 %v2743_v16  ;;  %v2741_v31 = vpop.xlane.xlu0 %2740  ;;  %v6185_v23 = vld [vmem:[#allocation10_spill] sm:$0xff] }
 0x8b0   : > { %4085 = vrcp.f32 %v2741_v31  ;;  %v2861_v16 = vmul.f32 %v5972_v9, %v6185_v23 }
 0x8b1   : > { %v4080_v28 = vpop.eup %4079 }
 0x8b2   : > { %v4082_v0 = vpop.eup %4081  ;;  %v2817_v21 = vmul.f32 %v4080_v28, %v5908_v33  ;;  %v2855_v33 = vmul.f32 %v5972_v9, %v6179_v43  ;;  %v6186_v28 = vld [vmem:[#allocation22_spill] sm:$0xff] }
 0x8b3   : > { %v2816_v44 = vmul.f32 %v4082_v0, %v5910_v3  ;;  %v2854_v3 = vmul.f32 %v5972_v9, %v6180_v50  ;;  %v2860_v0 = vmul.f32 %v5972_v9, %v6186_v28  ;;  %v6189_v50 = vld [vmem:[#allocation14_spill] sm:$0xff] }
 0x8b4   : > { %v2885_v49 = vadd.f32 %v2853_v61, %v2817_v21 }
 0x8b5   : > { %v2884_v14 = vadd.f32 %v2852_v45, %v2816_v44 }
 0x8b6   : > { %2917 = vst [vmem:[%s5982_s7 + $0x88] sm:$0xff] %v2885_v49  ;;  %v2747_v62 = vpop.xlane.xlu1 %2746 }
 0x8b7   : > { %2916 = vst [vmem:[%s5982_s7 + $0x80] sm:$0xff] %v2884_v14  ;;  %4087 = vrcp.f32 %v2747_v62  ;;  %v2745_v5 = vpop.xlane.xlu0 %2744  ;;  %v6187_v14 = vld [vmem:[#allocation12_spill] sm:$0xff] }
 0x8b8   : > { %4089 = vrcp.f32 %v2745_v5  ;;  %v6188_v5 = vld [vmem:[#allocation9_spill] sm:$0xff] }
 0x8b9   : > { %v4084_v34 = vpop.eup %4083 }
 0x8ba   : > { %v4086_v59 = vpop.eup %4085  ;;  %v2819_v63 = vmul.f32 %v4084_v34, %v5916_v57  ;;  %v2857_v57 = vmul.f32 %v5972_v9, %v6181_v15  ;;  %v2862_v34 = vmul.f32 %v5972_v9, %v6188_v5 }
 0x8bb   : > { %v2818_v1 = vmul.f32 %v4086_v59, %v5918_v8  ;;  %v2856_v8 = vmul.f32 %v5972_v9, %v6182_v46 }
 0x8bc   : > { %v2887_v11 = vadd.f32 %v2855_v33, %v2819_v63 }
 0x8bd   : > { %v2886_v30 = vadd.f32 %v2854_v3, %v2818_v1  ;;  %v2865_v3 = vmul.f32 %v5972_v9, %v6189_v50 }
 0x8be   : > { %2919 = vst [vmem:[%s5982_s7 + $0x98] sm:$0xff] %v2887_v11  ;;  %v6190_v11 = vld [vmem:[#allocation11_spill] sm:$0xff] }
 0x8bf   : > { %2918 = vst [vmem:[%s5982_s7 + $0x90] sm:$0xff] %v2886_v30  ;;  %v2751_v17 = vpop.xlane.xlu1 %2750 }
 0x8c0   : > { %4091 = vrcp.f32 %v2751_v17  ;;  %v2749_v6 = vpop.xlane.xlu0 %2748 }
 0x8c1   : > { %v4088_v35 = vpop.eup %4087  ;;  %4093 = vrcp.f32 %v2749_v6 }
 0x8c2   : > { %v4090_v18 = vpop.eup %4089  ;;  %v2821_v58 = vmul.f32 %v4088_v35, %v5925_v54 }
 0x8c3   : > { %v2820_v2 = vmul.f32 %v4090_v18, %v5928_v51  ;;  %v2755_v7 = vpop.xlane.xlu1 %2754  ;;  %v6191_v18 = vld [vmem:[#allocation16_spill] sm:$0xff] }
 0x8c4   : > { %v2889_v37 = vadd.f32 %v2857_v57, %v2821_v58  ;;  %4095 = vrcp.f32 %v2755_v7  ;;  %v2753_v27 = vpop.xlane.xlu0 %2752  ;;  %v2867_v15 = vmul.f32 %v5972_v9, %v6191_v18  ;;  %v6192_v58 = vld [vmem:[#allocation13_spill] sm:$0xff] }
 0x8c5   : > { %v2888_v12 = vadd.f32 %v2856_v8, %v2820_v2  ;;  %4097 = vrcp.f32 %v2753_v27 }
 0x8c6   : > { %2921 = vst [vmem:[%s5982_s7 + $0xa8] sm:$0xff] %v2889_v37 }
 0x8c7   : > { %2920 = vst [vmem:[%s5982_s7 + $0xa0] sm:$0xff] %v2888_v12  ;;  %v2759_v19 = vpop.xlane.xlu1 %2758 }
 0x8c8   : > { %4099 = vrcp.f32 %v2759_v19  ;;  %v2757_v29 = vpop.xlane.xlu0 %2756 }
 0x8c9   : > { %4101 = vrcp.f32 %v2757_v29 }
 0x8ca   : > { %v4092_v56 = vpop.eup %4091 }
 0x8cb   : > { %v4094_v54 = vpop.eup %4093  ;;  %v2823_v51 = vmul.f32 %v4092_v56, %v5936_v10  ;;  %v2763_v39 = vpop.xlane.xlu1 %2762 }
 0x8cc   : > { %v2822_v48 = vmul.f32 %v4094_v54, %v5938_v41  ;;  %4103 = vrcp.f32 %v2763_v39  ;;  %v2761_v36 = vpop.xlane.xlu0 %2760 }
 0x8cd   : > { %v2891_v13 = vadd.f32 %v2859_v40, %v2823_v51  ;;  %4105 = vrcp.f32 %v2761_v36 }
 0x8ce   : > { %v4096_v20 = vpop.eup %4095  ;;  %v2890_v55 = vadd.f32 %v2858_v26, %v2822_v48 }
 0x8cf   : > { %v4098_v38 = vpop.eup %4097  ;;  %2923 = vst [vmem:[%s5982_s7 + $0xb8] sm:$0xff] %v2891_v13  ;;  %v2825_v10 = vmul.f32 %v4096_v20, %v5944_v32  ;;  %v2767_v31 = vpop.xlane.xlu1 %2766  ;;  %v2863_v32 = vmul.f32 %v5972_v9, %v6187_v14 }
 0x8d0   : > { %2922 = vst [vmem:[%s5982_s7 + $0xb0] sm:$0xff] %v2890_v55  ;;  %v2824_v41 = vmul.f32 %v4098_v38, %v5946_v24  ;;  %4107 = vrcp.f32 %v2767_v31  ;;  %v2765_v61 = vpop.xlane.xlu0 %2764 }
 0x8d1   : > { %v2893_v21 = vadd.f32 %v2861_v16, %v2825_v10  ;;  %4109 = vrcp.f32 %v2765_v61 }
 0x8d2   : > { %v4100_v45 = vpop.eup %4099  ;;  %v2892_v44 = vadd.f32 %v2860_v0, %v2824_v41 }
 0x8d3   : > { %v4102_v49 = vpop.eup %4101  ;;  %2925 = vst [vmem:[%s5982_s7 + $0xc8] sm:$0xff] %v2893_v21  ;;  %v2827_v62 = vmul.f32 %v4100_v45, %v5950_v42  ;;  %v2864_v42 = vmul.f32 %v5972_v9, %v6190_v11 }
 0x8d4   : > { %2924 = vst [vmem:[%s5982_s7 + $0xc0] sm:$0xff] %v2892_v44  ;;  %v2826_v24 = vmul.f32 %v4102_v49, %v5952_v4 }
 0x8d5   : > { %v2895_v59 = vadd.f32 %v2863_v32, %v2827_v62 }
 0x8d6   : > { %v4104_v43 = vpop.eup %4103  ;;  %v2894_v33 = vadd.f32 %v2862_v34, %v2826_v24 }
 0x8d7   : > { %v4106_v63 = vpop.eup %4105  ;;  %2927 = vst [vmem:[%s5982_s7 + $0xd8] sm:$0xff] %v2895_v59  ;;  %v2829_v1 = vmul.f32 %v4104_v43, %v5956_v47  ;;  %v2866_v47 = vmul.f32 %v5972_v9, %v6192_v58 }
 0x8d8   : > { %2926 = vst [vmem:[%s5982_s7 + $0xd0] sm:$0xff] %v2894_v33  ;;  %v2828_v4 = vmul.f32 %v4106_v63, %v5958_v22 }
 0x8d9   : > { %v2897_v30 = vadd.f32 %v2865_v3, %v2829_v1 }
 0x8da   : > { %v4108_v17 = vpop.eup %4107  ;;  %v2896_v6 = vadd.f32 %v2864_v42, %v2828_v4 }
 0x8db   : > { %v4110_v35 = vpop.eup %4109  ;;  %2929 = vst [vmem:[%s5982_s7 + $0xe8] sm:$0xff] %v2897_v30  ;;  %v2831_v57 = vmul.f32 %v4108_v17, %v5962_v53 }
 0x8dc   : > { %2928 = vst [vmem:[%s5982_s7 + $0xe0] sm:$0xff] %v2896_v6  ;;  %v2830_v46 = vmul.f32 %v4110_v35, %v5964_v25 }
 0x8dd   : > { %v2899_v8 = vadd.f32 %v2867_v15, %v2831_v57 }
 0x8de   : > { %v2898_v2 = vadd.f32 %v2866_v47, %v2830_v46 }
 0x8df   : > { %2931 = vst [vmem:[%s5982_s7 + $0xf8] sm:$0xff] %v2899_v8 }
 0x8e0   : > { %2930 = vst [vmem:[%s5982_s7 + $0xf0] sm:$0xff] %v2898_v2 }
 0x8e1 PF: > { %s16_s20 = sadd.s32 1, %s4120_s20  }
 0x8e2   : > { %p13_p4 = scmp.ge.s32.totalorder %s16_s20, 4  }
 0x8e4   :  { %15 = sbr.rel (!%p13_p4) target bundleno = 3 (0x3), region = 130 }

</bundles_post_ra>
